<compile_context>
chip_gen: v5e
topology: v5e:2x2
jax: 0.10.0
libtpu: 0.0.40
codegen_flags: <defaults>
</compile_context>

<pallas_src>
import functools

import jax
import jax.numpy as jnp
from jax.experimental import pallas as pl
from jax.experimental.pallas import tpu as pltpu

LRELU_SLOPE = 0.2
BN_EPS = 1e-5


# ---------------------------------------------------------------------------
# Conv stage kernel: (optional fused BN+LeakyReLU of the previous stage on the
# input) -> 3x3 conv (stride 1 or 2) via one merged (Ho*Wo, 9*Cin) MXU matmul
# -> raw conv output (bf16) + per-batch per-channel [sum, sumsq] stats.
# Grid = (N,): one whole image per grid step.
# ---------------------------------------------------------------------------
def _conv_stage_kernel(x_ref, w_ref, scale_ref, shift_ref, y_ref, stats_ref,
                       pad_ref, *phase_refs, stride, fuse_act):
    """One grid step = one batch element.

    x_ref     : (H, W, Cin)           stage input (raw conv of previous stage
                                      when fuse_act=True)
    w_ref     : (9*Cin, Cout)   bf16  conv weight, taps flattened kh*3+kw
    scale_ref : (1, 1, Cin)     f32   folded BN scale of previous stage
    shift_ref : (1, 1, Cin)     f32   folded BN shift of previous stage
    y_ref     : (Ho, Wo, Cout)  bf16  raw conv output of this stage
    stats_ref : (2, Cout)       f32   per-batch [sum; sumsq] of conv output
    pad_ref   : (H+2, W+2, Cin) f32   VMEM scratch: zero halo + (activated) input
    phase_refs: stride-2 only: even/odd row-phase VMEM scratch
    """
    h, w, cin = x_ref.shape
    ho, wo, cout = y_ref.shape

    # ---- zero-padded (optionally pre-activated) input in VMEM -------------
    # The halo must stay exactly zero: Conv2d(padding=1) pads the *activated*
    # tensor, so the fused BN+LeakyReLU is applied to the interior only.
    xin = x_ref[...].astype(jnp.float32)
    if fuse_act:
        z = xin * scale_ref[...] + shift_ref[...]
        xin = jnp.where(z >= 0, z, LRELU_SLOPE * z)
    zcol = jnp.zeros((h, 1, cin), jnp.float32)
    xin = jnp.concatenate([zcol, xin, zcol], axis=1)          # W halo
    pad_ref[...] = jnp.zeros(pad_ref.shape, pad_ref.dtype)    # H halo rows
    pad_ref[1:h + 1, :, :] = xin

    # ---- gather the nine taps, merged into one (Ho*Wo, 9*Cin) patch -------
    taps = []
    if stride == 1:
        for kh in range(3):
            for kw in range(3):
                taps.append(pad_ref[kh:kh + ho, kw:kw + wo, :])
    else:  # stride == 2: split rows by parity, then strided reads along W.
        even_ref, odd_ref = phase_refs
        even_ref[...] = pad_ref[pl.ds(0, ho + 1, 2), :, :]    # rows 0,2,...,2*ho
        odd_ref[...] = pad_ref[pl.ds(1, ho, 2), :, :]         # rows 1,3,...,2*ho-1
        row_src = ((even_ref, 0), (odd_ref, 0), (even_ref, 1))
        for kh in range(3):
            src, r0 = row_src[kh]
            for kw in range(3):
                taps.append(src[r0:r0 + ho, pl.ds(kw, wo, 2), :])
    patch = jnp.concatenate(taps, axis=-1).reshape(ho * wo, 9 * cin)

    # ---- single fat MXU matmul, f32 accumulation ---------------------------
    acc = jnp.dot(patch.astype(jnp.bfloat16), w_ref[...],
                  preferred_element_type=jnp.float32)          # (Ho*Wo, Cout)

    y_ref[...] = acc.reshape(ho, wo, cout).astype(y_ref.dtype)
    # Per-batch stats: sublane-slice stores, no concat, no resident accumulator.
    stats_ref[0:1, :] = jnp.sum(acc, axis=0, keepdims=True)
    stats_ref[1:2, :] = jnp.sum(acc * acc, axis=0, keepdims=True)


def _conv_stage(x_nhwc, w_taps, scale, shift, *, stride, fuse_act):
    n, h, w, cin = x_nhwc.shape
    cout = w_taps.shape[1]
    hp, wp = h + 2, w + 2
    ho = (h + 2 - 3) // stride + 1
    wo = (w + 2 - 3) // stride + 1

    scratch = [pltpu.VMEM((hp, wp, cin), jnp.float32)]
    if stride != 1:
        scratch += [pltpu.VMEM((ho + 1, wp, cin), jnp.float32),
                    pltpu.VMEM((ho, wp, cin), jnp.float32)]

    kernel = functools.partial(_conv_stage_kernel, stride=stride,
                               fuse_act=fuse_act)

    y, stats = pl.pallas_call(
        kernel,
        out_shape=(
            jax.ShapeDtypeStruct((n, ho, wo, cout), jnp.bfloat16),
            jax.ShapeDtypeStruct((n, 2, cout), jnp.float32),
        ),
        grid=(n,),
        in_specs=[
            pl.BlockSpec((None, h, w, cin), lambda b: (b, 0, 0, 0)),
            pl.BlockSpec((9 * cin, cout), lambda b: (0, 0)),
            pl.BlockSpec((1, 1, cin), lambda b: (0, 0, 0)),
            pl.BlockSpec((1, 1, cin), lambda b: (0, 0, 0)),
        ],
        out_specs=(
            pl.BlockSpec((None, ho, wo, cout), lambda b: (b, 0, 0, 0)),
            pl.BlockSpec((None, 2, cout), lambda b: (b, 0, 0)),
        ),
        scratch_shapes=scratch,
        compiler_params=pltpu.CompilerParams(
            dimension_semantics=("parallel",)),
    )(x_nhwc, w_taps, scale, shift)
    return y, stats


# ---------------------------------------------------------------------------
# Final BN affine + LeakyReLU (lane-dense elementwise pass).
# ---------------------------------------------------------------------------
def _bn_lrelu_kernel(y_ref, scale_ref, shift_ref, o_ref):
    # Load bf16, compute in f32 (keeps the VALU path clean on v5e), store f32.
    z = y_ref[...].astype(jnp.float32) * scale_ref[...] + shift_ref[...]
    o_ref[...] = jnp.where(z >= 0, z, LRELU_SLOPE * z)


def _bn_lrelu(y, scale, shift):
    """y: (M, Cout) bf16 raw conv output -> f32 lrelu(y*scale + shift)."""
    m, cout = y.shape
    # Lane-dense repack: fold k rows into the lane dim so the last dim is a
    # multiple of 128 (full vector loads/stores instead of masked partials).
    k = 1
    if 128 % cout == 0 and m % (128 // cout) == 0:
        k = 128 // cout
    rows = m // k
    y2 = y.reshape(rows, k * cout)
    scale2 = jnp.tile(scale.reshape(1, cout), (1, k))
    shift2 = jnp.tile(shift.reshape(1, cout), (1, k))
    tm = rows if rows <= 512 else 512

    out = pl.pallas_call(
        _bn_lrelu_kernel,
        out_shape=jax.ShapeDtypeStruct((rows, k * cout), jnp.float32),
        grid=(pl.cdiv(rows, tm),),
        in_specs=[
            pl.BlockSpec((tm, k * cout), lambda i: (i, 0)),
            pl.BlockSpec((1, k * cout), lambda i: (0, 0)),
            pl.BlockSpec((1, k * cout), lambda i: (0, 0)),
        ],
        out_specs=pl.BlockSpec((tm, k * cout), lambda i: (i, 0)),
        compiler_params=pltpu.CompilerParams(
            dimension_semantics=("parallel",)),
    )(y2, scale2, shift2)
    return out.reshape(m, cout)


# ---------------------------------------------------------------------------
# Wrapper glue.
# ---------------------------------------------------------------------------
def _fold_bn(stats, gamma, beta, count):
    """Fold training-mode BN (biased batch stats) into a per-channel scale/shift."""
    s = jnp.sum(stats[:, 0, :], axis=0)
    sq = jnp.sum(stats[:, 1, :], axis=0)
    mean = s / count
    var = jnp.maximum(sq / count - mean * mean, 0.0)
    inv = jax.lax.rsqrt(var + BN_EPS)
    scale = gamma.astype(jnp.float32) * inv
    shift = beta.astype(jnp.float32) - mean * scale
    return scale, shift


def _prep_weight(w_oihw):
    """(Cout, Cin, 3, 3) -> (9*Cin, Cout) bf16, tap-major (kh*3+kw)."""
    cout, cin = w_oihw.shape[0], w_oihw.shape[1]
    return jnp.transpose(w_oihw, (2, 3, 1, 0)).reshape(9 * cin, cout).astype(
        jnp.bfloat16)


def discriminator_block(x_nchw, params):
    """Forward pass of DiscriminatorBlock. Input/output layout: NCHW, f32."""
    x = jnp.transpose(x_nchw, (0, 2, 3, 1))    # NCHW -> NHWC
    cin = x.shape[-1]
    c1 = params["w1"].shape[0]
    c2 = params["w2"].shape[0]

    wt1 = _prep_weight(params["w1"])           # (9*Cin, C1) bf16
    wt2 = _prep_weight(params["w2"])           # (9*C1,  C2) bf16

    # Conv biases cb1/cb2 are intentionally not applied: training-mode BN's
    # mean subtraction cancels a constant per-channel bias exactly.

    # Stage 1: conv (stride 1), no fused pre-activation (raw network input).
    dummy = jnp.zeros((1, 1, cin), jnp.float32)
    y1, st1 = _conv_stage(x, wt1, dummy, dummy, stride=1, fuse_act=False)
    n1, h1, w1, _ = y1.shape
    scale1, shift1 = _fold_bn(st1, params["g1"], params["b1"],
                              jnp.float32(n1 * h1 * w1))

    # Stage 2: conv (stride 2) with stage-1 BN + LeakyReLU fused into the load.
    y2, st2 = _conv_stage(y1, wt2, scale1.reshape(1, 1, c1),
                          shift1.reshape(1, 1, c1), stride=2, fuse_act=True)
    n2, h2, w2, _ = y2.shape
    scale2, shift2 = _fold_bn(st2, params["g2"], params["b2"],
                              jnp.float32(n2 * h2 * w2))

    # Stage 2 BN + LeakyReLU (lane-dense elementwise pass, f32 output).
    out = _bn_lrelu(y2.reshape(n2 * h2 * w2, c2), scale2, shift2)
    out = out.reshape(n2, h2, w2, c2)
    return jnp.transpose(out, (0, 3, 1, 2))    # NHWC -> NCHW


# ---------------- pure-JAX reference (for correctness check) ----------------
def _reference(x_nchw, params):
    def stage(x, w, cb, g, b, stride):
        y = jax.lax.conv_general_dilated(
            x, w, (stride, stride), ((1, 1), (1, 1)),
            dimension_numbers=("NCHW", "OIHW", "NCHW"),
            precision=jax.lax.Precision.HIGHEST)
        y = y + cb[None, :, None, None]
        mean = jnp.mean(y, axis=(0, 2, 3), keepdims=True)
        var = jnp.mean(jnp.square(y - mean), axis=(0, 2, 3), keepdims=True)
        z = (y - mean) * jax.lax.rsqrt(var + BN_EPS)
        z = z * g[None, :, None, None] + b[None, :, None, None]
        return jnp.where(z >= 0, z, LRELU_SLOPE * z)

    h = stage(x_nchw, params["w1"], params["cb1"], params["g1"], params["b1"], 1)
    h = stage(h, params["w2"], params["cb2"], params["g2"], params["b2"], 2)
    return h


def _init_params(key, features=4, double=True):
    out_features = features * 2 if double else features
    ks = jax.random.split(key, 8)
    params = {
        # Conv2d(features, features, 3, 1, 1)
        "w1": jax.random.normal(ks[0], (features, features, 3, 3), jnp.float32) * 0.1,
        "cb1": jax.random.normal(ks[1], (features,), jnp.float32) * 0.05,
        # BatchNorm2d(features)
        "g1": 1.0 + 0.1 * jax.random.normal(ks[2], (features,), jnp.float32),
        "b1": 0.1 * jax.random.normal(ks[3], (features,), jnp.float32),
        # Conv2d(features, out_features, 3, 2, 1)
        "w2": jax.random.normal(ks[4], (out_features, features, 3, 3), jnp.float32) * 0.1,
        "cb2": jax.random.normal(ks[5], (out_features,), jnp.float32) * 0.05,
        # BatchNorm2d(out_features)
        "g2": 1.0 + 0.1 * jax.random.normal(ks[6], (out_features,), jnp.float32),
        "b2": 0.1 * jax.random.normal(ks[7], (out_features,), jnp.float32),
    }
    return params


if __name__ == "__main__":
    key = jax.random.PRNGKey(0)
    k_x, k_p = jax.random.split(key)

    features = 4
    N, H, W = 2, 16, 16
    x = jax.random.normal(k_x, (N, features, H, W), jnp.float32)  # NCHW
    params = _init_params(k_p, features=features, double=True)

    fwd = jax.jit(discriminator_block)
    out = jax.block_until_ready(fwd(x, params))

    # Shape check: (N, 2*features, H//2, W//2)
    assert out.shape == (N, 2 * features, H // 2, W // 2), out.shape

    # Numerical check against a pure-JAX f32 reference of the PyTorch forward.
    # Tolerance accounts for bf16 MXU inputs and the bf16 intermediate
    # activations (vs the all-f32 reference).
    ref = jax.block_until_ready(_reference(x, params))
    max_err = float(jnp.max(jnp.abs(out - ref)))
    assert jnp.allclose(out, ref, atol=3e-2, rtol=3e-2), max_err

    print("KERNEL_OK")
</pallas_src>

<mosaic_0001>
module attributes {stable_mosaic.version = 11 : i64} {
  func.func @_conv_stage_kernel(%arg0: i32, %arg1: memref<1x16x16x4xf32, #tpu.memory_space<vmem>>, %arg2: memref<36x4xbf16, #tpu.memory_space<vmem>>, %arg3: memref<1x1x4xf32, #tpu.memory_space<vmem>>, %arg4: memref<1x1x4xf32, #tpu.memory_space<vmem>>, %arg5: memref<1x16x16x4xbf16, #tpu.memory_space<vmem>>, %arg6: memref<1x2x4xf32, #tpu.memory_space<vmem>>, %arg7: memref<18x18x4xf32, #tpu.memory_space<vmem>>) attributes {dimension_semantics = [#tpu.dimension_semantics<parallel>], iteration_bounds = array<i64: 2>, scalar_prefetch = 0 : i64, scratch_operands = 1 : i64, tpu.core_type = #tpu.core_type<tc>, window_params = [{transform_indices = @transform_0, window_bounds = array<i64: 1, 16, 16, 4>}, {pipeline_mode = #tpu.pipeline_mode<synchronous>, transform_indices = @transform_1, window_bounds = array<i64: 36, 4>}, {pipeline_mode = #tpu.pipeline_mode<synchronous>, transform_indices = @transform_2, window_bounds = array<i64: 1, 1, 4>}, {pipeline_mode = #tpu.pipeline_mode<synchronous>, transform_indices = @transform_3, window_bounds = array<i64: 1, 1, 4>}, {transform_indices = @transform_4, window_bounds = array<i64: 1, 16, 16, 4>}, {transform_indices = @transform_5, window_bounds = array<i64: 1, 2, 4>}]} {
    %c0 = arith.constant 0 : index
    %c0_0 = arith.constant 0 : index
    %c0_1 = arith.constant 0 : index
    %c0_2 = arith.constant 0 : index
    %0 = vector.load %arg1[%c0, %c0_0, %c0_1, %c0_2] : memref<1x16x16x4xf32, #tpu.memory_space<vmem>>, vector<1x16x16x4xf32>
    %1 = vector.shape_cast %0 : vector<1x16x16x4xf32> to vector<16x16x4xf32>
    %cst = arith.constant 0.000000e+00 : f32
    %2 = vector.broadcast %cst : f32 to vector<16x1x4xf32>
    %3 = tpu.concatenate %2, %1, %2 in 1 : vector<16x1x4xf32>, vector<16x16x4xf32>, vector<16x1x4xf32> -> vector<16x18x4xf32>
    %cst_3 = arith.constant 0.000000e+00 : f32
    %4 = vector.broadcast %cst_3 : f32 to vector<18x18x4xf32>
    %c0_4 = arith.constant 0 : index
    %c0_5 = arith.constant 0 : index
    %c0_6 = arith.constant 0 : index
    %5 = vector.load %arg7[%c0_4, %c0_5, %c0_6] : memref<18x18x4xf32, #tpu.memory_space<vmem>>, vector<18x18x4xf32>
    tpu.vector_store %arg7[%c0_4, %c0_5, %c0_6], %4 {strides = array<i32>} : memref<18x18x4xf32, #tpu.memory_space<vmem>>, vector<18x18x4xf32>,
    %c1 = arith.constant 1 : index
    %c0_7 = arith.constant 0 : index
    %c0_8 = arith.constant 0 : index
    %6 = vector.load %arg7[%c1, %c0_7, %c0_8] : memref<18x18x4xf32, #tpu.memory_space<vmem>>, vector<16x18x4xf32>
    tpu.vector_store %arg7[%c1, %c0_7, %c0_8], %3 {strides = array<i32>} : memref<18x18x4xf32, #tpu.memory_space<vmem>>, vector<16x18x4xf32>,
    %c0_9 = arith.constant 0 : index
    %c0_10 = arith.constant 0 : index
    %c0_11 = arith.constant 0 : index
    %7 = vector.load %arg7[%c0_9, %c0_10, %c0_11] : memref<18x18x4xf32, #tpu.memory_space<vmem>>, vector<16x16x4xf32>
    %c0_12 = arith.constant 0 : index
    %c1_13 = arith.constant 1 : index
    %c0_14 = arith.constant 0 : index
    %8 = vector.load %arg7[%c0_12, %c1_13, %c0_14] : memref<18x18x4xf32, #tpu.memory_space<vmem>>, vector<16x16x4xf32>
    %c0_15 = arith.constant 0 : index
    %c2 = arith.constant 2 : index
    %c0_16 = arith.constant 0 : index
    %9 = vector.load %arg7[%c0_15, %c2, %c0_16] : memref<18x18x4xf32, #tpu.memory_space<vmem>>, vector<16x16x4xf32>
    %c1_17 = arith.constant 1 : index
    %c0_18 = arith.constant 0 : index
    %c0_19 = arith.constant 0 : index
    %10 = vector.load %arg7[%c1_17, %c0_18, %c0_19] : memref<18x18x4xf32, #tpu.memory_space<vmem>>, vector<16x16x4xf32>
    %c1_20 = arith.constant 1 : index
    %c1_21 = arith.constant 1 : index
    %c0_22 = arith.constant 0 : index
    %11 = vector.load %arg7[%c1_20, %c1_21, %c0_22] : memref<18x18x4xf32, #tpu.memory_space<vmem>>, vector<16x16x4xf32>
    %c1_23 = arith.constant 1 : index
    %c2_24 = arith.constant 2 : index
    %c0_25 = arith.constant 0 : index
    %12 = vector.load %arg7[%c1_23, %c2_24, %c0_25] : memref<18x18x4xf32, #tpu.memory_space<vmem>>, vector<16x16x4xf32>
    %c2_26 = arith.constant 2 : index
    %c0_27 = arith.constant 0 : index
    %c0_28 = arith.constant 0 : index
    %13 = vector.load %arg7[%c2_26, %c0_27, %c0_28] : memref<18x18x4xf32, #tpu.memory_space<vmem>>, vector<16x16x4xf32>
    %c2_29 = arith.constant 2 : index
    %c1_30 = arith.constant 1 : index
    %c0_31 = arith.constant 0 : index
    %14 = vector.load %arg7[%c2_29, %c1_30, %c0_31] : memref<18x18x4xf32, #tpu.memory_space<vmem>>, vector<16x16x4xf32>
    %c2_32 = arith.constant 2 : index
    %c2_33 = arith.constant 2 : index
    %c0_34 = arith.constant 0 : index
    %15 = vector.load %arg7[%c2_32, %c2_33, %c0_34] : memref<18x18x4xf32, #tpu.memory_space<vmem>>, vector<16x16x4xf32>
    %16 = tpu.concatenate %7, %8, %9, %10, %11, %12, %13, %14, %15 in 2 : vector<16x16x4xf32>, vector<16x16x4xf32>, vector<16x16x4xf32>, vector<16x16x4xf32>, vector<16x16x4xf32>, vector<16x16x4xf32>, vector<16x16x4xf32>, vector<16x16x4xf32>, vector<16x16x4xf32> -> vector<16x16x36xf32>
    %17 = vector.shape_cast %16 : vector<16x16x36xf32> to vector<256x36xf32>
    %18 = arith.truncf %17 : vector<256x36xf32> to vector<256x36xbf16>
    %c0_35 = arith.constant 0 : index
    %c0_36 = arith.constant 0 : index
    %19 = vector.load %arg2[%c0_35, %c0_36] : memref<36x4xbf16, #tpu.memory_space<vmem>>, vector<36x4xbf16>
    %cst_37 = arith.constant dense<0.000000e+00> : vector<256x4xf32>
    %20 = tpu.matmul %18, %19, %cst_37 {dimension_numbers = #tpu.dot_dimension_numbers<[1], [0], [0], [1], [0, 0, 1, 1], [], []>} : vector<256x36xbf16>, vector<36x4xbf16>, vector<256x4xf32> -> vector<256x4xf32>
    %21 = vector.shape_cast %20 : vector<256x4xf32> to vector<16x16x4xf32>
    %22 = arith.truncf %21 : vector<16x16x4xf32> to vector<16x16x4xbf16>
    %c0_38 = arith.constant 0 : index
    %c0_39 = arith.constant 0 : index
    %c0_40 = arith.constant 0 : index
    %c0_41 = arith.constant 0 : index
    %23 = vector.load %arg5[%c0_38, %c0_39, %c0_40, %c0_41] : memref<1x16x16x4xbf16, #tpu.memory_space<vmem>>, vector<1x16x16x4xbf16>
    %24 = vector.shape_cast %23 : vector<1x16x16x4xbf16> to vector<16x16x4xbf16>
    %25 = vector.shape_cast %22 : vector<16x16x4xbf16> to vector<1x16x16x4xbf16>
    tpu.vector_store %arg5[%c0_38, %c0_39, %c0_40, %c0_41], %25 {strides = array<i32>} : memref<1x16x16x4xbf16, #tpu.memory_space<vmem>>, vector<1x16x16x4xbf16>,
    %cst_42 = arith.constant dense<0.000000e+00> : vector<4xf32>
    %26 = vector.multi_reduction <add>, %20, %cst_42 [0] : vector<256x4xf32> to vector<4xf32>
    %27 = vector.shape_cast %26 : vector<4xf32> to vector<1x4xf32>
    %c0_43 = arith.constant 0 : index
    %c0_44 = arith.constant 0 : index
    %c0_45 = arith.constant 0 : index
    %28 = vector.load %arg6[%c0_43, %c0_44, %c0_45] : memref<1x2x4xf32, #tpu.memory_space<vmem>>, vector<1x1x4xf32>
    %29 = vector.shape_cast %28 : vector<1x1x4xf32> to vector<1x4xf32>
    %30 = vector.shape_cast %27 : vector<1x4xf32> to vector<1x1x4xf32>
    tpu.vector_store %arg6[%c0_43, %c0_44, %c0_45], %30 {strides = array<i32>} : memref<1x2x4xf32, #tpu.memory_space<vmem>>, vector<1x1x4xf32>,
    %31 = arith.mulf %20, %20 : vector<256x4xf32>
    %cst_46 = arith.constant dense<0.000000e+00> : vector<4xf32>
    %32 = vector.multi_reduction <add>, %31, %cst_46 [0] : vector<256x4xf32> to vector<4xf32>
    %33 = vector.shape_cast %32 : vector<4xf32> to vector<1x4xf32>
    %c0_47 = arith.constant 0 : index
    %c1_48 = arith.constant 1 : index
    %c0_49 = arith.constant 0 : index
    %34 = vector.load %arg6[%c0_47, %c1_48, %c0_49] : memref<1x2x4xf32, #tpu.memory_space<vmem>>, vector<1x1x4xf32>
    %35 = vector.shape_cast %34 : vector<1x1x4xf32> to vector<1x4xf32>
    %36 = vector.shape_cast %33 : vector<1x4xf32> to vector<1x1x4xf32>
    tpu.vector_store %arg6[%c0_47, %c1_48, %c0_49], %36 {strides = array<i32>} : memref<1x2x4xf32, #tpu.memory_space<vmem>>, vector<1x1x4xf32>,
    return
  }
  func.func @transform_0(%arg0: i32) -> (i32, i32, i32, i32) {
    %c0_i32 = arith.constant 0 : i32
    %c0_i32_0 = arith.constant 0 : i32
    %c0_i32_1 = arith.constant 0 : i32
    %c0_i32_2 = arith.constant 0 : i32
    return %arg0, %c0_i32, %c0_i32_0, %c0_i32_1 : i32, i32, i32, i32
  }
  func.func @transform_1(%arg0: i32) -> (i32, i32) {
    %c0_i32 = arith.constant 0 : i32
    %c0_i32_0 = arith.constant 0 : i32
    %c0_i32_1 = arith.constant 0 : i32
    return %c0_i32, %c0_i32_0 : i32, i32
  }
  func.func @transform_2(%arg0: i32) -> (i32, i32, i32) {
    %c0_i32 = arith.constant 0 : i32
    %c0_i32_0 = arith.constant 0 : i32
    %c0_i32_1 = arith.constant 0 : i32
    %c0_i32_2 = arith.constant 0 : i32
    return %c0_i32, %c0_i32_0, %c0_i32_1 : i32, i32, i32
  }
  func.func @transform_3(%arg0: i32) -> (i32, i32, i32) {
    %c0_i32 = arith.constant 0 : i32
    %c0_i32_0 = arith.constant 0 : i32
    %c0_i32_1 = arith.constant 0 : i32
    %c0_i32_2 = arith.constant 0 : i32
    return %c0_i32, %c0_i32_0, %c0_i32_1 : i32, i32, i32
  }
  func.func @transform_4(%arg0: i32) -> (i32, i32, i32, i32) {
    %c0_i32 = arith.constant 0 : i32
    %c0_i32_0 = arith.constant 0 : i32
    %c0_i32_1 = arith.constant 0 : i32
    %c0_i32_2 = arith.constant 0 : i32
    return %arg0, %c0_i32, %c0_i32_0, %c0_i32_1 : i32, i32, i32, i32
  }
  func.func @transform_5(%arg0: i32) -> (i32, i32, i32) {
    %c0_i32 = arith.constant 0 : i32
    %c0_i32_0 = arith.constant 0 : i32
    %c0_i32_1 = arith.constant 0 : i32
    return %arg0, %c0_i32, %c0_i32_0 : i32, i32, i32
  }
}

module attributes {stable_mosaic.version = 11 : i64} {
  func.func @_conv_stage_kernel(%arg0: i32, %arg1: memref<1x16x16x4xbf16, #tpu.memory_space<vmem>>, %arg2: memref<36x8xbf16, #tpu.memory_space<vmem>>, %arg3: memref<1x1x4xf32, #tpu.memory_space<vmem>>, %arg4: memref<1x1x4xf32, #tpu.memory_space<vmem>>, %arg5: memref<1x8x8x8xbf16, #tpu.memory_space<vmem>>, %arg6: memref<1x2x8xf32, #tpu.memory_space<vmem>>, %arg7: memref<18x18x4xf32, #tpu.memory_space<vmem>>, %arg8: memref<9x18x4xf32, #tpu.memory_space<vmem>>, %arg9: memref<8x18x4xf32, #tpu.memory_space<vmem>>) attributes {dimension_semantics = [#tpu.dimension_semantics<parallel>], iteration_bounds = array<i64: 2>, scalar_prefetch = 0 : i64, scratch_operands = 3 : i64, tpu.core_type = #tpu.core_type<tc>, window_params = [{transform_indices = @transform_0, window_bounds = array<i64: 1, 16, 16, 4>}, {pipeline_mode = #tpu.pipeline_mode<synchronous>, transform_indices = @transform_1, window_bounds = array<i64: 36, 8>}, {pipeline_mode = #tpu.pipeline_mode<synchronous>, transform_indices = @transform_2, window_bounds = array<i64: 1, 1, 4>}, {pipeline_mode = #tpu.pipeline_mode<synchronous>, transform_indices = @transform_3, window_bounds = array<i64: 1, 1, 4>}, {transform_indices = @transform_4, window_bounds = array<i64: 1, 8, 8, 8>}, {transform_indices = @transform_5, window_bounds = array<i64: 1, 2, 8>}]} {
    %c0 = arith.constant 0 : index
    %c0_0 = arith.constant 0 : index
    %c0_1 = arith.constant 0 : index
    %c0_2 = arith.constant 0 : index
    %0 = vector.load %arg1[%c0, %c0_0, %c0_1, %c0_2] : memref<1x16x16x4xbf16, #tpu.memory_space<vmem>>, vector<1x16x16x4xbf16>
    %1 = vector.shape_cast %0 : vector<1x16x16x4xbf16> to vector<16x16x4xbf16>
    %2 = arith.extf %1 : vector<16x16x4xbf16> to vector<16x16x4xf32>
    %c0_3 = arith.constant 0 : index
    %c0_4 = arith.constant 0 : index
    %c0_5 = arith.constant 0 : index
    %3 = vector.load %arg3[%c0_3, %c0_4, %c0_5] : memref<1x1x4xf32, #tpu.memory_space<vmem>>, vector<1x1x4xf32>
    %4 = vector.broadcast %3 : vector<1x1x4xf32> to vector<16x16x4xf32>
    %5 = arith.mulf %2, %4 : vector<16x16x4xf32>
    %c0_6 = arith.constant 0 : index
    %c0_7 = arith.constant 0 : index
    %c0_8 = arith.constant 0 : index
    %6 = vector.load %arg4[%c0_6, %c0_7, %c0_8] : memref<1x1x4xf32, #tpu.memory_space<vmem>>, vector<1x1x4xf32>
    %7 = vector.broadcast %6 : vector<1x1x4xf32> to vector<16x16x4xf32>
    %8 = arith.addf %5, %7 : vector<16x16x4xf32>
    %cst = arith.constant 0.000000e+00 : f32
    %9 = vector.broadcast %cst : f32 to vector<16x16x4xf32>
    %10 = arith.cmpf oge, %8, %9 : vector<16x16x4xf32>
    %cst_9 = arith.constant 2.000000e-01 : f32
    %11 = vector.broadcast %cst_9 : f32 to vector<16x16x4xf32>
    %12 = arith.mulf %11, %8 : vector<16x16x4xf32>
    %13 = arith.select %10, %8, %12 : vector<16x16x4xi1>, vector<16x16x4xf32>
    %cst_10 = arith.constant 0.000000e+00 : f32
    %14 = vector.broadcast %cst_10 : f32 to vector<16x1x4xf32>
    %15 = tpu.concatenate %14, %13, %14 in 1 : vector<16x1x4xf32>, vector<16x16x4xf32>, vector<16x1x4xf32> -> vector<16x18x4xf32>
    %cst_11 = arith.constant 0.000000e+00 : f32
    %16 = vector.broadcast %cst_11 : f32 to vector<18x18x4xf32>
    %c0_12 = arith.constant 0 : index
    %c0_13 = arith.constant 0 : index
    %c0_14 = arith.constant 0 : index
    %17 = vector.load %arg7[%c0_12, %c0_13, %c0_14] : memref<18x18x4xf32, #tpu.memory_space<vmem>>, vector<18x18x4xf32>
    tpu.vector_store %arg7[%c0_12, %c0_13, %c0_14], %16 {strides = array<i32>} : memref<18x18x4xf32, #tpu.memory_space<vmem>>, vector<18x18x4xf32>,
    %c1 = arith.constant 1 : index
    %c0_15 = arith.constant 0 : index
    %c0_16 = arith.constant 0 : index
    %18 = vector.load %arg7[%c1, %c0_15, %c0_16] : memref<18x18x4xf32, #tpu.memory_space<vmem>>, vector<16x18x4xf32>
    tpu.vector_store %arg7[%c1, %c0_15, %c0_16], %15 {strides = array<i32>} : memref<18x18x4xf32, #tpu.memory_space<vmem>>, vector<16x18x4xf32>,
    %c0_17 = arith.constant 0 : index
    %c0_18 = arith.constant 0 : index
    %c0_19 = arith.constant 0 : index
    %19 = tpu.strided_load %arg7[%c0_17, %c0_18, %c0_19] {strides = array<i32: 2, 1, 1>} : memref<18x18x4xf32, #tpu.memory_space<vmem>>, vector<9x18x4xf32>
    %c0_20 = arith.constant 0 : index
    %c0_21 = arith.constant 0 : index
    %c0_22 = arith.constant 0 : index
    %20 = vector.load %arg8[%c0_20, %c0_21, %c0_22] : memref<9x18x4xf32, #tpu.memory_space<vmem>>, vector<9x18x4xf32>
    tpu.vector_store %arg8[%c0_20, %c0_21, %c0_22], %19 {strides = array<i32>} : memref<9x18x4xf32, #tpu.memory_space<vmem>>, vector<9x18x4xf32>,
    %c1_23 = arith.constant 1 : index
    %c0_24 = arith.constant 0 : index
    %c0_25 = arith.constant 0 : index
    %21 = tpu.strided_load %arg7[%c1_23, %c0_24, %c0_25] {strides = array<i32: 2, 1, 1>} : memref<18x18x4xf32, #tpu.memory_space<vmem>>, vector<8x18x4xf32>
    %c0_26 = arith.constant 0 : index
    %c0_27 = arith.constant 0 : index
    %c0_28 = arith.constant 0 : index
    %22 = vector.load %arg9[%c0_26, %c0_27, %c0_28] : memref<8x18x4xf32, #tpu.memory_space<vmem>>, vector<8x18x4xf32>
    tpu.vector_store %arg9[%c0_26, %c0_27, %c0_28], %21 {strides = array<i32>} : memref<8x18x4xf32, #tpu.memory_space<vmem>>, vector<8x18x4xf32>,
    %c0_29 = arith.constant 0 : index
    %c0_30 = arith.constant 0 : index
    %c0_31 = arith.constant 0 : index
    %23 = tpu.strided_load %arg8[%c0_29, %c0_30, %c0_31] {strides = array<i32: 1, 2, 1>} : memref<9x18x4xf32, #tpu.memory_space<vmem>>, vector<8x8x4xf32>
    %c0_32 = arith.constant 0 : index
    %c1_33 = arith.constant 1 : index
    %c0_34 = arith.constant 0 : index
    %24 = tpu.strided_load %arg8[%c0_32, %c1_33, %c0_34] {strides = array<i32: 1, 2, 1>} : memref<9x18x4xf32, #tpu.memory_space<vmem>>, vector<8x8x4xf32>
    %c0_35 = arith.constant 0 : index
    %c2 = arith.constant 2 : index
    %c0_36 = arith.constant 0 : index
    %25 = tpu.strided_load %arg8[%c0_35, %c2, %c0_36] {strides = array<i32: 1, 2, 1>} : memref<9x18x4xf32, #tpu.memory_space<vmem>>, vector<8x8x4xf32>
    %c0_37 = arith.constant 0 : index
    %c0_38 = arith.constant 0 : index
    %c0_39 = arith.constant 0 : index
    %26 = tpu.strided_load %arg9[%c0_37, %c0_38, %c0_39] {strides = array<i32: 1, 2, 1>} : memref<8x18x4xf32, #tpu.memory_space<vmem>>, vector<8x8x4xf32>
    %c0_40 = arith.constant 0 : index
    %c1_41 = arith.constant 1 : index
    %c0_42 = arith.constant 0 : index
    %27 = tpu.strided_load %arg9[%c0_40, %c1_41, %c0_42] {strides = array<i32: 1, 2, 1>} : memref<8x18x4xf32, #tpu.memory_space<vmem>>, vector<8x8x4xf32>
    %c0_43 = arith.constant 0 : index
    %c2_44 = arith.constant 2 : index
    %c0_45 = arith.constant 0 : index
    %28 = tpu.strided_load %arg9[%c0_43, %c2_44, %c0_45] {strides = array<i32: 1, 2, 1>} : memref<8x18x4xf32, #tpu.memory_space<vmem>>, vector<8x8x4xf32>
    %c1_46 = arith.constant 1 : index
    %c0_47 = arith.constant 0 : index
    %c0_48 = arith.constant 0 : index
    %29 = tpu.strided_load %arg8[%c1_46, %c0_47, %c0_48] {strides = array<i32: 1, 2, 1>} : memref<9x18x4xf32, #tpu.memory_space<vmem>>, vector<8x8x4xf32>
    %c1_49 = arith.constant 1 : index
    %c1_50 = arith.constant 1 : index
    %c0_51 = arith.constant 0 : index
    %30 = tpu.strided_load %arg8[%c1_49, %c1_50, %c0_51] {strides = array<i32: 1, 2, 1>} : memref<9x18x4xf32, #tpu.memory_space<vmem>>, vector<8x8x4xf32>
    %c1_52 = arith.constant 1 : index
    %c2_53 = arith.constant 2 : index
    %c0_54 = arith.constant 0 : index
    %31 = tpu.strided_load %arg8[%c1_52, %c2_53, %c0_54] {strides = array<i32: 1, 2, 1>} : memref<9x18x4xf32, #tpu.memory_space<vmem>>, vector<8x8x4xf32>
    %32 = tpu.concatenate %23, %24, %25, %26, %27, %28, %29, %30, %31 in 2 : vector<8x8x4xf32>, vector<8x8x4xf32>, vector<8x8x4xf32>, vector<8x8x4xf32>, vector<8x8x4xf32>, vector<8x8x4xf32>, vector<8x8x4xf32>, vector<8x8x4xf32>, vector<8x8x4xf32> -> vector<8x8x36xf32>
    %33 = vector.shape_cast %32 : vector<8x8x36xf32> to vector<64x36xf32>
    %34 = arith.truncf %33 : vector<64x36xf32> to vector<64x36xbf16>
    %c0_55 = arith.constant 0 : index
    %c0_56 = arith.constant 0 : index
    %35 = vector.load %arg2[%c0_55, %c0_56] : memref<36x8xbf16, #tpu.memory_space<vmem>>, vector<36x8xbf16>
    %cst_57 = arith.constant dense<0.000000e+00> : vector<64x8xf32>
    %36 = tpu.matmul %34, %35, %cst_57 {dimension_numbers = #tpu.dot_dimension_numbers<[1], [0], [0], [1], [0, 0, 1, 1], [], []>} : vector<64x36xbf16>, vector<36x8xbf16>, vector<64x8xf32> -> vector<64x8xf32>
    %37 = vector.shape_cast %36 : vector<64x8xf32> to vector<8x8x8xf32>
    %38 = arith.truncf %37 : vector<8x8x8xf32> to vector<8x8x8xbf16>
    %c0_58 = arith.constant 0 : index
    %c0_59 = arith.constant 0 : index
    %c0_60 = arith.constant 0 : index
    %c0_61 = arith.constant 0 : index
    %39 = vector.load %arg5[%c0_58, %c0_59, %c0_60, %c0_61] : memref<1x8x8x8xbf16, #tpu.memory_space<vmem>>, vector<1x8x8x8xbf16>
    %40 = vector.shape_cast %39 : vector<1x8x8x8xbf16> to vector<8x8x8xbf16>
    %41 = vector.shape_cast %38 : vector<8x8x8xbf16> to vector<1x8x8x8xbf16>
    tpu.vector_store %arg5[%c0_58, %c0_59, %c0_60, %c0_61], %41 {strides = array<i32>} : memref<1x8x8x8xbf16, #tpu.memory_space<vmem>>, vector<1x8x8x8xbf16>,
    %cst_62 = arith.constant dense<0.000000e+00> : vector<8xf32>
    %42 = vector.multi_reduction <add>, %36, %cst_62 [0] : vector<64x8xf32> to vector<8xf32>
    %43 = vector.shape_cast %42 : vector<8xf32> to vector<1x8xf32>
    %c0_63 = arith.constant 0 : index
    %c0_64 = arith.constant 0 : index
    %c0_65 = arith.constant 0 : index
    %44 = vector.load %arg6[%c0_63, %c0_64, %c0_65] : memref<1x2x8xf32, #tpu.memory_space<vmem>>, vector<1x1x8xf32>
    %45 = vector.shape_cast %44 : vector<1x1x8xf32> to vector<1x8xf32>
    %46 = vector.shape_cast %43 : vector<1x8xf32> to vector<1x1x8xf32>
    tpu.vector_store %arg6[%c0_63, %c0_64, %c0_65], %46 {strides = array<i32>} : memref<1x2x8xf32, #tpu.memory_space<vmem>>, vector<1x1x8xf32>,
    %47 = arith.mulf %36, %36 : vector<64x8xf32>
    %cst_66 = arith.constant dense<0.000000e+00> : vector<8xf32>
    %48 = vector.multi_reduction <add>, %47, %cst_66 [0] : vector<64x8xf32> to vector<8xf32>
    %49 = vector.shape_cast %48 : vector<8xf32> to vector<1x8xf32>
    %c0_67 = arith.constant 0 : index
    %c1_68 = arith.constant 1 : index
    %c0_69 = arith.constant 0 : index
    %50 = vector.load %arg6[%c0_67, %c1_68, %c0_69] : memref<1x2x8xf32, #tpu.memory_space<vmem>>, vector<1x1x8xf32>
    %51 = vector.shape_cast %50 : vector<1x1x8xf32> to vector<1x8xf32>
    %52 = vector.shape_cast %49 : vector<1x8xf32> to vector<1x1x8xf32>
    tpu.vector_store %arg6[%c0_67, %c1_68, %c0_69], %52 {strides = array<i32>} : memref<1x2x8xf32, #tpu.memory_space<vmem>>, vector<1x1x8xf32>,
    return
  }
  func.func @transform_0(%arg0: i32) -> (i32, i32, i32, i32) {
    %c0_i32 = arith.constant 0 : i32
    %c0_i32_0 = arith.constant 0 : i32
    %c0_i32_1 = arith.constant 0 : i32
    %c0_i32_2 = arith.constant 0 : i32
    return %arg0, %c0_i32, %c0_i32_0, %c0_i32_1 : i32, i32, i32, i32
  }
  func.func @transform_1(%arg0: i32) -> (i32, i32) {
    %c0_i32 = arith.constant 0 : i32
    %c0_i32_0 = arith.constant 0 : i32
    %c0_i32_1 = arith.constant 0 : i32
    return %c0_i32, %c0_i32_0 : i32, i32
  }
  func.func @transform_2(%arg0: i32) -> (i32, i32, i32) {
    %c0_i32 = arith.constant 0 : i32
    %c0_i32_0 = arith.constant 0 : i32
    %c0_i32_1 = arith.constant 0 : i32
    %c0_i32_2 = arith.constant 0 : i32
    return %c0_i32, %c0_i32_0, %c0_i32_1 : i32, i32, i32
  }
  func.func @transform_3(%arg0: i32) -> (i32, i32, i32) {
    %c0_i32 = arith.constant 0 : i32
    %c0_i32_0 = arith.constant 0 : i32
    %c0_i32_1 = arith.constant 0 : i32
    %c0_i32_2 = arith.constant 0 : i32
    return %c0_i32, %c0_i32_0, %c0_i32_1 : i32, i32, i32
  }
  func.func @transform_4(%arg0: i32) -> (i32, i32, i32, i32) {
    %c0_i32 = arith.constant 0 : i32
    %c0_i32_0 = arith.constant 0 : i32
    %c0_i32_1 = arith.constant 0 : i32
    %c0_i32_2 = arith.constant 0 : i32
    return %arg0, %c0_i32, %c0_i32_0, %c0_i32_1 : i32, i32, i32, i32
  }
  func.func @transform_5(%arg0: i32) -> (i32, i32, i32) {
    %c0_i32 = arith.constant 0 : i32
    %c0_i32_0 = arith.constant 0 : i32
    %c0_i32_1 = arith.constant 0 : i32
    return %arg0, %c0_i32, %c0_i32_0 : i32, i32, i32
  }
}

module attributes {stable_mosaic.version = 11 : i64} {
  func.func @_bn_lrelu_kernel(%arg0: i32, %arg1: memref<8x128xbf16, #tpu.memory_space<vmem>>, %arg2: memref<1x128xf32, #tpu.memory_space<vmem>>, %arg3: memref<1x128xf32, #tpu.memory_space<vmem>>, %arg4: memref<8x128xf32, #tpu.memory_space<vmem>>) attributes {dimension_semantics = [#tpu.dimension_semantics<parallel>], iteration_bounds = array<i64: 1>, scalar_prefetch = 0 : i64, scratch_operands = 0 : i64, tpu.core_type = #tpu.core_type<tc>, window_params = [{transform_indices = @transform_0, window_bounds = array<i64: 8, 128>}, {pipeline_mode = #tpu.pipeline_mode<synchronous>, transform_indices = @transform_1, window_bounds = array<i64: 1, 128>}, {pipeline_mode = #tpu.pipeline_mode<synchronous>, transform_indices = @transform_2, window_bounds = array<i64: 1, 128>}, {transform_indices = @transform_3, window_bounds = array<i64: 8, 128>}]} {
    %c0 = arith.constant 0 : index
    %c0_0 = arith.constant 0 : index
    %0 = vector.load %arg1[%c0, %c0_0] : memref<8x128xbf16, #tpu.memory_space<vmem>>, vector<8x128xbf16>
    %1 = arith.extf %0 : vector<8x128xbf16> to vector<8x128xf32>
    %c0_1 = arith.constant 0 : index
    %c0_2 = arith.constant 0 : index
    %2 = vector.load %arg2[%c0_1, %c0_2] : memref<1x128xf32, #tpu.memory_space<vmem>>, vector<1x128xf32>
    %3 = vector.broadcast %2 : vector<1x128xf32> to vector<8x128xf32>
    %4 = arith.mulf %1, %3 : vector<8x128xf32>
    %c0_3 = arith.constant 0 : index
    %c0_4 = arith.constant 0 : index
    %5 = vector.load %arg3[%c0_3, %c0_4] : memref<1x128xf32, #tpu.memory_space<vmem>>, vector<1x128xf32>
    %6 = vector.broadcast %5 : vector<1x128xf32> to vector<8x128xf32>
    %7 = arith.addf %4, %6 : vector<8x128xf32>
    %cst = arith.constant 0.000000e+00 : f32
    %8 = vector.broadcast %cst : f32 to vector<8x128xf32>
    %9 = arith.cmpf oge, %7, %8 : vector<8x128xf32>
    %cst_5 = arith.constant 2.000000e-01 : f32
    %10 = vector.broadcast %cst_5 : f32 to vector<8x128xf32>
    %11 = arith.mulf %10, %7 : vector<8x128xf32>
    %12 = arith.select %9, %7, %11 : vector<8x128xi1>, vector<8x128xf32>
    %c0_6 = arith.constant 0 : index
    %c0_7 = arith.constant 0 : index
    %13 = vector.load %arg4[%c0_6, %c0_7] : memref<8x128xf32, #tpu.memory_space<vmem>>, vector<8x128xf32>
    tpu.vector_store %arg4[%c0_6, %c0_7], %12 {strides = array<i32>} : memref<8x128xf32, #tpu.memory_space<vmem>>, vector<8x128xf32>,
    return
  }
  func.func @transform_0(%arg0: i32) -> (i32, i32) {
    %c0_i32 = arith.constant 0 : i32
    %c0_i32_0 = arith.constant 0 : i32
    return %arg0, %c0_i32 : i32, i32
  }
  func.func @transform_1(%arg0: i32) -> (i32, i32) {
    %c0_i32 = arith.constant 0 : i32
    %c0_i32_0 = arith.constant 0 : i32
    %c0_i32_1 = arith.constant 0 : i32
    return %c0_i32, %c0_i32_0 : i32, i32
  }
  func.func @transform_2(%arg0: i32) -> (i32, i32) {
    %c0_i32 = arith.constant 0 : i32
    %c0_i32_0 = arith.constant 0 : i32
    %c0_i32_1 = arith.constant 0 : i32
    return %c0_i32, %c0_i32_0 : i32, i32
  }
  func.func @transform_3(%arg0: i32) -> (i32, i32) {
    %c0_i32 = arith.constant 0 : i32
    %c0_i32_0 = arith.constant 0 : i32
    return %arg0, %c0_i32 : i32, i32
  }
}

</mosaic_0001>

<bundles_post_ra>
// kernel: discriminator_block.5
= control target key start
LH: loop header
LB: loop body
LE: loop exit
PB: predicated region body
PF: predicated region fallthrough
CT: control target
= control target key end

     0   :  { %s68_s0 = inlined_call_operand.vmem [shape: bf16[8,128], index: 0, kind: input, shape index: {}]   ;;  %s69_s1 = inlined_call_operand.vmem [shape: f32[1,128], index: 1, kind: input, shape index: {}]   ;;  %s70_s2 = inlined_call_operand.vmem [shape: f32[1,128], index: 2, kind: input, shape index: {}]   ;;  %s71_s3 = inlined_call_operand.vmem [shape: f32[8,128], index: 3, kind: output, shape index: {}]  }
   0x1   :  { %v14_v0 = vld [vmem:[%s68_s0] sm:$0xf] }
   0x2   :  { %v34_v1 = vld [vmem:[%s69_s1] ss:$0 sm:$0xff]  ;;  %v15_v2 = vunpack.c.l.bf16 %v14_v0 }
   0x3   :  { %v35_v3 = vld [vmem:[%s70_s2] ss:$0 sm:$0xff] }
   0x4   :  { %v20_v4 = vmul.f32 %v34_v1, %v15_v2 }
   0x6   :  { %v25_v5 = vadd.f32 %v35_v3, %v20_v4 }
   0x8   :  { %vm26_vm0 = vcmp.ge.f32.partialorder %v25_v5, 0.0  ;;  %v27_v6 = vmul.f32 0.2, %v25_v5 }
   0xa   :  { %v28_v7 = vsel %vm26_vm0, %v25_v5, %v27_v6 }
   0xb   :  { %29 = vst [vmem:[%s71_s3] sm:$0xff] %v28_v7 }

// kernel: discriminator_block.4
= control target key start
LH: loop header
LB: loop body
LE: loop exit
PB: predicated region body
PF: predicated region fallthrough
CT: control target
= control target key end

     0   :  { %s1897_s18 = smov 0   ;;  %s2602_s0 = inlined_call_operand.vmem [shape: bf16[2,16,16,4], index: 0, kind: input, shape index: {}]   ;;  %s2603_s1 = inlined_call_operand.vmem [shape: bf16[36,8], index: 1, kind: input, shape index: {}]   ;;  %s2604_s2 = inlined_call_operand.vmem [shape: f32[1,1,4], index: 2, kind: input, shape index: {}]   ;;  %s2605_s3 = inlined_call_operand.vmem [shape: f32[1,1,4], index: 3, kind: input, shape index: {}]   ;;  %s2606_s4 = inlined_call_operand.vmem [shape: bf16[2,8,8,8], index: 4, kind: output, shape index: {0}]   ;;  %s2607_s5 = inlined_call_operand.vmem [shape: f32[2,2,8], index: 5, kind: output, shape index: {1}]  }
   0x1 LB: > { %s1555_s19 = sadd.s32 4294967295, %s1856_s18   ;;  %p1559_p0 = scmp.ge.s32.totalorder %s1856_s18, 1  ;;  %s1856_s18 = sphi %s1897_s18, %s16_s18  }
   0x2   : > { %p190_p1 = scmp.lt.s32.totalorder %s1856_s18, 3 }
   0x4   : > { %p191_p2 = pnand %p1559_p0, %p190_p1 }
   0x5   : > { %p222_p3 = scmp.lt.s32.totalorder (!%p191_p2), %s1555_s19, 1  ;;  %s1859_s28 = smov (!%p191_p2), 4  }
   0x6   : > { %194 = sbr.rel (%p191_p2) target bundleno = 471 (0x1d7), region = 36  ;;  %s1860_s29 = smov (!%p191_p2), 8  }
   0x7   : > { %s1861_s30 = smov (!%p191_p2), 12   ;;  %s1862_s6 = smov (!%p191_p2), 16  }
   0x8   : > { %s1863_s7 = smov (!%p191_p2), 20   ;;  %s1864_s8 = smov (!%p191_p2), 24  }
   0x9   : > { %s1865_s9 = smov (!%p191_p2), 28   ;;  %s1866_s10 = smov (!%p191_p2), 32  }
   0xb   : > { %vm630_vm0 = vcmask 31744   ;;  %s2609_s19 = smov (!%p222_p3, %s1555_s19), 1  ;;  %v1858_v0 = vmov 0.0   ;;  %v1922_v1 = vld [vmem:[%s2604_s2] ss:$0 sm:$0xff]  ;;  %vm501_vm5 = vcmask 1040384  }
   0xc   : > { %656 = vst.msk [vmem:[#allocation2 + $0xc0] sm:$0xff] %vm630_vm0, %v1858_v0  ;;  %s1579_s20 = sshll.u32 %s2609_s19, 7  ;;  %v1933_v8 = vld [vmem:[%s2605_s3] ss:$0 sm:$0xff]  ;;  %vm633_vm8 = vcmask 25600   ;;  %s1580_s17 = sshll.u32 %s2609_s19, 5 }
   0xd   : > { %657 = vst.msk [vmem:[#allocation2 + $0xc8] sm:$0xff] %vm630_vm0, %v1858_v0  ;;  %s1917_s23 = scalar_lea.vmem %s2602_s0, %s1579_s20  ;;  %s2561_s22 = scalar_lea.vmem %s2606_s4, %s1580_s17 }
   0xe   : > { %662 = vst.msk [vmem:[#allocation2 + $0xf0] sm:$0xff] %vm630_vm0, %v1858_v0  ;;  %v1653_v2 = vld [vmem:[%s1917_s23 + $0x38] sm:$0xff]   ;;  %v1655_v3 = vld [vmem:[%s1917_s23 + $0x48] sm:$0xff]   ;;  %v1584_v55 = vld [vmem:[%s1917_s23] sm:$0xff]  }
   0xf   : > { %663 = vst.msk [vmem:[#allocation2 + $0xf8] sm:$0xff] %vm630_vm0, %v1858_v0  ;;  %v1613_v4 = vunpack.c.l.bf16 %v1653_v2  ;;  %v1614_v5 = vunpack.c.h.bf16 %v1653_v2  ;;  %v1621_v6 = vunpack.c.l.bf16 %v1655_v3  ;;  %v1622_v7 = vunpack.c.h.bf16 %v1655_v3  ;;  %v1647_v29 = vld [vmem:[%s1917_s23 + $0x8] sm:$0xff]   ;;  %v1648_v59 = vld [vmem:[%s1917_s23 + $0x10] sm:$0xff]   ;;  %v1649_v3 = vld [vmem:[%s1917_s23 + $0x18] sm:$0xff]  }
  0x10   : > { %631 = vst.msk [vmem:[#allocation2] sm:$0xff] %vm630_vm0, %v1858_v0  ;;  %v1589_v34 = vunpack.c.l.bf16 %v1647_v29  ;;  %v1590_v35 = vunpack.c.h.bf16 %v1647_v29  ;;  %v1585_v58 = vunpack.c.l.bf16 %v1584_v55  ;;  %v1586_v61 = vunpack.c.h.bf16 %v1584_v55 }
  0x11   : > { %632 = vst.msk [vmem:[#allocation2 + $0x8] sm:$0xff] %vm630_vm0, %v1858_v0  ;;  %v319_v9 = vmul.f32 %v1922_v1, %v1613_v4  ;;  %v320_v10 = vmul.f32 %v1922_v1, %v1614_v5  ;;  %v323_v11 = vmul.f32 %v1922_v1, %v1621_v6  ;;  %v324_v12 = vmul.f32 %v1922_v1, %v1622_v7 }
  0x12   : > { %635 = vst.msk [vmem:[#allocation2 + $0x18] sm:$0xff] %vm630_vm0, %v1858_v0  ;;  %v307_v36 = vmul.f32 %v1922_v1, %v1589_v34  ;;  %v308_v37 = vmul.f32 %v1922_v1, %v1590_v35  ;;  %v1593_v63 = vunpack.c.l.bf16 %v1648_v59  ;;  %v305_v2 = vmul.f32 %v1922_v1, %v1585_v58 }
  0x13   : > { %636 = vst.msk [vmem:[#allocation2 + $0x20] sm:$0xff] %vm630_vm0, %v1858_v0  ;;  %v355_v13 = vadd.f32 %v1933_v8, %v319_v9  ;;  %v356_v14 = vadd.f32 %v1933_v8, %v320_v10  ;;  %v359_v15 = vadd.f32 %v1933_v8, %v323_v11  ;;  %v360_v16 = vadd.f32 %v1933_v8, %v324_v12  ;;  %v1651_v11 = vld [vmem:[%s1917_s23 + $0x28] sm:$0xff]  }
  0x14   : > { %638 = vst.msk [vmem:[#allocation2 + $0x30] sm:$0xff] %vm630_vm0, %v1858_v0  ;;  %v343_v41 = vadd.f32 %v1933_v8, %v307_v36  ;;  %v344_v43 = vadd.f32 %v1933_v8, %v308_v37  ;;  %v1594_v4 = vunpack.c.h.bf16 %v1648_v59  ;;  %v306_v6 = vmul.f32 %v1922_v1, %v1586_v61 }
  0x15   : > { %639 = vst.msk [vmem:[#allocation2 + $0x38] sm:$0xff] %vm630_vm0, %v1858_v0  ;;  %vm387_vm1 = vcmp.ge.f32.partialorder %v355_v13, 0.0  ;;  %vm388_vm2 = vcmp.ge.f32.partialorder %v356_v14, 0.0  ;;  %vm391_vm3 = vcmp.ge.f32.partialorder %v359_v15, 0.0  ;;  %vm392_vm4 = vcmp.ge.f32.partialorder %v360_v16, 0.0 }
  0x16   : > { %641 = vst.msk [vmem:[#allocation2 + $0x48] sm:$0xff] %vm630_vm0, %v1858_v0  ;;  %v419_v17 = vmul.f32 0.2, %v355_v13  ;;  %v420_v18 = vmul.f32 0.2, %v356_v14  ;;  %vm375_vm6 = vcmp.ge.f32.partialorder %v343_v41, 0.0  ;;  %v1597_v9 = vunpack.c.l.bf16 %v1649_v3 }
  0x17   : > { %642 = vst.msk [vmem:[#allocation2 + $0x50] sm:$0xff] %vm630_vm0, %v1858_v0  ;;  %v423_v19 = vmul.f32 0.2, %v359_v15  ;;  %v424_v20 = vmul.f32 0.2, %v360_v16  ;;  %vm376_vm7 = vcmp.ge.f32.partialorder %v344_v43, 0.0  ;;  %v1598_v10 = vunpack.c.h.bf16 %v1649_v3 }
  0x18   : > { %644 = vst.msk [vmem:[#allocation2 + $0x60] sm:$0xff] %vm630_vm0, %v1858_v0  ;;  %v451_v21 = vsel %vm387_vm1, %v355_v13, %v419_v17  ;;  %v1959_v22 = vsel %vm388_vm2, %v356_v14, %v420_v18  ;;  %v407_v44 = vmul.f32 0.2, %v343_v41  ;;  %v408_v45 = vmul.f32 0.2, %v344_v43  ;;  %v735_v56 = vld [vmem:[#allocation2] sm:$0xff] }
  0x19   : > { %v455_v23 = vsel %vm391_vm3, %v359_v15, %v423_v19  ;;  %645 = vst.msk [vmem:[#allocation2 + $0x68] sm:$0xff] %vm630_vm0, %v1858_v0  ;;  %v1963_v24 = vsel %vm392_vm4, %v360_v16, %v424_v20  ;;  %v523_v25 = vrot.slane %v451_v21, 7  ;;  %v524_v26 = vrot.slane %v1959_v22, 7  ;;  %v736_v57 = vld [vmem:[#allocation2 + $0x8] sm:$0xff] }
  0x1a   : > { %v529_v27 = vrot.slane %v455_v23, 7  ;;  %647 = vst.msk [vmem:[#allocation2 + $0x78] sm:$0xff] %vm630_vm0, %v1858_v0  ;;  %v530_v28 = vrot.slane %v1963_v24, 7  ;;  %v439_v47 = vsel %vm375_vm6, %v343_v41, %v407_v44  ;;  %v2016_v49 = vsel %vm376_vm7, %v344_v43, %v408_v45 }
  0x1b   : > { %648 = vst.msk [vmem:[#allocation2 + $0x80] sm:$0xff] %vm630_vm0, %v1858_v0  ;;  %v525_v30 = vsel %vm501_vm5, %v523_v25, %v524_v26  ;;  %v605_v31 = vsel %vm501_vm5, 0.0, %v523_v25  ;;  %v505_v51 = vrot.slane %v439_v47, 7  ;;  %v506_v52 = vrot.slane %v2016_v49, 7 }
  0x1c   : > { %v607_v32 = vsel %vm501_vm5, 0.0, %v529_v27  ;;  %650 = vst.msk [vmem:[#allocation2 + $0x90] sm:$0xff] %vm630_vm0, %v1858_v0  ;;  %v531_v33 = vsel %vm501_vm5, %v529_v27, %v530_v28  ;;  %v621_v60 = vsel %vm501_vm5, %v524_v26, 0.0  ;;  %v623_v62 = vsel %vm501_vm5, %v530_v28, 0.0 }
  0x1d   : > { %708 = vst.msk [vmem:[#allocation2 + $0xc0] sm:$0xff] %vm630_vm0, %v605_v31  ;;  %v599_v53 = vsel %vm501_vm5, 0.0, %v505_v51  ;;  %v507_v54 = vsel %vm501_vm5, %v505_v51, %v506_v52  ;;  %v309_v12 = vmul.f32 %v1922_v1, %v1593_v63  ;;  %v341_v13 = vadd.f32 %v1933_v8, %v305_v2 }
  0x1e   : > { %709 = vst.msk [vmem:[#allocation2 + $0xc8] sm:$0xff] %vm630_vm0, %v525_v30  ;;  %v310_v14 = vmul.f32 %v1922_v1, %v1594_v4  ;;  %v342_v15 = vadd.f32 %v1933_v8, %v306_v6  ;;  %v1605_v16 = vunpack.c.l.bf16 %v1651_v11  ;;  %v311_v17 = vmul.f32 %v1922_v1, %v1597_v9 }
  0x1f   : > { %714 = vst.msk [vmem:[#allocation2 + $0xf0] sm:$0xff] %vm630_vm0, %v607_v32  ;;  %v312_v18 = vmul.f32 %v1922_v1, %v1598_v10  ;;  %v345_v20 = vadd.f32 %v1933_v8, %v309_v12  ;;  %v405_v21 = vmul.f32 0.2, %v341_v13  ;;  %vm373_vm9 = vcmp.ge.f32.partialorder %v341_v13, 0.0 }
  0x20   : > { %715 = vst.msk [vmem:[#allocation2 + $0xf8] sm:$0xff] %vm630_vm0, %v531_v33  ;;  %v346_v24 = vadd.f32 %v1933_v8, %v310_v14  ;;  %v406_v25 = vmul.f32 0.2, %v342_v15  ;;  %v315_v26 = vmul.f32 %v1922_v1, %v1605_v16  ;;  %vm374_vm10 = vcmp.ge.f32.partialorder %v342_v15, 0.0  ;;  %v1654_v33 = vld [vmem:[%s1917_s23 + $0x40] sm:$0xff]  }
  0x21   : > { %651 = vst.msk [vmem:[#allocation2 + $0x98] sm:$0xff] %vm630_vm0, %v1858_v0  ;;  %v1606_v28 = vunpack.c.h.bf16 %v1651_v11  ;;  %v347_v29 = vadd.f32 %v1933_v8, %v311_v17  ;;  %v348_v30 = vadd.f32 %v1933_v8, %v312_v18  ;;  %v409_v32 = vmul.f32 0.2, %v345_v20 }
  0x22   : > { %653 = vst.msk [vmem:[#allocation2 + $0xa8] sm:$0xff] %vm630_vm0, %v1858_v0  ;;  %vm377_vm11 = vcmp.ge.f32.partialorder %v345_v20, 0.0  ;;  %v410_v34 = vmul.f32 0.2, %v346_v24  ;;  %vm378_vm12 = vcmp.ge.f32.partialorder %v346_v24, 0.0  ;;  %v437_v35 = vsel %vm373_vm9, %v341_v13, %v405_v21 }
  0x23   : > { %654 = vst.msk [vmem:[#allocation2 + $0xb0] sm:$0xff] %vm630_vm0, %v1858_v0  ;;  %v2092_v36 = vsel %vm374_vm10, %v342_v15, %v406_v25  ;;  %v351_v37 = vadd.f32 %v1933_v8, %v315_v26  ;;  %v412_v41 = vmul.f32 0.2, %v348_v30  ;;  %v441_v44 = vsel %vm377_vm11, %v345_v20, %v409_v32  ;;  %v1657_v15 = vld [vmem:[%s1917_s23 + $0x58] sm:$0xff]   ;;  %v1659_v25 = vld [vmem:[%s1917_s23 + $0x68] sm:$0xff]  }
  0x24   : > { %v747_v38 = vld [vmem:[#allocation2 + $0xc0] sm:$0xff]  ;;  %659 = vst.msk [vmem:[#allocation2 + $0xd8] sm:$0xff] %vm630_vm0, %v1858_v0  ;;  %vm379_vm13 = vcmp.ge.f32.partialorder %v347_v29, 0.0  ;;  %v1618_v45 = vunpack.c.h.bf16 %v1654_v33  ;;  %v2105_v47 = vsel %vm378_vm12, %v346_v24, %v410_v34  ;;  %vm380_vm14 = vcmp.ge.f32.partialorder %v348_v30, 0.0 }
  0x25   : > { %v748_v39 = vld [vmem:[#allocation2 + $0xc8] sm:$0xff]  ;;  %774 = vst.msk [vmem:[#allocation3 + $0x60] sm:$0xff] %vm630_vm0, %v747_v38  ;;  %v1656_v38 = vld [vmem:[%s1917_s23 + $0x50] sm:$0xff]   ;;  %vm383_vm15 = vcmp.ge.f32.partialorder %v351_v37, 0.0  ;;  %v615_v59 = vsel %vm501_vm5, %v506_v52, 0.0  ;;  %v2122_v61 = vsel %vm380_vm14, %v348_v30, %v412_v41  ;;  %v509_v2 = vrot.slane %v2105_v47, 7 }
  0x26   : > { %v750_v40 = vld [vmem:[#allocation2 + $0xf0] sm:$0xff]  ;;  %775 = vst.msk [vmem:[#allocation3 + $0x68] sm:$0xff] %vm630_vm0, %v748_v39  ;;  %v316_v39 = vmul.f32 %v1922_v1, %v1606_v28  ;;  %v1626_v55 = vunpack.c.h.bf16 %v1656_v38 }
  0x27   : > { %v751_v42 = vld [vmem:[#allocation2 + $0xf8] sm:$0xff]  ;;  %777 = vst.msk [vmem:[#allocation3 + $0x78] sm:$0xff] %vm630_vm0, %v750_v40  ;;  %v411_v40 = vmul.f32 0.2, %v347_v29 }
  0x28   : > { %778 = vst.msk [vmem:[#allocation3 + $0x80] sm:$0xff] %vm630_vm0, %v751_v42  ;;  %v1617_v42 = vunpack.c.l.bf16 %v1654_v33  ;;  %v326_v52 = vmul.f32 %v1922_v1, %v1626_v55  ;;  %v1637_v33 = vunpack.c.l.bf16 %v1659_v25 }
  0x29   : > { %660 = vst.msk [vmem:[#allocation2 + $0xe0] sm:$0xff] %vm630_vm0, %v1858_v0 }
  0x2a   : > { %665 = vst.msk [vmem:[#allocation2 + $0x108] sm:$0xff] %vm630_vm0, %v1858_v0  ;;  %v321_v58 = vmul.f32 %v1922_v1, %v1617_v42  ;;  %v362_v17 = vadd.f32 %v1933_v8, %v326_v52 }
  0x2b   : > { %666 = vst.msk [vmem:[#allocation2 + $0x110] sm:$0xff] %vm630_vm0, %v1858_v0 }
  0x2c   : > { %668 = vst.msk [vmem:[#allocation2 + $0x120] sm:$0xff] %vm630_vm0, %v1858_v0  ;;  %v357_v9 = vadd.f32 %v1933_v8, %v321_v58  ;;  %v426_v28 = vmul.f32 0.2, %v362_v17  ;;  %vm394_vm6 = vcmp.ge.f32.partialorder %v362_v17, 0.0 }
  0x2d   : > { %v861_v46 = vld [vmem:[#allocation3 + $0x61] ss:$2 sm:$0xff]  ;;  %669 = vst.msk [vmem:[#allocation2 + $0x128] sm:$0xff] %vm630_vm0, %v1858_v0 }
  0x2e   : > { %671 = vst.msk [vmem:[#allocation2 + $0x138] sm:$0xff] %vm630_vm0, %v1858_v0  ;;  %v421_v20 = vmul.f32 0.2, %v357_v9  ;;  %vm389_vm2 = vcmp.ge.f32.partialorder %v357_v9, 0.0 }
  0x2f   : > { %v863_v48 = vld [vmem:[#allocation3 + $0x79] ss:$2 sm:$0xff]  ;;  %672 = vst.msk [vmem:[#allocation2 + $0x140] sm:$0xff] %vm630_vm0, %v1858_v0 }
  0x30   : > { %v1698_v50 = vpack.i.bf16 %v863_v48, %v861_v46  ;;  %674 = vst.msk [vmem:[#allocation2 + $0x150] sm:$0xff] %vm630_vm0, %v1858_v0  ;;  %v502_v48 = vrot.slane %v437_v35, 7  ;;  %v453_v30 = vsel %vm389_vm2, %v357_v9, %v421_v20  ;;  %v1650_v35 = vld [vmem:[%s1917_s23 + $0x20] sm:$0xff]   ;;  %v616_v20 = vsel %vm501_vm5, %v509_v2, 0.0 }
  0x31   : > { %675 = vst.msk [vmem:[#allocation2 + $0x158] sm:$0xff] %vm630_vm0, %v1858_v0 }
  0x32   : > { %1699 = vrot.lane.b32.xlu1 %v1698_v50, %s1859_s28  ;;  %677 = vst.msk [vmem:[#allocation2 + $0x168] sm:$0xff] %vm630_vm0, %v1858_v0  ;;  %v1625_v50 = vunpack.c.l.bf16 %v1656_v38  ;;  %v598_v4 = vsel %vm501_vm5, 0.0, %v502_v48 }
  0x33   : > { %678 = vst.msk [vmem:[#allocation2 + $0x170] sm:$0xff] %vm630_vm0, %v1858_v0 }
  0x34   : > { %680 = vst.msk [vmem:[#allocation2 + $0x180] sm:$0xff] %vm630_vm0, %v1858_v0  ;;  %v325_v3 = vmul.f32 %v1922_v1, %v1625_v50  ;;  %v1601_v50 = vunpack.c.l.bf16 %v1650_v35 }
  0x35   : > { %681 = vst.msk [vmem:[#allocation2 + $0x188] sm:$0xff] %vm630_vm0, %v1858_v0 }
  0x36   : > { %690 = vst.msk [vmem:[#allocation2 + $0x30] sm:$0xff] %vm630_vm0, %v599_v53  ;;  %v503_v53 = vrot.slane %v2092_v36, 7  ;;  %v361_v14 = vadd.f32 %v1933_v8, %v325_v3 }
  0x37   : > { %691 = vst.msk [vmem:[#allocation2 + $0x38] sm:$0xff] %vm630_vm0, %v507_v54  ;;  %v415_v54 = vmul.f32 0.2, %v351_v37 }
  0x38   : > { %762 = vst.msk [vmem:[#allocation3] sm:$0xff] %vm630_vm0, %v735_v56  ;;  %v352_v56 = vadd.f32 %v1933_v8, %v316_v39  ;;  %v504_v6 = vsel %vm501_vm5, %v502_v48, %v503_v53  ;;  %vm393_vm4 = vcmp.ge.f32.partialorder %v361_v14, 0.0  ;;  %v425_v24 = vmul.f32 0.2, %v361_v14 }
  0x39   : > { %763 = vst.msk [vmem:[#allocation3 + $0x8] sm:$0xff] %vm630_vm0, %v736_v57  ;;  %v443_v57 = vsel %vm379_vm13, %v347_v29, %v411_v40  ;;  %v1630_v29 = vunpack.c.h.bf16 %v1657_v15  ;;  %v1638_v39 = vunpack.c.h.bf16 %v1659_v25  ;;  %v2172_v40 = vld [vmem:[%s1917_s23 + $0x30] sm:$0xff]  }
  0x3a   : > { %658 = vst.msk [vmem:[#allocation2 + $0xd0] sm:$0x3] %vm633_vm8, %v1858_v0  ;;  %v511_v49 = vrot.slane %v443_v57, 7  ;;  %vm384_vm1 = vcmp.ge.f32.partialorder %v352_v56, 0.0  ;;  %v457_v38 = vsel %vm393_vm4, %v361_v14, %v425_v24  ;;  %v331_v57 = vmul.f32 %v1922_v1, %v1637_v33 }
  0x3b   : > { %664 = vst.msk [vmem:[#allocation2 + $0x100] sm:$0x3] %vm633_vm8, %v1858_v0 }
  0x3c   : > { %710 = vst.msk [vmem:[#allocation2 + $0xd0] sm:$0x3] %vm633_vm8, %v621_v60  ;;  %v508_v60 = vrot.slane %v441_v44, 7  ;;  %v601_v16 = vsel %vm501_vm5, 0.0, %v511_v49  ;;  %v526_v44 = vrot.slane %v453_v30, 7 }
  0x3d   : > { %v738_v5 = vld [vmem:[#allocation2 + $0x30] sm:$0xff]  ;;  %716 = vst.msk [vmem:[#allocation2 + $0x100] sm:$0x3] %vm633_vm8, %v623_v62  ;;  %v322_v62 = vmul.f32 %v1922_v1, %v1618_v45  ;;  %v328_v45 = vmul.f32 %v1922_v1, %v1630_v29 }
  0x3e   : > { %v739_v7 = vld [vmem:[#allocation2 + $0x38] sm:$0xff]  ;;  %765 = vst.msk [vmem:[#allocation3 + $0x18] sm:$0xff] %vm630_vm0, %v738_v5  ;;  %v447_v5 = vsel %vm383_vm15, %v351_v37, %v415_v54  ;;  %v600_v10 = vsel %vm501_vm5, 0.0, %v508_v60  ;;  %v510_v12 = vsel %vm501_vm5, %v508_v60, %v509_v2 }
  0x3f   : > { %766 = vst.msk [vmem:[#allocation3 + $0x20] sm:$0xff] %vm630_vm0, %v739_v7  ;;  %v416_v7 = vmul.f32 0.2, %v352_v56  ;;  %v358_v11 = vadd.f32 %v1933_v8, %v322_v62  ;;  %v517_v13 = vrot.slane %v447_v5, 7  ;;  %v364_v5 = vadd.f32 %v1933_v8, %v328_v45 }
  0x40   : > { %634 = vst.msk [vmem:[#allocation2 + $0x10] sm:$0x3] %vm633_vm8, %v1858_v0  ;;  %v853_v22 = vld [vmem:[#allocation3 + $0x1] ss:$2 sm:$0xff] }
  0x41   : > { %637 = vst.msk [vmem:[#allocation2 + $0x28] sm:$0x3] %vm633_vm8, %v1858_v0  ;;  %v2150_v18 = vsel %vm384_vm1, %v352_v56, %v416_v7  ;;  %vm390_vm3 = vcmp.ge.f32.partialorder %v358_v11, 0.0  ;;  %v422_v21 = vmul.f32 0.2, %v358_v11  ;;  %v532_v56 = vrot.slane %v457_v38, 7 }
  0x42   : > { %640 = vst.msk [vmem:[#allocation2 + $0x40] sm:$0x3] %vm633_vm8, %v1858_v0  ;;  %v313_v7 = vmul.f32 %v1922_v1, %v1601_v50  ;;  %vm396_vm9 = vcmp.ge.f32.partialorder %v364_v5, 0.0 }
  0x43   : > { %v749_v19 = vld [vmem:[#allocation2 + $0xd0] sm:$0x3]  ;;  %643 = vst.msk [vmem:[#allocation2 + $0x58] sm:$0x3] %vm633_vm8, %v1858_v0  ;;  %v2165_v32 = vsel %vm390_vm3, %v358_v11, %v422_v21  ;;  %v367_v11 = vadd.f32 %v1933_v8, %v331_v57  ;;  %v428_v21 = vmul.f32 0.2, %v364_v5 }
  0x44   : > { %v752_v23 = vld [vmem:[#allocation2 + $0x100] sm:$0x3]  ;;  %776 = vst.msk [vmem:[#allocation3 + $0x70] sm:$0x3] %vm633_vm8, %v749_v19  ;;  %v527_v48 = vrot.slane %v2165_v32, 7 }
  0x45   : > { %779 = vst.msk [vmem:[#allocation3 + $0x88] sm:$0x3] %vm633_vm8, %v752_v23  ;;  %v603_v23 = vsel %vm501_vm5, 0.0, %v517_v13  ;;  %v431_v2 = vmul.f32 0.2, %v367_v11  ;;  %vm399_vm10 = vcmp.ge.f32.partialorder %v367_v11, 0.0 }
  0x46   : > { %v855_v27 = vld [vmem:[#allocation3 + $0x19] ss:$2 sm:$0xff]  ;;  %646 = vst.msk [vmem:[#allocation2 + $0x70] sm:$0x3] %vm633_vm8, %v1858_v0 }
  0x47   : > { %v1688_v31 = vpack.i.bf16 %v855_v27, %v853_v22  ;;  %649 = vst.msk [vmem:[#allocation2 + $0x88] sm:$0x3] %vm633_vm8, %v1858_v0  ;;  %v737_v63 = vld [vmem:[#allocation2 + $0x10] sm:$0x3]  ;;  %v1629_v22 = vunpack.c.l.bf16 %v1657_v15  ;;  %v518_v27 = vrot.slane %v2150_v18, 7 }
  0x48   : > { %652 = vst.msk [vmem:[#allocation2 + $0xa0] sm:$0x3] %vm633_vm8, %v1858_v0 }
  0x49   : > { %1689 = vrot.lane.b32.xlu0 %v1688_v31, %s1859_s28  ;;  %655 = vst.msk [vmem:[#allocation2 + $0xb8] sm:$0x3] %vm633_vm8, %v1858_v0  ;;  %v327_v34 = vmul.f32 %v1922_v1, %v1629_v22  ;;  %v519_v42 = vsel %vm501_vm5, %v517_v13, %v518_v27  ;;  %v1610_v22 = vunpack.c.h.bf16 %v2172_v40 }
  0x4a   : > { %661 = vst.msk [vmem:[#allocation2 + $0xe8] sm:$0x3] %vm633_vm8, %v1858_v0 }
  0x4b   : > { %v877_v43 = vld [vmem:[#allocation3 + $0x62] ss:$2 sm:$0xff]  ;;  %667 = vst.msk [vmem:[#allocation2 + $0x118] sm:$0x3] %vm633_vm8, %v1858_v0  ;;  %v363_v58 = vadd.f32 %v1933_v8, %v327_v34 }
  0x4c   : > { %v879_v46 = vld [vmem:[#allocation3 + $0x7a] ss:$2 sm:$0xff]  ;;  %670 = vst.msk [vmem:[#allocation2 + $0x130] sm:$0x3] %vm633_vm8, %v1858_v0 }
  0x4d   : > { %v1708_v51 = vpack.i.bf16 %v879_v46, %v877_v43  ;;  %673 = vst.msk [vmem:[#allocation2 + $0x148] sm:$0x3] %vm633_vm8, %v1858_v0  ;;  %v2179_v43 = vsel %vm394_vm6, %v362_v17, %v426_v28  ;;  %v614_v17 = vsel %vm501_vm5, %v503_v53, 0.0  ;;  %vm395_vm7 = vcmp.ge.f32.partialorder %v363_v58, 0.0 }
  0x4e   : > { %676 = vst.msk [vmem:[#allocation2 + $0x160] sm:$0x3] %vm633_vm8, %v1858_v0  ;;  %v533_v62 = vrot.slane %v2179_v43, 7  ;;  %v349_v53 = vadd.f32 %v1933_v8, %v313_v7 }
  0x4f   : > { %1709 = vrot.lane.b32.xlu2 %v1708_v51, %s1860_s29  ;;  %679 = vst.msk [vmem:[#allocation2 + $0x178] sm:$0x3] %vm633_vm8, %v1858_v0  ;;  %v1602_v51 = vunpack.c.h.bf16 %v1650_v35  ;;  %v2238_v35 = vsel %vm396_vm9, %v364_v5, %v428_v21  ;;  %vm1252_vm9 = vcmask 97280  }
  0x50   : > { %682 = vst.msk [vmem:[#allocation2 + $0x190] sm:$0x3] %vm633_vm8, %v1858_v0  ;;  %v512_v0 = vrot.slane %v2122_v61, 7  ;;  %v413_v33 = vmul.f32 0.2, %v349_v53  ;;  %vm381_vm12 = vcmp.ge.f32.partialorder %v349_v53, 0.0 }
  0x51   : > { %692 = vst.msk [vmem:[#allocation2 + $0x40] sm:$0x3] %vm633_vm8, %v615_v59  ;;  %v1609_v59 = vunpack.c.l.bf16 %v2172_v40  ;;  %v314_v9 = vmul.f32 %v1922_v1, %v1602_v51  ;;  %v536_v51 = vrot.slane %v2238_v35, 7 }
  0x52   : > { %764 = vst.msk [vmem:[#allocation3 + $0x10] sm:$0x3] %vm633_vm8, %v737_v63  ;;  %v513_v19 = vsel %vm501_vm5, %v511_v49, %v512_v0  ;;  %v332_v63 = vmul.f32 %v1922_v1, %v1638_v39  ;;  %v617_v36 = vsel %vm501_vm5, %v512_v0, 0.0  ;;  %v318_v0 = vmul.f32 %v1922_v1, %v1610_v22 }
  0x53   : > { %687 = vst.msk [vmem:[#allocation2 + $0x18] sm:$0xff] %vm630_vm0, %v598_v4  ;;  %v606_v4 = vsel %vm501_vm5, 0.0, %v526_v44  ;;  %v317_v13 = vmul.f32 %v1922_v1, %v1609_v59  ;;  %v350_v25 = vadd.f32 %v1933_v8, %v314_v9  ;;  %v625_v32 = vsel %vm501_vm5, %v536_v51, 0.0 }
  0x54   : > { %688 = vst.msk [vmem:[#allocation2 + $0x20] sm:$0xff] %vm630_vm0, %v504_v6  ;;  %v528_v6 = vsel %vm501_vm5, %v526_v44, %v527_v48  ;;  %v354_v45 = vadd.f32 %v1933_v8, %v318_v0 }
  0x55   : > { %693 = vst.msk [vmem:[#allocation2 + $0x48] sm:$0xff] %vm630_vm0, %v600_v10  ;;  %v608_v10 = vsel %vm501_vm5, 0.0, %v532_v56  ;;  %v353_v29 = vadd.f32 %v1933_v8, %v317_v13  ;;  %v414_v39 = vmul.f32 0.2, %v350_v25  ;;  %vm382_vm13 = vcmp.ge.f32.partialorder %v350_v25, 0.0 }
  0x56   : > { %694 = vst.msk [vmem:[#allocation2 + $0x50] sm:$0xff] %vm630_vm0, %v510_v12  ;;  %v427_v12 = vmul.f32 0.2, %v363_v58  ;;  %vm386_vm15 = vcmp.ge.f32.partialorder %v354_v45, 0.0 }
  0x57   : > { %696 = vst.msk [vmem:[#allocation2 + $0x60] sm:$0xff] %vm630_vm0, %v601_v16  ;;  %v534_v16 = vsel %vm501_vm5, %v532_v56, %v533_v62  ;;  %v417_v18 = vmul.f32 0.2, %v353_v29  ;;  %vm385_vm14 = vcmp.ge.f32.partialorder %v353_v29, 0.0 }
  0x58   : > { %v740_v26 = vld [vmem:[#allocation2 + $0x40] sm:$0x3]  ;;  %697 = vst.msk [vmem:[#allocation2 + $0x68] sm:$0xff] %vm630_vm0, %v513_v19  ;;  %v368_v19 = vadd.f32 %v1933_v8, %v332_v63  ;;  %v459_v61 = vsel %vm395_vm7, %v363_v58, %v427_v12  ;;  %v445_v58 = vsel %vm381_vm12, %v349_v53, %v413_v33  ;;  %vm1279_vm12 = vcmask 195584  }
  0x59   : > { %767 = vst.msk [vmem:[#allocation3 + $0x28] sm:$0x3] %vm633_vm8, %v740_v26  ;;  %v869_v54 = vld [vmem:[#allocation3 + $0x2] ss:$2 sm:$0xff]  ;;  %v535_v38 = vrot.slane %v459_v61, 7 }
  0x5a   : > { %v789_v31 = vld [vmem:[#allocation2 + $0x18] sm:$0xff]  ;;  %702 = vst.msk [vmem:[#allocation2 + $0x90] sm:$0xff] %vm630_vm0, %v603_v23  ;;  %v432_v30 = vmul.f32 0.2, %v368_v19  ;;  %vm400_vm11 = vcmp.ge.f32.partialorder %v368_v19, 0.0 }
  0x5b   : > { %v790_v37 = vld [vmem:[#allocation2 + $0x20] sm:$0xff]  ;;  %813 = vst.msk [vmem:[#allocation4] sm:$0xff] %vm630_vm0, %v789_v31  ;;  %v619_v31 = vsel %vm501_vm5, %v518_v27, 0.0  ;;  %v609_v57 = vsel %vm501_vm5, 0.0, %v535_v38  ;;  %v537_v9 = vsel %vm501_vm5, %v535_v38, %v536_v51 }
  0x5c   : > { %v792_v41 = vld [vmem:[#allocation2 + $0x48] sm:$0xff]  ;;  %814 = vst.msk [vmem:[#allocation4 + $0x8] sm:$0xff] %vm630_vm0, %v790_v37  ;;  %v463_v37 = vsel %vm399_vm10, %v367_v11, %v431_v2  ;;  %v1658_v27 = vld [vmem:[%s1917_s23 + $0x60] sm:$0xff]   ;;  %vm1261_vm10 = vcmask 130048  }
  0x5d   : > { %v793_v46 = vld [vmem:[#allocation2 + $0x50] sm:$0xff]  ;;  %816 = vst.msk [vmem:[#allocation4 + $0x18] sm:$0xff] %vm630_vm0, %v792_v41  ;;  %v2242_v41 = vsel %vm400_vm11, %v368_v19, %v432_v30  ;;  %v1633_v59 = vunpack.c.l.bf16 %v1658_v27  ;;  %vm1270_vm11 = vcmask 162816  }
  0x5e   : > { %817 = vst.msk [vmem:[#allocation4 + $0x20] sm:$0xff] %vm630_vm0, %v793_v46  ;;  %v741_v55 = vld [vmem:[#allocation2 + $0x60] sm:$0xff]  ;;  %v2248_v46 = vld [vmem:[%s1917_s23 + $0x70] sm:$0xff]   ;;  %v542_v56 = vrot.slane %v2242_v41, 7 }
  0x5f   : > { %703 = vst.msk [vmem:[#allocation2 + $0x98] sm:$0xff] %vm630_vm0, %v519_v42  ;;  %v742_v60 = vld [vmem:[#allocation2 + $0x68] sm:$0xff]  ;;  %v1641_v5 = vunpack.c.l.bf16 %v2248_v46  ;;  %v329_v13 = vmul.f32 %v1922_v1, %v1633_v59 }
  0x60   : > { %v871_v3 = vld [vmem:[#allocation3 + $0x1a] ss:$2 sm:$0xff]  ;;  %768 = vst.msk [vmem:[#allocation3 + $0x30] sm:$0xff] %vm630_vm0, %v741_v55 }
  0x61   : > { %v1693_v49 = vpack.i.bf16 %v871_v3, %v869_v54  ;;  %v744_v52 = vld [vmem:[#allocation2 + $0x90] sm:$0xff]  ;;  %769 = vst.msk [vmem:[#allocation3 + $0x38] sm:$0xff] %vm630_vm0, %v742_v60  ;;  %v541_v54 = vrot.slane %v463_v37, 7  ;;  %v2258_v3 = vsel %vm382_vm13, %v350_v25, %v414_v39  ;;  %v333_v19 = vmul.f32 %v1922_v1, %v1641_v5 }
  0x62   : > { %771 = vst.msk [vmem:[#allocation3 + $0x48] sm:$0xff] %vm630_vm0, %v744_v52  ;;  %v418_v52 = vmul.f32 0.2, %v354_v45  ;;  %v515_v12 = vrot.slane %v2258_v3, 7  ;;  %v365_v25 = vadd.f32 %v1933_v8, %v329_v13  ;;  %vm1288_vm13 = vcmask 228352  }
  0x63   : > { %1694 = vrot.lane.b32.xlu0 %v1693_v49, %s1860_s29  ;;  %v884_v14 = vld [vmem:[#allocation4] ss:$2 sm:$0xff]  ;;  %v900_v15 = vld [vmem:[#allocation4 + $0x1] ss:$2 sm:$0xff]  ;;  %711 = vst.msk [vmem:[#allocation2 + $0xd8] sm:$0xff] %vm630_vm0, %v606_v4  ;;  %v1634_v4 = vunpack.c.h.bf16 %v1658_v27  ;;  %v611_v11 = vsel %vm501_vm5, 0.0, %v541_v54  ;;  %v369_v2 = vadd.f32 %v1933_v8, %v333_v19 }
  0x64   : > { %712 = vst.msk [vmem:[#allocation2 + $0xe0] sm:$0xff] %vm630_vm0, %v528_v6  ;;  %v449_v6 = vsel %vm385_vm14, %v353_v29, %v417_v18  ;;  %v2280_v21 = vsel %vm386_vm15, %v354_v45, %v418_v52  ;;  %vm397_vm1 = vcmp.ge.f32.partialorder %v365_v25, 0.0  ;;  %v429_v39 = vmul.f32 0.2, %v365_v25 }
  0x65   : > { %v886_v23 = vld [vmem:[#allocation4 + $0x18] ss:$2 sm:$0xff]  ;;  %v902_v24 = vld [vmem:[#allocation4 + $0x19] ss:$2 sm:$0xff]  ;;  %717 = vst.msk [vmem:[#allocation2 + $0x108] sm:$0xff] %vm630_vm0, %v608_v10  ;;  %v514_v10 = vrot.slane %v445_v58, 7 }
  0x66   : > { %v1703_v26 = vpack.i.bf16 %v886_v23, %v884_v14  ;;  %v1713_v47 = vpack.i.bf16 %v902_v24, %v900_v15  ;;  %v745_v28 = vld [vmem:[#allocation2 + $0x98] sm:$0xff]  ;;  %718 = vst.msk [vmem:[#allocation2 + $0x110] sm:$0xff] %vm630_vm0, %v534_v16  ;;  %v543_v15 = vsel %vm501_vm5, %v541_v54, %v542_v56  ;;  %v520_v16 = vrot.slane %v449_v6, 7 }
  0x67   : > { %772 = vst.msk [vmem:[#allocation3 + $0x50] sm:$0xff] %vm630_vm0, %v745_v28  ;;  %v602_v22 = vsel %vm501_vm5, 0.0, %v514_v10  ;;  %v1642_v23 = vunpack.c.h.bf16 %v2248_v46  ;;  %v516_v53 = vsel %vm501_vm5, %v514_v10, %v515_v12  ;;  %v521_v30 = vrot.slane %v2280_v21, 7 }
  0x68   : > { %1704 = vrot.lane.b32.xlu1 %v1703_v26, %s1861_s30  ;;  %1714 = vrot.lane.b32.xlu2 %v1713_v47, %s1862_s6  ;;  %689 = vst.msk [vmem:[#allocation2 + $0x28] sm:$0x3] %vm633_vm8, %v614_v17  ;;  %v857_v42 = vld [vmem:[#allocation3 + $0x31] ss:$2 sm:$0xff]  ;;  %v330_v17 = vmul.f32 %v1922_v1, %v1634_v4  ;;  %v604_v47 = vsel %vm501_vm5, 0.0, %v520_v16  ;;  %vm401_vm3 = vcmp.ge.f32.partialorder %v369_v2, 0.0  ;;  %v461_v59 = vsel %vm397_vm1, %v365_v25, %v429_v39 }
  0x69   : > { %695 = vst.msk [vmem:[#allocation2 + $0x58] sm:$0x3] %vm633_vm8, %v616_v20  ;;  %v334_v33 = vmul.f32 %v1922_v1, %v1642_v23  ;;  %v934_v37 = vld [vmem:[#allocation3 + $0x30] ss:$2 sm:$0xff]  ;;  %v433_v27 = vmul.f32 0.2, %v369_v2  ;;  %v522_v46 = vsel %vm501_vm5, %v520_v16, %v521_v30 }
  0x6a   : > { %v801_v34 = vld [vmem:[#allocation2 + $0xd8] sm:$0xff]  ;;  %698 = vst.msk [vmem:[#allocation2 + $0x70] sm:$0x3] %vm633_vm8, %v617_v36  ;;  %v366_v28 = vadd.f32 %v1933_v8, %v330_v17  ;;  %v622_v6 = vsel %vm501_vm5, %v527_v48, 0.0  ;;  %v624_v10 = vsel %vm501_vm5, %v533_v62, 0.0  ;;  %v538_v13 = vrot.slane %v461_v59, 7 }
  0x6b   : > { %v802_v40 = vld [vmem:[#allocation2 + $0xe0] sm:$0xff]  ;;  %825 = vst.msk [vmem:[#allocation4 + $0x60] sm:$0xff] %vm630_vm0, %v801_v34  ;;  %v932_v34 = vld [vmem:[#allocation3 + $0x18] ss:$2 sm:$0xff]  ;;  %v627_v62 = vsel %vm501_vm5, %v542_v56, 0.0  ;;  %vm1297_vm14 = vcmask 261120  }
  0x6c   : > { %v804_v44 = vld [vmem:[#allocation2 + $0x108] sm:$0xff]  ;;  %826 = vst.msk [vmem:[#allocation4 + $0x68] sm:$0xff] %vm630_vm0, %v802_v40  ;;  %v430_v18 = vmul.f32 0.2, %v366_v28  ;;  %vm398_vm2 = vcmp.ge.f32.partialorder %v366_v28, 0.0  ;;  %v1743_v4 = vpack.i.bf16 %v934_v37, %v932_v34  ;;  %v610_v17 = vsel %vm501_vm5, 0.0, %v538_v13 }
  0x6d   : > { %v805_v50 = vld [vmem:[#allocation2 + $0x110] sm:$0xff]  ;;  %828 = vst.msk [vmem:[#allocation4 + $0x78] sm:$0xff] %vm630_vm0, %v804_v44  ;;  %vm1330_vm15 = vcmask 293888   ;;  %vm1414_vm1 = vcmask 57344  }
  0x6e   : > { %v859_v55 = vld [vmem:[#allocation3 + $0x49] ss:$2 sm:$0xff]  ;;  %829 = vst.msk [vmem:[#allocation4 + $0x80] sm:$0xff] %vm630_vm0, %v805_v50 }
  0x6f   : > { %v1718_v60 = vpack.i.bf16 %v859_v55, %v857_v42  ;;  %v791_v63 = vld [vmem:[#allocation2 + $0x28] sm:$0x3]  ;;  %704 = vst.msk [vmem:[#allocation2 + $0xa0] sm:$0x3] %vm633_vm8, %v619_v31  ;;  %v1661_v50 = vld [vmem:[%s1917_s23 + $0x78] sm:$0xff]   ;;  %v370_v55 = vadd.f32 %v1933_v8, %v334_v33  ;;  %s1564_s23 = sshll.u32 %s2609_s19, 1 }
  0x70   : > { %v794_v49 = vld [vmem:[#allocation2 + $0x58] sm:$0x3]  ;;  %815 = vst.msk [vmem:[#allocation4 + $0x10] sm:$0x3] %vm633_vm8, %v791_v63  ;;  %s235_s26 = scalar_lea.vmem %s2607_s5, %s1564_s23 }
  0x71   : > { %1719 = vrot.lane.b32.xlu0 %v1718_v60, %s1859_s28  ;;  %818 = vst.msk [vmem:[#allocation4 + $0x28] sm:$0x3] %vm633_vm8, %v794_v49  ;;  %v743_v7 = vld [vmem:[#allocation2 + $0x70] sm:$0x3]  ;;  %v1646_v60 = vunpack.c.h.bf16 %v1661_v50  ;;  %v2311_v49 = vsel %vm398_vm2, %v366_v28, %v430_v18  ;;  %vm402_vm4 = vcmp.ge.f32.partialorder %v370_v55, 0.0 }
  0x72   : > { %770 = vst.msk [vmem:[#allocation3 + $0x40] sm:$0x3] %vm633_vm8, %v743_v7  ;;  %v465_v7 = vsel %vm401_vm3, %v369_v2, %v433_v27  ;;  %v539_v48 = vrot.slane %v2311_v49, 7  ;;  %v964_v49 = vld [vmem:[#allocation3 + $0x1a] ss:$2 sm:$0xff] }
  0x73   : > { %v892_v14 = vld [vmem:[#allocation4 + $0x60] ss:$2 sm:$0xff]  ;;  %720 = vst.msk [vmem:[#allocation2 + $0x120] sm:$0xff] %vm630_vm0, %v609_v57  ;;  %v908_v0 = vld [vmem:[#allocation4 + $0x61] ss:$2 sm:$0xff]  ;;  %v1645_v57 = vunpack.c.l.bf16 %v1661_v50  ;;  %v544_v16 = vrot.slane %v465_v7, 7 }
  0x74   : > { %721 = vst.msk [vmem:[#allocation2 + $0x128] sm:$0xff] %vm630_vm0, %v537_v9  ;;  %v540_v41 = vsel %vm501_vm5, %v538_v13, %v539_v48  ;;  %v626_v3 = vsel %vm501_vm5, %v539_v48, 0.0 }
  0x75   : > { %v894_v20 = vld [vmem:[#allocation4 + $0x78] ss:$2 sm:$0xff]  ;;  %726 = vst.msk [vmem:[#allocation2 + $0x150] sm:$0xff] %vm630_vm0, %v611_v11  ;;  %v910_v31 = vld [vmem:[#allocation4 + $0x79] ss:$2 sm:$0xff] }
  0x76   : > { %v1723_v24 = vpack.i.bf16 %v894_v20, %v892_v14  ;;  %v746_v36 = vld [vmem:[#allocation2 + $0xa0] sm:$0x3]  ;;  %727 = vst.msk [vmem:[#allocation2 + $0x158] sm:$0xff] %vm630_vm0, %v543_v15  ;;  %v1738_v44 = vpack.i.bf16 %v910_v31, %v908_v0  ;;  %v434_v11 = vmul.f32 0.2, %v370_v55  ;;  %v335_v14 = vmul.f32 %v1922_v1, %v1645_v57 }
  0x77   : > { %v916_v26 = vld [vmem:[#allocation4 + $0x2] ss:$2 sm:$0xff]  ;;  %773 = vst.msk [vmem:[#allocation3 + $0x58] sm:$0x3] %vm633_vm8, %v746_v36  ;;  %v336_v15 = vmul.f32 %v1922_v1, %v1646_v60  ;;  %v950_v36 = vld [vmem:[#allocation3 + $0x31] ss:$2 sm:$0xff] }
  0x78   : > { %1724 = vrot.lane.b32.xlu1 %v1723_v24, %s1861_s30  ;;  %v918_v29 = vld [vmem:[#allocation4 + $0x1a] ss:$2 sm:$0xff]  ;;  %699 = vst.msk [vmem:[#allocation2 + $0x78] sm:$0xff] %vm630_vm0, %v602_v22  ;;  %v466_v51 = vsel %vm402_vm4, %v370_v55, %v434_v11  ;;  %v371_v1 = vadd.f32 %v1933_v8, %v335_v14  ;;  %v612_v22 = vsel %vm501_vm5, 0.0, %v544_v16  ;;  %v948_v24 = vld [vmem:[#allocation3 + $0x19] ss:$2 sm:$0xff] }
  0x79   : > { %v1728_v61 = vpack.i.bf16 %v918_v29, %v916_v26  ;;  %700 = vst.msk [vmem:[#allocation2 + $0x80] sm:$0xff] %vm630_vm0, %v516_v53  ;;  %v873_v42 = vld [vmem:[#allocation3 + $0x32] ss:$2 sm:$0xff]  ;;  %v372_v56 = vadd.f32 %v1933_v8, %v336_v15  ;;  %v545_v23 = vrot.slane %v466_v51, 7  ;;  %v1763_v29 = vpack.i.bf16 %v950_v36, %v948_v24 }
  0x7a   : > { %v753_v38 = vld [vmem:[#allocation2 + $0x120] sm:$0xff]  ;;  %705 = vst.msk [vmem:[#allocation2 + $0xa8] sm:$0xff] %vm630_vm0, %v604_v47  ;;  %vm403_vm6 = vcmp.ge.f32.partialorder %v371_v1, 0.0  ;;  %v435_v25 = vmul.f32 0.2, %v371_v1 }
  0x7b   : > { %1729 = vrot.lane.b32.xlu2 %v1728_v61, %s1863_s7  ;;  %v754_v40 = vld [vmem:[#allocation2 + $0x128] sm:$0xff]  ;;  %780 = vst.msk [vmem:[#allocation3 + $0x90] sm:$0xff] %vm630_vm0, %v753_v38  ;;  %vm404_vm7 = vcmp.ge.f32.partialorder %v372_v56, 0.0  ;;  %v436_v26 = vmul.f32 0.2, %v372_v56  ;;  %v546_v2 = vsel %vm501_vm5, %v544_v16, %v545_v23  ;;  %v628_v50 = vsel %vm501_vm5, %v545_v23, 0.0 }
  0x7c   : > { %v756_v45 = vld [vmem:[#allocation2 + $0x150] sm:$0xff]  ;;  %781 = vst.msk [vmem:[#allocation3 + $0x98] sm:$0xff] %vm630_vm0, %v754_v40  ;;  %v467_v31 = vsel %vm403_vm6, %v371_v1, %v435_v25  ;;  %v618_v40 = vsel %vm501_vm5, %v515_v12, 0.0 }
  0x7d   : > { %v757_v54 = vld [vmem:[#allocation2 + $0x158] sm:$0xff]  ;;  %783 = vst.msk [vmem:[#allocation3 + $0xa8] sm:$0xff] %vm630_vm0, %v756_v45  ;;  %v468_v37 = vsel %vm404_vm7, %v372_v56, %v436_v26  ;;  %v940_v38 = vld [vmem:[#allocation3 + $0x78] ss:$2 sm:$0xff] }
  0x7e   : > { %v875_v58 = vld [vmem:[#allocation3 + $0x4a] ss:$2 sm:$0xff]  ;;  %784 = vst.msk [vmem:[#allocation3 + $0xb0] sm:$0xff] %vm630_vm0, %v757_v54  ;;  %v548_v12 = vrot.slane %v468_v37, 7  ;;  %v972_v36 = vld [vmem:[#allocation3 + $0x7a] ss:$2 sm:$0xff] }
  0x7f   : > { %v1733_v63 = vpack.i.bf16 %v875_v58, %v873_v42  ;;  %706 = vst.msk [vmem:[#allocation2 + $0xb0] sm:$0xff] %vm630_vm0, %v522_v46  ;;  %v795_v5 = vld [vmem:[#allocation2 + $0x78] sm:$0xff]  ;;  %v620_v42 = vsel %vm501_vm5, %v521_v30, 0.0 }
  0x80   : > { %1739 = vrot.lane.b32.xlu1 %v1738_v44, %s1862_s6  ;;  %v796_v52 = vld [vmem:[#allocation2 + $0x80] sm:$0xff]  ;;  %819 = vst.msk [vmem:[#allocation4 + $0x30] sm:$0xff] %vm630_vm0, %v795_v5  ;;  %v547_v44 = vrot.slane %v467_v31, 7  ;;  %v629_v5 = vsel %vm501_vm5, %v548_v12, 0.0 }
  0x81   : > { %1734 = vrot.lane.b32.xlu0 %v1733_v63, %s1860_s29  ;;  %v798_v9 = vld [vmem:[#allocation2 + $0xa8] sm:$0xff]  ;;  %820 = vst.msk [vmem:[#allocation4 + $0x38] sm:$0xff] %vm630_vm0, %v796_v52 }
  0x82   : > { %822 = vst.msk [vmem:[#allocation4 + $0x48] sm:$0xff] %vm630_vm0, %v798_v9  ;;  %v613_v57 = vsel %vm501_vm5, 0.0, %v547_v44  ;;  %v549_v60 = vsel %vm501_vm5, %v547_v44, %v548_v12  ;;  %v968_v37 = vld [vmem:[#allocation3 + $0x4a] ss:$2 sm:$0xff]  ;;  %vm1343_vm5 = vcmask 1041408  }
  0x83   : > { %1744 = vrot.lane.b32.xlu2 %v1743_v4, %s1864_s8  ;;  %v865_v43 = vld [vmem:[#allocation3 + $0x91] ss:$2 sm:$0xff]  ;;  %713 = vst.msk [vmem:[#allocation2 + $0xe8] sm:$0x3] %vm633_vm8, %v622_v6  ;;  %v942_v18 = vld [vmem:[#allocation3 + $0x90] ss:$2 sm:$0xff] }
  0x84   : > { %719 = vst.msk [vmem:[#allocation2 + $0x118] sm:$0x3] %vm633_vm8, %v624_v10  ;;  %v1778_v30 = vpack.i.bf16 %v942_v18, %v940_v38  ;;  %v966_v6 = vld [vmem:[#allocation3 + $0x32] ss:$2 sm:$0xff]  ;;  %v958_v51 = vld [vmem:[#allocation3 + $0x91] ss:$2 sm:$0xff] }
  0x85   : > { %v867_v35 = vld [vmem:[#allocation3 + $0xa9] ss:$2 sm:$0xff]  ;;  %722 = vst.msk [vmem:[#allocation2 + $0x130] sm:$0x3] %vm633_vm8, %v625_v32  ;;  %v1783_v11 = vpack.i.bf16 %v966_v6, %v964_v49  ;;  %v970_v38 = vld [vmem:[#allocation3 + $0x62] ss:$2 sm:$0xff] }
  0x86   : > { %v1748_v19 = vpack.i.bf16 %v867_v35, %v865_v43  ;;  %v799_v20 = vld [vmem:[#allocation2 + $0xb0] sm:$0xff]  ;;  %728 = vst.msk [vmem:[#allocation2 + $0x160] sm:$0x3] %vm633_vm8, %v627_v62 }
  0x87   : > { %823 = vst.msk [vmem:[#allocation4 + $0x50] sm:$0xff] %vm630_vm0, %v799_v20  ;;  %v956_v43 = vld [vmem:[#allocation3 + $0x79] ss:$2 sm:$0xff]  ;;  %v936_v20 = vld [vmem:[#allocation3 + $0x48] ss:$2 sm:$0xff] }
  0x88   : > { %723 = vst.msk [vmem:[#allocation2 + $0x138] sm:$0xff] %vm630_vm0, %v610_v17  ;;  %v888_v47 = vld [vmem:[#allocation4 + $0x30] ss:$2 sm:$0xff]  ;;  %v904_v63 = vld [vmem:[#allocation4 + $0x31] ss:$2 sm:$0xff] }
  0x89   : > { %1749 = vrot.lane.b32.xlu0 %v1748_v19, %s1859_s28  ;;  %724 = vst.msk [vmem:[#allocation2 + $0x140] sm:$0xff] %vm630_vm0, %v540_v41  ;;  %v1798_v19 = vpack.i.bf16 %v958_v51, %v956_v43 }
  0x8a   : > { %v803_v53 = vld [vmem:[#allocation2 + $0xe8] sm:$0x3]  ;;  %729 = vst.msk [vmem:[#allocation2 + $0x168] sm:$0xff] %vm630_vm0, %v612_v22  ;;  %v938_v22 = vld [vmem:[#allocation3 + $0x60] ss:$2 sm:$0xff] }
  0x8b   : > { %v806_v8 = vld [vmem:[#allocation2 + $0x118] sm:$0x3]  ;;  %827 = vst.msk [vmem:[#allocation4 + $0x70] sm:$0x3] %vm633_vm8, %v803_v53  ;;  %v1808_v24 = vpack.i.bf16 %v938_v22, %v936_v20 }
  0x8c   : > { %830 = vst.msk [vmem:[#allocation4 + $0x88] sm:$0x3] %vm633_vm8, %v806_v8  ;;  %v755_v28 = vld [vmem:[#allocation2 + $0x130] sm:$0x3]  ;;  %v952_v8 = vld [vmem:[#allocation3 + $0x49] ss:$2 sm:$0xff] }
  0x8d   : > { %v758_v61 = vld [vmem:[#allocation2 + $0x160] sm:$0x3]  ;;  %782 = vst.msk [vmem:[#allocation3 + $0xa0] sm:$0x3] %vm633_vm8, %v755_v28  ;;  %v954_v28 = vld [vmem:[#allocation3 + $0x61] ss:$2 sm:$0xff] }
  0x8e   : > { %v890_v0 = vld [vmem:[#allocation4 + $0x48] ss:$2 sm:$0xff]  ;;  %785 = vst.msk [vmem:[#allocation3 + $0xb8] sm:$0x3] %vm633_vm8, %v758_v61  ;;  %v906_v4 = vld [vmem:[#allocation4 + $0x49] ss:$2 sm:$0xff] }
  0x8f   : > { %v1753_v33 = vpack.i.bf16 %v890_v0, %v888_v47  ;;  %730 = vst.msk [vmem:[#allocation2 + $0x170] sm:$0xff] %vm630_vm0, %v546_v2  ;;  %v807_v34 = vld [vmem:[#allocation2 + $0x138] sm:$0xff]  ;;  %v1773_v52 = vpack.i.bf16 %v906_v4, %v904_v63  ;;  %v1582_v63 = vld [vmem:[%s2603_s1 + $0x8] sm:$0xff] }
  0x90   : > { %v808_v39 = vld [vmem:[#allocation2 + $0x140] sm:$0xff]  ;;  %831 = vst.msk [vmem:[#allocation4 + $0x90] sm:$0xff] %vm630_vm0, %v807_v34 }
  0x91   : > { %1754 = vrot.lane.b32.xlu1 %v1753_v33, %s1861_s30  ;;  %1764 = vrot.lane.b32.xlu0 %v1763_v29, %s1865_s9  ;;  %v810_v27 = vld [vmem:[#allocation2 + $0x168] sm:$0xff]  ;;  %832 = vst.msk [vmem:[#allocation4 + $0x98] sm:$0xff] %vm630_vm0, %v808_v39  ;;  %v1823_v29 = vpack.i.bf16 %v954_v28, %v952_v8  ;;  %v944_v61 = vld [vmem:[#allocation3 + $0xa8] ss:$2 sm:$0xff]  ;;  %v960_v33 = vld [vmem:[#allocation3 + $0xa9] ss:$2 sm:$0xff] }
  0x92   : > { %v924_v45 = vld [vmem:[#allocation4 + $0x62] ss:$2 sm:$0xff]  ;;  %834 = vst.msk [vmem:[#allocation4 + $0xa8] sm:$0xff] %vm630_vm0, %v810_v27  ;;  %v1833_v27 = vpack.i.bf16 %v970_v38, %v968_v37 }
  0x93   : > { %v926_v46 = vld [vmem:[#allocation4 + $0x7a] ss:$2 sm:$0xff]  ;;  %701 = vst.msk [vmem:[#allocation2 + $0x88] sm:$0x3] %vm633_vm8, %v618_v40 }
  0x94   : > { %v1758_v54 = vpack.i.bf16 %v926_v46, %v924_v45  ;;  %v881_v55 = vld [vmem:[#allocation3 + $0x92] ss:$2 sm:$0xff]  ;;  %707 = vst.msk [vmem:[#allocation2 + $0xb8] sm:$0x3] %vm633_vm8, %v620_v42 }
  0x95   : > { %v883_v21 = vld [vmem:[#allocation3 + $0xaa] ss:$2 sm:$0xff]  ;;  %725 = vst.msk [vmem:[#allocation2 + $0x148] sm:$0x3] %vm633_vm8, %v626_v3 }
  0x96   : > { %1759 = vrot.lane.b32.xlu2 %v1758_v54, %s1863_s7  ;;  %v1768_v58 = vpack.i.bf16 %v883_v21, %v881_v55  ;;  %v811_v59 = vld [vmem:[#allocation2 + $0x170] sm:$0xff]  ;;  %731 = vst.msk [vmem:[#allocation2 + $0x178] sm:$0x3] %vm633_vm8, %v628_v50  ;;  %v976_v40 = vld [vmem:[#allocation3 + $0xaa] ss:$2 sm:$0xff] }
  0x97   : > { %835 = vst.msk [vmem:[#allocation4 + $0xb0] sm:$0xff] %vm630_vm0, %v811_v59  ;;  %v974_v53 = vld [vmem:[#allocation3 + $0x92] ss:$2 sm:$0xff] }
  0x98   : > { %732 = vst.msk [vmem:[#allocation2 + $0x180] sm:$0xff] %vm630_vm0, %v613_v57  ;;  %v896_v14 = vld [vmem:[#allocation4 + $0x90] ss:$2 sm:$0xff]  ;;  %v912_v41 = vld [vmem:[#allocation4 + $0x91] ss:$2 sm:$0xff]  ;;  %v1813_v25 = vpack.i.bf16 %v974_v53, %v972_v36 }
  0x99   : > { %1769 = vrot.lane.b32.xlu1 %v1768_v58, %s1860_s29  ;;  %1779 = vrot.lane.b32.xlu0 %v1778_v30, %s1864_s8  ;;  %733 = vst.msk [vmem:[#allocation2 + $0x188] sm:$0xff] %vm630_vm0, %v549_v60  ;;  %v1314_v21 = vld [vmem:[%s2603_s1 + $0x10] sm:$0x3] }
  0x9a   : > { %v797_v7 = vld [vmem:[#allocation2 + $0x88] sm:$0x3]  ;;  %734 = vst.msk [vmem:[#allocation2 + $0x190] sm:$0x3] %vm633_vm8, %v629_v5  ;;  %v1324_v57 = vunpack.c.l.b16 %v1314_v21  ;;  %v1581_v5 = vld [vmem:[%s2603_s1] sm:$0xff] }
  0x9b   : > { %v800_v9 = vld [vmem:[#allocation2 + $0xb8] sm:$0x3]  ;;  %821 = vst.msk [vmem:[#allocation4 + $0x40] sm:$0x3] %vm633_vm8, %v797_v7 }
  0x9c   : > { %824 = vst.msk [vmem:[#allocation4 + $0x58] sm:$0x3] %vm633_vm8, %v800_v9  ;;  %v809_v10 = vld [vmem:[#allocation2 + $0x148] sm:$0x3]  ;;  %v1327_v58 = vpack.c.b16 %v1324_v57, %v1324_v57 }
  0x9d   : > { %v812_v13 = vld [vmem:[#allocation2 + $0x178] sm:$0x3]  ;;  %833 = vst.msk [vmem:[#allocation4 + $0xa0] sm:$0x3] %vm633_vm8, %v809_v10 }
  0x9e   : > { %1774 = vrot.lane.b32.xlu2 %v1773_v52, %s1862_s6  ;;  %836 = vst.msk [vmem:[#allocation4 + $0xb8] sm:$0x3] %vm633_vm8, %v812_v13  ;;  %v898_v32 = vld [vmem:[#allocation4 + $0xa8] ss:$2 sm:$0xff]  ;;  %v914_v56 = vld [vmem:[#allocation4 + $0xa9] ss:$2 sm:$0xff] }
  0x9f   : > { %v759_v48 = vld [vmem:[#allocation2 + $0x180] sm:$0xff]  ;;  %v1788_v16 = vpack.i.bf16 %v898_v32, %v896_v14  ;;  %v1803_v23 = vpack.i.bf16 %v914_v56, %v912_v41  ;;  %v1345_v60 = vsel %vm1343_vm5, %v1327_v58, 0  ;;  %v837_v10 = vld [vmem:[#allocation3] ss:$2 sm:$0xff] }
  0xa0   : > { %v760_v15 = vld [vmem:[#allocation2 + $0x188] sm:$0xff]  ;;  %786 = vst.msk [vmem:[#allocation3 + $0xc0] sm:$0xff] %vm630_vm0, %v759_v48  ;;  %1352 = vmatpush.bf16.msra.mxu0 %v1345_v60  ;;  %1663 = vmatpush.bf16.msra.mxu2 %v1345_v60 }
  0xa1   : > { %1784 = vrot.lane.b32.xlu1 %v1783_v11, %s1866_s10  ;;  %787 = vst.msk [vmem:[#allocation3 + $0xc8] sm:$0xff] %vm630_vm0, %v760_v15  ;;  %v761_v62 = vld [vmem:[#allocation2 + $0x190] sm:$0x3]  ;;  %1662 = vmatpush.bf16.msra.mxu1 %v1345_v60 }
  0xa2   : > { %v920_v35 = vld [vmem:[#allocation4 + $0x32] ss:$2 sm:$0xff]  ;;  %788 = vst.msk [vmem:[#allocation3 + $0xd0] sm:$0x3] %vm633_vm8, %v761_v62  ;;  %1664 = vmatpush.bf16.msra.mxu3 %v1345_v60  ;;  %vm1243_vm8 = vcmask 64512  }
  0xa3   : > { %v922_v17 = vld [vmem:[#allocation4 + $0x4a] ss:$2 sm:$0xff] }
  0xa4   : > { %v1793_v1 = vpack.i.bf16 %v922_v17, %v920_v35  ;;  %v928_v26 = vld [vmem:[#allocation4 + $0x92] ss:$2 sm:$0xff]  ;;  %v2410_v12 = vpop.permute.xlu1 %1699  ;;  %1353 = vmatpush.bf16.msra.mxu0 %v1582_v63  ;;  %1666 = vmatpush.bf16.msra.mxu2 %v1582_v63 }
  0xa5   : > { %v930_v47 = vld [vmem:[#allocation4 + $0xaa] ss:$2 sm:$0xff]  ;;  %1665 = vmatpush.bf16.msra.mxu1 %v1582_v63 }
  0xa6   : > { %1789 = vrot.lane.b32.xlu2 %v1788_v16, %s1861_s30  ;;  %1794 = vrot.lane.b32.xlu0 %v1793_v1, %s1863_s7  ;;  %v1818_v2 = vpack.i.bf16 %v930_v47, %v928_v26  ;;  %v839_v14 = vld [vmem:[#allocation3 + $0x18] ss:$2 sm:$0xff] }
  0xa7   : > { %1667 = vmatpush.bf16.msra.mxu3 %v1582_v63 }
  0xa8   : > { %v946_v0 = vld [vmem:[#allocation3 + $0xc0] ss:$2 sm:$0xff]  ;;  %v962_v34 = vld [vmem:[#allocation3 + $0xc1] ss:$2 sm:$0xff]  ;;  %1354 = vmatpush.bf16.msra.mxu0 %v1581_v5  ;;  %1669 = vmatpush.bf16.msra.mxu2 %v1581_v5 }
  0xa9   : > { %1799 = vrot.lane.b32.xlu1 %v1798_v19, %s1865_s9  ;;  %v1828_v31 = vpack.i.bf16 %v946_v0, %v944_v61  ;;  %v1838_v39 = vpack.i.bf16 %v962_v34, %v960_v33  ;;  %v978_v18 = vld [vmem:[#allocation3 + $0xc2] ss:$2 sm:$0xff]  ;;  %v2408_v44 = vpop.permute.xlu2 %1709  ;;  %1668 = vmatpush.bf16.msra.mxu1 %v1581_v5  ;;  %v1701_v61 = vunpack.i.l.bf16 %v2410_v12 }
  0xaa   : > { %v1843_v42 = vpack.i.bf16 %v978_v18, %v976_v40  ;;  %v845_v40 = vld [vmem:[#allocation3 + $0x60] ss:$2 sm:$0xff] }
  0xab   : > { %1670 = vmatpush.bf16.msra.mxu3 %v1581_v5  ;;  %v1239_v21 = vsel %vm630_vm0, %v845_v40, %v1701_v61 }
  0xae   : > { %1804 = vrot.lane.b32.xlu2 %v1803_v23, %s1862_s6  ;;  %1809 = vrot.lane.b32.xlu0 %v1808_v24, %s1864_s8 }
  0xb1   : > { %1814 = vrot.lane.b32.xlu1 %v1813_v25, %s1866_s10 }
  0xb6   : > { %1819 = vrot.lane.b32.xlu2 %v1818_v2, %s1863_s7  ;;  %1824 = vrot.lane.b32.xlu0 %v1823_v29, %s1865_s9 }
  0xb9   : > { %1829 = vrot.lane.b32.xlu1 %v1828_v31, %s1864_s8 }
  0xbb   : > { %v1690_v45 = vpop.permute.xlu0 %1689 }
  0xbc   : > { %v1691_v9 = vunpack.i.l.bf16 %v1690_v45  ;;  %v1692_v11 = vunpack.i.h.bf16 %v1690_v45 }
  0xbe   : > { %1839 = vrot.lane.b32.xlu0 %v1838_v39, %s1865_s9  ;;  %1834 = vrot.lane.b32.xlu2 %v1833_v27, %s1866_s10  ;;  %v1235_v43 = vsel %vm630_vm0, %v837_v10, %v1691_v9  ;;  %v1236_v62 = vsel %vm630_vm0, %v839_v14, %v1692_v11  ;;  %v1702_v39 = vunpack.i.h.bf16 %v2410_v12  ;;  %v841_v9 = vld [vmem:[#allocation3 + $0x30] ss:$2 sm:$0xff] }
  0xc1   : > { %1844 = vrot.lane.b32.xlu1 %v1843_v42, %s1866_s10  ;;  %v847_v42 = vld [vmem:[#allocation3 + $0x78] ss:$2 sm:$0xff] }
  0xc2   : > { %v1715_v3 = vpop.permute.xlu2 %1714  ;;  %v1240_v57 = vsel %vm630_vm0, %v847_v42, %v1702_v39 }
  0xc3   : > { %v1717_v19 = vunpack.i.h.bf16 %v1715_v3  ;;  %v1716_v20 = vunpack.i.l.bf16 %v1715_v3 }
  0xd5   : > { %v1695_v46 = vpop.permute.xlu0 %1694  ;;  %v2412_v50 = vpop.permute.xlu2 %1729 }
  0xd6   : > { %v1697_v32 = vunpack.i.h.bf16 %v1695_v46  ;;  %v1696_v48 = vunpack.i.l.bf16 %v1695_v46  ;;  %v1732_v23 = vunpack.i.h.bf16 %v2412_v50  ;;  %v1731_v24 = vunpack.i.l.bf16 %v2412_v50 }
  0xd7   : > { %v1711_v46 = vunpack.i.l.bf16 %v2408_v44 }
  0xd8   : > { %v1244_v51 = vsel %vm1243_vm8, %v1235_v43, %v1696_v48  ;;  %v1245_v17 = vsel %vm1243_vm8, %v1236_v62, %v1697_v32  ;;  %v843_v48 = vld [vmem:[#allocation3 + $0x48] ss:$2 sm:$0xff] }
  0xd9   : > { %v1248_v10 = vsel %vm1243_vm8, %v1239_v21, %v1711_v46 }
  0xda   : > { %v1705_v54 = vpop.permute.xlu1 %1704 }
  0xdb   : > { %v1707_v16 = vunpack.i.h.bf16 %v1705_v54  ;;  %v1706_v35 = vunpack.i.l.bf16 %v1705_v54  ;;  %v1712_v54 = vunpack.i.h.bf16 %v2408_v44 }
  0xdd   : > { %v2419_v30 = vpop.permute.xlu2 %1744  ;;  %v1254_v41 = vsel %vm1252_vm9, %v1245_v17, %v1707_v16  ;;  %v1253_v56 = vsel %vm1252_vm9, %v1244_v51, %v1706_v35 }
  0xde   : > { %v1263_v36 = vsel %vm1261_vm10, %v1254_v41, %v1717_v19  ;;  %v1262_v53 = vsel %vm1261_vm10, %v1253_v56, %v1716_v20  ;;  %v1747_v8 = vunpack.i.h.bf16 %v2419_v30  ;;  %v1746_v26 = vunpack.i.l.bf16 %v2419_v30  ;;  %v849_v41 = vld [vmem:[#allocation3 + $0x90] ss:$2 sm:$0xff] }
  0xdf   : > { %v1271_v2 = vsel %vm1270_vm11, %v1262_v53, %v1731_v24  ;;  %v1272_v29 = vsel %vm1270_vm11, %v1263_v36, %v1732_v23 }
  0xe0   : > { %v1280_v33 = vsel %vm1279_vm12, %v1271_v2, %v1746_v26  ;;  %v1281_v34 = vsel %vm1279_vm12, %v1272_v29, %v1747_v8 }
  0xe3   : > { %v2414_v55 = vpop.permute.xlu0 %1719 }
  0xe4   : > { %v1721_v63 = vunpack.i.l.bf16 %v2414_v55  ;;  %v1722_v44 = vunpack.i.h.bf16 %v2414_v55 }
  0xe6   : > { %v1237_v35 = vsel %vm630_vm0, %v841_v9, %v1721_v63  ;;  %v1238_v20 = vsel %vm630_vm0, %v843_v48, %v1722_v44 }
  0xea   : > { %v2421_v59 = vpop.permute.xlu1 %1724 }
  0xeb   : > { %v1726_v12 = vunpack.i.l.bf16 %v2421_v59  ;;  %v1727_v58 = vunpack.i.h.bf16 %v2421_v59  ;;  %v1249_v59 = vsel %vm1243_vm8, %v1240_v57, %v1712_v54 }
  0xf0   : > { %v2431_v49 = vpop.permute.xlu2 %1759 }
  0xf1   : > { %v1761_v32 = vunpack.i.l.bf16 %v2431_v49  ;;  %v1762_v62 = vunpack.i.h.bf16 %v2431_v49  ;;  %v851_v49 = vld [vmem:[#allocation3 + $0xa8] ss:$2 sm:$0xff] }
  0xf2   : > { %v2433_v52 = vpop.permute.xlu1 %1739 }
  0xf3   : > { %v2426_v4 = vpop.permute.xlu0 %1734  ;;  %v1741_v60 = vunpack.i.l.bf16 %v2433_v52  ;;  %v1742_v5 = vunpack.i.h.bf16 %v2433_v52  ;;  %v1258_v52 = vsel %vm1252_vm9, %v1249_v59, %v1727_v58 }
  0xf4   : > { %v1736_v11 = vunpack.i.l.bf16 %v2426_v4  ;;  %v1737_v43 = vunpack.i.h.bf16 %v2426_v4 }
  0xf5   : > { %v1267_v51 = vsel %vm1261_vm10, %v1258_v52, %v1742_v5 }
  0xf6   : > { %v1246_v4 = vsel %vm1243_vm8, %v1237_v35, %v1736_v11  ;;  %v1247_v24 = vsel %vm1243_vm8, %v1238_v20, %v1737_v43 }
  0xf8   : > { %v2437_v7 = vpop.permute.xlu2 %1774 }
  0xf9   : > { %v1776_v29 = vunpack.i.l.bf16 %v2437_v7 }
  0xfb   : > { %v2435_v6 = vpop.permute.xlu0 %1749 }
  0xfc   : > { %v1752_v17 = vunpack.i.h.bf16 %v2435_v6  ;;  %v1751_v19 = vunpack.i.l.bf16 %v2435_v6  ;;  %v1777_v6 = vunpack.i.h.bf16 %v2437_v7 }
 0x100   : > { %v2445_v1 = vpop.permute.xlu2 %1789 }
 0x101   : > { %v1792_v61 = vunpack.i.h.bf16 %v2445_v1 }
 0x103   : > { %v2439_v13 = vpop.permute.xlu1 %1754  ;;  %v1765_v15 = vpop.permute.xlu0 %1764 }
 0x104   : > { %v1767_v47 = vunpack.i.h.bf16 %v1765_v15  ;;  %v1766_v28 = vunpack.i.l.bf16 %v1765_v15  ;;  %v1257_v15 = vsel %vm1252_vm9, %v1248_v10, %v1726_v12  ;;  %v1757_v56 = vunpack.i.h.bf16 %v2439_v13 }
 0x105   : > { %v1266_v55 = vsel %vm1261_vm10, %v1257_v15, %v1741_v60  ;;  %v1756_v23 = vunpack.i.l.bf16 %v2439_v13  ;;  %v1242_v13 = vsel %vm630_vm0, %v851_v49, %v1752_v17  ;;  %v1791_v12 = vunpack.i.l.bf16 %v2445_v1 }
 0x106   : > { %v1289_v18 = vsel %vm1288_vm13, %v1280_v33, %v1766_v28  ;;  %v1290_v27 = vsel %vm1288_vm13, %v1281_v34, %v1767_v47  ;;  %v1275_v8 = vsel %vm1270_vm11, %v1266_v55, %v1761_v32  ;;  %v1276_v47 = vsel %vm1270_vm11, %v1267_v51, %v1762_v62 }
 0x107   : > { %v1256_v33 = vsel %vm1252_vm9, %v1247_v24, %v1757_v56 }
 0x108   : > { %v2462_v0 = vpop.permute.xlu2 %1804  ;;  %v1265_v58 = vsel %vm1261_vm10, %v1256_v33, %v1777_v6 }
 0x109   : > { %v1807_v32 = vunpack.i.h.bf16 %v2462_v0  ;;  %v1806_v48 = vunpack.i.l.bf16 %v2462_v0 }
 0x10b   : > { %v2449_v22 = vpop.permute.xlu1 %1769  ;;  %v2455_v25 = vpop.permute.xlu0 %1779 }
 0x10c   : > { %v1782_v36 = vunpack.i.h.bf16 %v2455_v25  ;;  %v1781_v53 = vunpack.i.l.bf16 %v2455_v25  ;;  %v1255_v25 = vsel %vm1252_vm9, %v1246_v4, %v1756_v23  ;;  %v1772_v34 = vunpack.i.h.bf16 %v2449_v22 }
 0x10d   : > { %v1264_v57 = vsel %vm1261_vm10, %v1255_v25, %v1776_v29 }
 0x10e   : > { %v1284_v39 = vsel %vm1279_vm12, %v1275_v8, %v1781_v53  ;;  %v1285_v40 = vsel %vm1279_vm12, %v1276_v47, %v1782_v36 }
 0x110   : > { %v2493_v16 = vpop.permute.xlu2 %1819 }
 0x111   : > { %v1821_v0 = vunpack.i.l.bf16 %v2493_v16 }
 0x113   : > { %v1785_v31 = vpop.permute.xlu1 %1784 }
 0x114   : > { %v1787_v37 = vunpack.i.h.bf16 %v1785_v31  ;;  %v1786_v38 = vunpack.i.l.bf16 %v1785_v31  ;;  %v1241_v31 = vsel %vm630_vm0, %v849_v41, %v1751_v19  ;;  %v1822_v19 = vunpack.i.h.bf16 %v2493_v16 }
 0x115   : > { %vm1384_vm0 = vcmask 60416  }
 0x116   : > { %v1298_v45 = vsel %vm1297_vm14, %v1289_v18, %v1786_v38  ;;  %v1299_v3 = vsel %vm1297_vm14, %v1290_v27, %v1787_v37  ;;  %v1771_v37 = vunpack.i.l.bf16 %v2449_v22 }
 0x117   : > { %v1306_v50 = vpack.c.bf16 %v1299_v3, %v1298_v45 }
 0x118   : > { %v2475_v30 = vpop.permute.xlu0 %1794  ;;  %v1835_v46 = vpop.permute.xlu2 %1834  ;;  %v1250_v63 = vsel %vm1243_vm8, %v1241_v31, %v1771_v37 }
 0x119   : > { %1573 = vmatmul.msk.bf16.vlgmr.msra.gmra.mxu0 %vm1330_vm15, %v1306_v50  ;;  %v1797_v27 = vunpack.i.h.bf16 %v2475_v30  ;;  %v1796_v42 = vunpack.i.l.bf16 %v2475_v30  ;;  %v1251_v30 = vsel %vm1243_vm8, %v1242_v13, %v1772_v34  ;;  %v1837_v9 = vunpack.i.h.bf16 %v1835_v46 }
 0x11a   : > { %v1836_v44 = vunpack.i.l.bf16 %v1835_v46  ;;  %v1260_v43 = vsel %vm1252_vm9, %v1251_v30, %v1792_v61  ;;  %v1259_v62 = vsel %vm1252_vm9, %v1250_v63, %v1791_v12 }
 0x11b   : > { %v1800_v14 = vpop.permute.xlu1 %1799  ;;  %v1273_v10 = vsel %vm1270_vm11, %v1264_v57, %v1796_v42  ;;  %v1274_v11 = vsel %vm1270_vm11, %v1265_v58, %v1797_v27  ;;  %v1268_v4 = vsel %vm1261_vm10, %v1259_v62, %v1806_v48  ;;  %v1269_v41 = vsel %vm1261_vm10, %v1260_v43, %v1807_v32 }
 0x11c   : > { %v1802_v28 = vunpack.i.h.bf16 %v1800_v14  ;;  %v1801_v2 = vunpack.i.l.bf16 %v1800_v14  ;;  %v1277_v24 = vsel %vm1270_vm11, %v1268_v4, %v1821_v0  ;;  %v1278_v36 = vsel %vm1270_vm11, %v1269_v41, %v1822_v19 }
 0x11e   : > { %v1293_v45 = vsel %vm1288_vm13, %v1284_v39, %v1801_v2  ;;  %v1294_v3 = vsel %vm1288_vm13, %v1285_v40, %v1802_v28 }
 0x120   : > { %v1810_v26 = vpop.permute.xlu0 %1809 }
 0x121   : > { %v1812_v50 = vunpack.i.h.bf16 %v1810_v26  ;;  %v1811_v54 = vunpack.i.l.bf16 %v1810_v26 }
 0x123   : > { %v1815_v38 = vpop.permute.xlu1 %1814  ;;  %v1282_v59 = vsel %vm1279_vm12, %v1273_v10, %v1811_v54  ;;  %v1283_v15 = vsel %vm1279_vm12, %v1274_v11, %v1812_v50 }
 0x124   : > { %v1817_v7 = vunpack.i.h.bf16 %v1815_v38  ;;  %v1816_v18 = vunpack.i.l.bf16 %v1815_v38 }
 0x126   : > { %v1302_v22 = vsel %vm1297_vm14, %v1293_v45, %v1816_v18  ;;  %v1303_v21 = vsel %vm1297_vm14, %v1294_v3, %v1817_v7 }
 0x127   : > { %v1308_v60 = vpack.c.bf16 %v1303_v21, %v1302_v22 }
 0x128   : > { %v1825_v5 = vpop.permute.xlu0 %1824 }
 0x129   : > { %1575 = vmatmul.msk.bf16.vlgmr.msra.gmra.mxu2 %vm1330_vm15, %v1308_v60  ;;  %v1827_v14 = vunpack.i.h.bf16 %v1825_v5  ;;  %v1826_v1 = vunpack.i.l.bf16 %v1825_v5 }
 0x12b   : > { %v1291_v52 = vsel %vm1288_vm13, %v1282_v59, %v1826_v1  ;;  %v1292_v55 = vsel %vm1288_vm13, %v1283_v15, %v1827_v14  ;;  %v1830_v35 = vpop.permute.xlu1 %1829 }
 0x12c   : > { %v1300_v51 = vsel %vm1297_vm14, %v1291_v52, %v1836_v44  ;;  %v1301_v17 = vsel %vm1297_vm14, %v1292_v55, %v1837_v9  ;;  %v1832_v49 = vunpack.i.h.bf16 %v1830_v35  ;;  %v1831_v56 = vunpack.i.l.bf16 %v1830_v35 }
 0x12d   : > { %v1307_v20 = vpack.c.bf16 %v1301_v17, %v1300_v51 }
 0x12e   : > { %v1286_v26 = vsel %vm1279_vm12, %v1277_v24, %v1831_v56  ;;  %v1287_v16 = vsel %vm1279_vm12, %v1278_v36, %v1832_v49 }
 0x12f   : > { %1574 = vmatmul.msk.bf16.vlgmr.msra.gmra.mxu1 %vm1330_vm15, %v1307_v20 }
 0x130   : > { %v1840_v23 = vpop.permute.xlu0 %1839 }
 0x131   : > { %v1842_v53 = vunpack.i.h.bf16 %v1840_v23  ;;  %v1841_v8 = vunpack.i.l.bf16 %v1840_v23 }
 0x133   : > { %v1295_v6 = vsel %vm1288_vm13, %v1286_v26, %v1841_v8  ;;  %v1296_v47 = vsel %vm1288_vm13, %v1287_v16, %v1842_v53  ;;  %v1845_v28 = vpop.permute.xlu1 %1844 }
 0x134   : > { %v1847_v2 = vunpack.i.h.bf16 %v1845_v28  ;;  %v1846_v29 = vunpack.i.l.bf16 %v1845_v28 }
 0x136   : > { %v1304_v61 = vsel %vm1297_vm14, %v1295_v6, %v1846_v29  ;;  %v1305_v13 = vsel %vm1297_vm14, %v1296_v47, %v1847_v2 }
 0x137   : > { %v1309_v31 = vpack.c.bf16 %v1305_v13, %v1304_v61 }
 0x139   : > { %1576 = vmatmul.msk.bf16.vlgmr.msra.gmra.mxu3 %vm1330_vm15, %v1309_v31 }
 0x196   : > { %v1356_v33 = vpop.f32.mrf.mxu0 }
 0x197   : > { %v1376_v25 = vpack.c.bf16 %v1356_v33, %v1356_v33  ;;  %v1416_v27 = vmul.f32 %v1356_v33, %v1356_v33  ;;  %v1393_v3 = vsel %vm1243_vm8, %v1356_v33, 0.0 }
 0x199   : > { %1385 = vst.msk [vmem:[%s2561_s22] sm:$0xf] %vm1384_vm0, %v1376_v25  ;;  %v1424_v12 = vsel %vm1243_vm8, %v1416_v27, 0.0 }
 0x19e   : > { %v1358_v34 = vpop.f32.mrf.mxu0 }
 0x19f   : > { %v1377_v37 = vpack.c.bf16 %v1358_v34, %v1358_v34  ;;  %v1417_v18 = vmul.f32 %v1358_v34, %v1358_v34  ;;  %v1394_v42 = vsel %vm1243_vm8, %v1358_v34, 0.0 }
 0x1a0   : > { %v1395_v54 = vadd.f32 %v1394_v42, %v1393_v3 }
 0x1a1   : > { %1386 = vst.msk [vmem:[%s2561_s22 + $0x4] sm:$0xf] %vm1384_vm0, %v1377_v37  ;;  %v1425_v46 = vsel %vm1243_vm8, %v1417_v18, 0.0 }
 0x1a2   : > { %v1426_v30 = vadd.f32 %v1425_v46, %v1424_v12 }
 0x1ac   : > { %v1366_v38 = vpop.f32.mrf.mxu2  ;;  %v1361_v39 = vpop.f32.mrf.mxu1 }
 0x1ad   : > { %v1380_v40 = vpack.c.bf16 %v1366_v38, %v1366_v38  ;;  %v1378_v7 = vpack.c.bf16 %v1361_v39, %v1361_v39  ;;  %v1418_v45 = vmul.f32 %v1361_v39, %v1361_v39  ;;  %v1396_v50 = vsel %vm1243_vm8, %v1361_v39, 0.0 }
 0x1ae   : > { %v1397_v63 = vadd.f32 %v1396_v50, %v1395_v54  ;;  %v1420_v14 = vmul.f32 %v1366_v38, %v1366_v38  ;;  %v1400_v32 = vsel %vm1243_vm8, %v1366_v38, 0.0 }
 0x1af   : > { %1389 = vst.msk [vmem:[%s2561_s22 + $0x10] sm:$0xf] %vm1384_vm0, %v1380_v40  ;;  %v1427_v57 = vsel %vm1243_vm8, %v1418_v45, 0.0 }
 0x1b0   : > { %1387 = vst.msk [vmem:[%s2561_s22 + $0x8] sm:$0xf] %vm1384_vm0, %v1378_v7  ;;  %v1428_v44 = vadd.f32 %v1427_v57, %v1426_v30  ;;  %v1431_v15 = vsel %vm1243_vm8, %v1420_v14, 0.0 }
 0x1b4   : > { %v1368_v22 = vpop.f32.mrf.mxu2  ;;  %v1363_v21 = vpop.f32.mrf.mxu1 }
 0x1b5   : > { %v1381_v58 = vpack.c.bf16 %v1368_v22, %v1368_v22  ;;  %v1379_v60 = vpack.c.bf16 %v1363_v21, %v1363_v21  ;;  %v1398_v5 = vsel %vm1243_vm8, %v1363_v21, 0.0  ;;  %v1419_v9 = vmul.f32 %v1363_v21, %v1363_v21 }
 0x1b6   : > { %v1399_v10 = vadd.f32 %v1398_v5, %v1397_v63  ;;  %v1421_v43 = vmul.f32 %v1368_v22, %v1368_v22  ;;  %v1402_v55 = vsel %vm1243_vm8, %v1368_v22, 0.0 }
 0x1b7   : > { %1390 = vst.msk [vmem:[%s2561_s22 + $0x14] sm:$0xf] %vm1384_vm0, %v1381_v58  ;;  %v1429_v11 = vsel %vm1243_vm8, %v1419_v9, 0.0 }
 0x1b8   : > { %1388 = vst.msk [vmem:[%s2561_s22 + $0xc] sm:$0xf] %vm1384_vm0, %v1379_v60  ;;  %v1430_v1 = vadd.f32 %v1429_v11, %v1428_v44  ;;  %v1401_v48 = vadd.f32 %v1400_v32, %v1399_v10  ;;  %v1433_v17 = vsel %vm1243_vm8, %v1421_v43, 0.0 }
 0x1ba   : > { %v1432_v52 = vadd.f32 %v1431_v15, %v1430_v1  ;;  %v1403_v51 = vadd.f32 %v1402_v55, %v1401_v48 }
 0x1bc   : > { %v1371_v59 = vpop.f32.mrf.mxu3  ;;  %v1434_v0 = vadd.f32 %v1433_v17, %v1432_v52 }
 0x1bd   : > { %v1382_v62 = vpack.c.bf16 %v1371_v59, %v1371_v59  ;;  %v1422_v35 = vmul.f32 %v1371_v59, %v1371_v59  ;;  %v1404_v19 = vsel %vm1243_vm8, %v1371_v59, 0.0 }
 0x1be   : > { %v1405_v4 = vadd.f32 %v1404_v19, %v1403_v51 }
 0x1bf   : > { %1391 = vst.msk [vmem:[%s2561_s22 + $0x18] sm:$0xf] %vm1384_vm0, %v1382_v62  ;;  %v1435_v20 = vsel %vm1243_vm8, %v1422_v35, 0.0 }
 0x1c0   : > { %v1436_v24 = vadd.f32 %v1435_v20, %v1434_v0 }
 0x1c4   : > { %v1373_v41 = vpop.f32.mrf.mxu3 }
 0x1c5   : > { %v1383_v49 = vpack.c.bf16 %v1373_v41, %v1373_v41  ;;  %v1406_v56 = vsel %vm1243_vm8, %v1373_v41, 0.0  ;;  %v1423_v23 = vmul.f32 %v1373_v41, %v1373_v41 }
 0x1c6   : > { %v1407_v36 = vadd.f32 %v1406_v56, %v1405_v4 }
 0x1c7   : > { %1392 = vst.msk [vmem:[%s2561_s22 + $0x1c] sm:$0xf] %vm1384_vm0, %v1383_v49  ;;  %v1437_v53 = vsel %vm1243_vm8, %v1423_v23, 0.0 }
 0x1c8   : > { %v1408_v8 = vrot.slane %v1407_v36, 4  ;;  %v1438_v26 = vadd.f32 %v1437_v53, %v1436_v24 }
 0x1ca   : > { %v1409_v16 = vadd.f32 %v1408_v8, %v1407_v36  ;;  %v1439_v6 = vrot.slane %v1438_v26, 4 }
 0x1cc   : > { %v1410_v47 = vrot.slane %v1409_v16, 2  ;;  %v1440_v28 = vadd.f32 %v1439_v6, %v1438_v26 }
 0x1ce   : > { %v1411_v2 = vadd.f32 %v1410_v47, %v1409_v16  ;;  %v1441_v29 = vrot.slane %v1440_v28, 2 }
 0x1d0   : > { %v1412_v61 = vrot.slane %v1411_v2, 1  ;;  %v1442_v13 = vadd.f32 %v1441_v29, %v1440_v28 }
 0x1d2   : > { %v1413_v31 = vadd.f32 %v1412_v61, %v1411_v2  ;;  %v1443_v33 = vrot.slane %v1442_v13, 1 }
 0x1d4   : > { %1415 = vst.msk [vmem:[%s235_s26] sm:$0x1] %vm1414_vm1, %v1413_v31  ;;  %v1444_v25 = vadd.f32 %v1443_v33, %v1442_v13 }
 0x1d6   : > { %1445 = vst.msk [vmem:[%s235_s26 + $0x1] sm:$0x1] %vm1414_vm1, %v1444_v25 }
 0x1d7 PF: > { %s16_s18 = sadd.s32 1, %s1856_s18  }
 0x1d8   : > { %p13_p4 = scmp.ge.s32.totalorder %s16_s18, 4  }
 0x1da   :  { %15 = sbr.rel (!%p13_p4) target bundleno = 1 (0x1), region = 149 }

// kernel: discriminator_block.3
= control target key start
LH: loop header
LB: loop body
LE: loop exit
PB: predicated region body
PF: predicated region fallthrough
CT: control target
= control target key end

     0   :  { %s3366_s18 = smov 0   ;;  %s4866_s0 = inlined_call_operand.vmem [shape: f32[2,16,16,4], index: 0, kind: input, shape index: {}]   ;;  %s4867_s1 = inlined_call_operand.vmem [shape: bf16[36,4], index: 1, kind: input, shape index: {}]   ;;  %s4868_s2 = inlined_call_operand.vmem [shape: f32[1,1,4], index: 2, kind: input, shape index: {}, may-alias: {2,3}]   ;;  %s4869_s3 = inlined_call_operand.vmem [shape: f32[1,1,4], index: 3, kind: input, shape index: {}, may-alias: {2,3}]   ;;  %s4870_s4 = inlined_call_operand.vmem [shape: bf16[2,16,16,4], index: 4, kind: output, shape index: {0}]   ;;  %s4871_s5 = inlined_call_operand.vmem [shape: f32[2,2,4], index: 5, kind: output, shape index: {1}]  }
   0x1 LB: > { %s2613_s2 = sadd.s32 4294967295, %s3325_s18   ;;  %p2617_p0 = scmp.ge.s32.totalorder %s3325_s18, 1  ;;  %s3325_s18 = sphi %s3366_s18, %s16_s18  }
   0x2   : > { %p190_p1 = scmp.lt.s32.totalorder %s3325_s18, 3 }
   0x4   : > { %p191_p2 = pnand %p2617_p0, %p190_p1 }
   0x6   : > { %194 = sbr.rel (%p191_p2) target bundleno = 707 (0x2c3), region = 36 }
   0xb   : > { %vm430_vm0 = vcmask 31744   ;;  %vm433_vm1 = vcmask 25600   ;;  %v3327_v0 = vmov 0.0   ;;  %s3328_s3 = smov 4   ;;  %p222_p3 = scmp.lt.s32.totalorder %s2613_s2, 1  ;;  %vm301_vm2 = vcmask 1040384  }
   0xc   : > { %431 = vst.msk [vmem:[#allocation2] sm:$0xff] %vm430_vm0, %v3327_v0  ;;  %s3329_s23 = smov 8   ;;  %s3330_s24 = smov 12   ;;  %vm1880_vm3 = vcmask 64512   ;;  %vm1913_vm4 = vcmask 97280   ;;  %vm1946_vm5 = vcmask 130048  }
   0xd   : > { %432 = vst.msk [vmem:[#allocation2 + $0x8] sm:$0xff] %vm430_vm0, %v3327_v0  ;;  %s4923_s2 = smov (!%p222_p3, %s2613_s2), 1  ;;  %s3331_s25 = smov 16   ;;  %vm1979_vm6 = vcmask 162816   ;;  %vm2196_vm7 = vcmask 1041408   ;;  %vm2012_vm8 = vcmask 195584  }
   0xe   : > { %434 = vst.msk [vmem:[#allocation2 + $0x10] sm:$0x3] %vm433_vm1, %v3327_v0  ;;  %s2649_s19 = sshll.u32 %s4923_s2, 8  ;;  %s3332_s26 = smov 20   ;;  %vm2045_vm9 = vcmask 228352   ;;  %vm2078_vm10 = vcmask 261120  }
   0xf   : > { %435 = vst.msk [vmem:[#allocation2 + $0x18] sm:$0xff] %vm430_vm0, %v3327_v0  ;;  %s3469_s22 = scalar_lea.vmem %s4866_s0, %s2649_s19  ;;  %s3333_s27 = smov 24   ;;  %vm2147_vm11 = vcmask 293888   ;;  %vm2321_vm12 = vcmask 27648   ;;  %vm2423_vm13 = vcmask 24576  }
  0x10   : > { %436 = vst.msk [vmem:[#allocation2 + $0x20] sm:$0xff] %vm430_vm0, %v3327_v0  ;;  %v243_v4 = vld [vmem:[%s3469_s22 + $0x30] sm:$0xff]  ;;  %v244_v5 = vld [vmem:[%s3469_s22 + $0x38] sm:$0xff]  ;;  %v237_v11 = vld [vmem:[%s3469_s22] sm:$0xff]  ;;  %s3334_s28 = smov 28   ;;  %s3335_s29 = smov 32  }
  0x11   : > { %437 = vst.msk [vmem:[#allocation2 + $0x28] sm:$0x3] %vm433_vm1, %v3327_v0  ;;  %v311_v6 = vrot.slane %v243_v4, 7  ;;  %v239_v7 = vld [vmem:[%s3469_s22 + $0x10] sm:$0xff]  ;;  %v312_v8 = vrot.slane %v244_v5, 7  ;;  %v240_v9 = vld [vmem:[%s3469_s22 + $0x18] sm:$0xff] }
  0x12   : > { %438 = vst.msk [vmem:[#allocation2 + $0x30] sm:$0xff] %vm430_vm0, %v3327_v0  ;;  %v305_v10 = vrot.slane %v239_v7, 7  ;;  %v306_v13 = vrot.slane %v240_v9, 7  ;;  %v238_v14 = vld [vmem:[%s3469_s22 + $0x8] sm:$0xff]  ;;  %v302_v17 = vrot.slane %v237_v11, 7  ;;  %v245_v18 = vld [vmem:[%s3469_s22 + $0x40] sm:$0xff] }
  0x13   : > { %439 = vst.msk [vmem:[#allocation2 + $0x38] sm:$0xff] %vm430_vm0, %v3327_v0  ;;  %v401_v12 = vsel %vm301_vm2, 0.0, %v311_v6  ;;  %v313_v15 = vsel %vm301_vm2, %v311_v6, %v312_v8  ;;  %v417_v16 = vsel %vm301_vm2, %v312_v8, 0.0  ;;  %v303_v20 = vrot.slane %v238_v14, 7  ;;  %v246_v21 = vld [vmem:[%s3469_s22 + $0x48] sm:$0xff]  ;;  %v241_v25 = vld [vmem:[%s3469_s22 + $0x20] sm:$0xff] }
  0x14   : > { %v567_v1 = vld [vmem:[#allocation2 + $0x1] sm:$0xff]  ;;  %440 = vst.msk [vmem:[#allocation2 + $0x40] sm:$0x3] %vm433_vm1, %v3327_v0  ;;  %v399_v19 = vsel %vm301_vm2, 0.0, %v305_v10  ;;  %v307_v22 = vsel %vm301_vm2, %v305_v10, %v306_v13  ;;  %v415_v23 = vsel %vm301_vm2, %v306_v13, 0.0  ;;  %v314_v24 = vrot.slane %v245_v18, 7 }
  0x15   : > { %v568_v2 = vld [vmem:[#allocation2 + $0x9] sm:$0xff]  ;;  %441 = vst.msk [vmem:[#allocation2 + $0x48] sm:$0xff] %vm430_vm0, %v3327_v0  ;;  %v398_v26 = vsel %vm301_vm2, 0.0, %v302_v17  ;;  %v315_v27 = vrot.slane %v246_v21, 7  ;;  %v304_v29 = vsel %vm301_vm2, %v302_v17, %v303_v20  ;;  %v414_v30 = vsel %vm301_vm2, %v303_v20, 0.0  ;;  %v248_v35 = vld [vmem:[%s3469_s22 + $0x58] sm:$0xff] }
  0x16   : > { %v2679_v3 = vpack.i.bf16 %v568_v2, %v567_v1  ;;  %442 = vst.msk [vmem:[#allocation2 + $0x50] sm:$0xff] %vm430_vm0, %v3327_v0  ;;  %v242_v28 = vld [vmem:[%s3469_s22 + $0x28] sm:$0xff]  ;;  %v308_v31 = vrot.slane %v241_v25, 7  ;;  %v247_v32 = vld [vmem:[%s3469_s22 + $0x50] sm:$0xff]  ;;  %v402_v33 = vsel %vm301_vm2, 0.0, %v314_v24  ;;  %v318_v43 = vrot.slane %v248_v35, 7 }
  0x17   : > { %443 = vst.msk [vmem:[#allocation2 + $0x58] sm:$0x3] %vm433_vm1, %v3327_v0  ;;  %v309_v34 = vrot.slane %v242_v28, 7  ;;  %v316_v36 = vsel %vm301_vm2, %v314_v24, %v315_v27  ;;  %v418_v38 = vsel %vm301_vm2, %v315_v27, 0.0  ;;  %v317_v39 = vrot.slane %v247_v32, 7  ;;  %v251_v40 = vld [vmem:[%s3469_s22 + $0x70] sm:$0xff] }
  0x18   : > { %2680 = vrot.lane.b32.xlu0 %v2679_v3, %s3328_s3  ;;  %444 = vst.msk [vmem:[#allocation2 + $0x60] sm:$0xff] %vm430_vm0, %v3327_v0  ;;  %v400_v42 = vsel %vm301_vm2, 0.0, %v308_v31  ;;  %v252_v44 = vld [vmem:[%s3469_s22 + $0x78] sm:$0xff]  ;;  %v323_v49 = vrot.slane %v251_v40, 7  ;;  %v249_v50 = vld [vmem:[%s3469_s22 + $0x60] sm:$0xff]  ;;  %v250_v54 = vld [vmem:[%s3469_s22 + $0x68] sm:$0xff] }
  0x19   : > { %445 = vst.msk [vmem:[#allocation2 + $0x68] sm:$0xff] %vm430_vm0, %v3327_v0  ;;  %v310_v46 = vsel %vm301_vm2, %v308_v31, %v309_v34  ;;  %v416_v48 = vsel %vm301_vm2, %v309_v34, 0.0  ;;  %v403_v52 = vsel %vm301_vm2, 0.0, %v317_v39  ;;  %v324_v53 = vrot.slane %v252_v44, 7  ;;  %v253_v60 = vld [vmem:[%s3469_s22 + $0x80] sm:$0xff]  ;;  %v258_v10 = vld [vmem:[%s3469_s22 + $0xa8] sm:$0xff] }
  0x1a   : > { %446 = vst.msk [vmem:[#allocation2 + $0x70] sm:$0x3] %vm433_vm1, %v3327_v0  ;;  %v319_v56 = vsel %vm301_vm2, %v317_v39, %v318_v43  ;;  %v419_v58 = vsel %vm301_vm2, %v318_v43, 0.0  ;;  %v320_v59 = vrot.slane %v249_v50, 7  ;;  %v405_v62 = vsel %vm301_vm2, 0.0, %v323_v49  ;;  %v257_v6 = vld [vmem:[%s3469_s22 + $0xa0] sm:$0xff] }
  0x1b   : > { %447 = vst.msk [vmem:[#allocation2 + $0x78] sm:$0xff] %vm430_vm0, %v3327_v0  ;;  %v321_v63 = vrot.slane %v250_v54, 7  ;;  %v325_v2 = vsel %vm301_vm2, %v323_v49, %v324_v53  ;;  %v421_v4 = vsel %vm301_vm2, %v324_v53, 0.0  ;;  %v326_v5 = vrot.slane %v253_v60, 7  ;;  %v256_v20 = vld [vmem:[%s3469_s22 + $0x98] sm:$0xff]  ;;  %s2650_s11 = sshll.u32 %s4923_s2, 7 }
  0x1c   : > { %448 = vst.msk [vmem:[#allocation2 + $0x80] sm:$0xff] %vm430_vm0, %v3327_v0  ;;  %v404_v8 = vsel %vm301_vm2, 0.0, %v320_v59  ;;  %v264_v40 = vld [vmem:[%s3469_s22 + $0xd8] sm:$0xff]  ;;  %s4637_s14 = scalar_lea.vmem %s4870_s4, %s2650_s11  ;;  %s2622_s15 = sshll.u32 %s4923_s2, 1 }
  0x1d   : > { %449 = vst.msk [vmem:[#allocation2 + $0x88] sm:$0x3] %vm433_vm1, %v3327_v0  ;;  %v420_v14 = vsel %vm301_vm2, %v321_v63, 0.0  ;;  %v406_v18 = vsel %vm301_vm2, 0.0, %v326_v5  ;;  %v342_v50 = vrot.slane %v264_v40, 7 }
  0x1e   : > { %450 = vst.msk [vmem:[#allocation2 + $0x90] sm:$0xff] %vm430_vm0, %v3327_v0 }
  0x1f   : > { %451 = vst.msk [vmem:[#allocation2 + $0x98] sm:$0xff] %vm430_vm0, %v3327_v0 }
  0x20   : > { %452 = vst.msk [vmem:[#allocation2 + $0xa0] sm:$0x3] %vm433_vm1, %v3327_v0 }
  0x21   : > { %453 = vst.msk [vmem:[#allocation2 + $0xa8] sm:$0xff] %vm430_vm0, %v3327_v0 }
  0x22   : > { %454 = vst.msk [vmem:[#allocation2 + $0xb0] sm:$0xff] %vm430_vm0, %v3327_v0 }
  0x23   : > { %455 = vst.msk [vmem:[#allocation2 + $0xb8] sm:$0x3] %vm433_vm1, %v3327_v0 }
  0x24   : > { %456 = vst.msk [vmem:[#allocation2 + $0xc0] sm:$0xff] %vm430_vm0, %v3327_v0 }
  0x25   : > { %457 = vst.msk [vmem:[#allocation2 + $0xc8] sm:$0xff] %vm430_vm0, %v3327_v0 }
  0x26   : > { %458 = vst.msk [vmem:[#allocation2 + $0xd0] sm:$0x3] %vm433_vm1, %v3327_v0 }
  0x27   : > { %459 = vst.msk [vmem:[#allocation2 + $0xd8] sm:$0xff] %vm430_vm0, %v3327_v0 }
  0x28   : > { %460 = vst.msk [vmem:[#allocation2 + $0xe0] sm:$0xff] %vm430_vm0, %v3327_v0 }
  0x29   : > { %461 = vst.msk [vmem:[#allocation2 + $0xe8] sm:$0x3] %vm433_vm1, %v3327_v0 }
  0x2a   : > { %462 = vst.msk [vmem:[#allocation2 + $0xf0] sm:$0xff] %vm430_vm0, %v3327_v0 }
  0x2b   : > { %463 = vst.msk [vmem:[#allocation2 + $0xf8] sm:$0xff] %vm430_vm0, %v3327_v0 }
  0x2c   : > { %464 = vst.msk [vmem:[#allocation2 + $0x100] sm:$0x3] %vm433_vm1, %v3327_v0 }
  0x2d   : > { %465 = vst.msk [vmem:[#allocation2 + $0x108] sm:$0xff] %vm430_vm0, %v3327_v0 }
  0x2e   : > { %466 = vst.msk [vmem:[#allocation2 + $0x110] sm:$0xff] %vm430_vm0, %v3327_v0 }
  0x2f   : > { %467 = vst.msk [vmem:[#allocation2 + $0x118] sm:$0x3] %vm433_vm1, %v3327_v0 }
  0x30   : > { %468 = vst.msk [vmem:[#allocation2 + $0x120] sm:$0xff] %vm430_vm0, %v3327_v0 }
  0x31   : > { %469 = vst.msk [vmem:[#allocation2 + $0x128] sm:$0xff] %vm430_vm0, %v3327_v0 }
  0x32   : > { %470 = vst.msk [vmem:[#allocation2 + $0x130] sm:$0x3] %vm433_vm1, %v3327_v0 }
  0x33   : > { %471 = vst.msk [vmem:[#allocation2 + $0x138] sm:$0xff] %vm430_vm0, %v3327_v0 }
  0x34   : > { %472 = vst.msk [vmem:[#allocation2 + $0x140] sm:$0xff] %vm430_vm0, %v3327_v0 }
  0x35   : > { %473 = vst.msk [vmem:[#allocation2 + $0x148] sm:$0x3] %vm433_vm1, %v3327_v0 }
  0x36   : > { %474 = vst.msk [vmem:[#allocation2 + $0x150] sm:$0xff] %vm430_vm0, %v3327_v0 }
  0x37   : > { %475 = vst.msk [vmem:[#allocation2 + $0x158] sm:$0xff] %vm430_vm0, %v3327_v0 }
  0x38   : > { %476 = vst.msk [vmem:[#allocation2 + $0x160] sm:$0x3] %vm433_vm1, %v3327_v0 }
  0x39   : > { %477 = vst.msk [vmem:[#allocation2 + $0x168] sm:$0xff] %vm430_vm0, %v3327_v0 }
  0x3a   : > { %478 = vst.msk [vmem:[#allocation2 + $0x170] sm:$0xff] %vm430_vm0, %v3327_v0 }
  0x3b   : > { %479 = vst.msk [vmem:[#allocation2 + $0x178] sm:$0x3] %vm433_vm1, %v3327_v0 }
  0x3c   : > { %480 = vst.msk [vmem:[#allocation2 + $0x180] sm:$0xff] %vm430_vm0, %v3327_v0 }
  0x3d   : > { %481 = vst.msk [vmem:[#allocation2 + $0x188] sm:$0xff] %vm430_vm0, %v3327_v0 }
  0x3e   : > { %482 = vst.msk [vmem:[#allocation2 + $0x190] sm:$0x3] %vm433_vm1, %v3327_v0 }
  0x3f   : > { %483 = vst.msk [vmem:[#allocation2 + $0x198] sm:$0xff] %vm430_vm0, %v3327_v0 }
  0x40   : > { %484 = vst.msk [vmem:[#allocation2 + $0x1a0] sm:$0xff] %vm430_vm0, %v3327_v0 }
  0x41   : > { %485 = vst.msk [vmem:[#allocation2 + $0x1a8] sm:$0x3] %vm433_vm1, %v3327_v0  ;;  %v254_v0 = vld [vmem:[%s3469_s22 + $0x88] sm:$0xff] }
  0x42   : > { %496 = vst.msk [vmem:[#allocation2 + $0x60] sm:$0xff] %vm430_vm0, %v401_v12  ;;  %v327_v9 = vrot.slane %v254_v0, 7  ;;  %v322_v12 = vsel %vm301_vm2, %v320_v59, %v321_v63 }
  0x43   : > { %497 = vst.msk [vmem:[#allocation2 + $0x68] sm:$0xff] %vm430_vm0, %v313_v15  ;;  %v332_v15 = vrot.slane %v257_v6, 7 }
  0x44   : > { %498 = vst.msk [vmem:[#allocation2 + $0x70] sm:$0x3] %vm433_vm1, %v417_v16  ;;  %v255_v16 = vld [vmem:[%s3469_s22 + $0x90] sm:$0xff]  ;;  %v422_v24 = vsel %vm301_vm2, %v327_v9, 0.0 }
  0x45   : > { %490 = vst.msk [vmem:[#allocation2 + $0x30] sm:$0xff] %vm430_vm0, %v399_v19  ;;  %v333_v19 = vrot.slane %v258_v10, 7  ;;  %v329_v25 = vrot.slane %v255_v16, 7  ;;  %v408_v28 = vsel %vm301_vm2, 0.0, %v332_v15 }
  0x46   : > { %491 = vst.msk [vmem:[#allocation2 + $0x38] sm:$0xff] %vm430_vm0, %v307_v22  ;;  %v328_v22 = vsel %vm301_vm2, %v326_v5, %v327_v9 }
  0x47   : > { %492 = vst.msk [vmem:[#allocation2 + $0x40] sm:$0x3] %vm433_vm1, %v415_v23  ;;  %v334_v32 = vsel %vm301_vm2, %v332_v15, %v333_v19  ;;  %v424_v34 = vsel %vm301_vm2, %v333_v19, 0.0 }
  0x48   : > { %487 = vst.msk [vmem:[#allocation2 + $0x18] sm:$0xff] %vm430_vm0, %v398_v26  ;;  %v259_v26 = vld [vmem:[%s3469_s22 + $0xb0] sm:$0xff] }
  0x49   : > { %488 = vst.msk [vmem:[#allocation2 + $0x20] sm:$0xff] %vm430_vm0, %v304_v29  ;;  %v330_v29 = vrot.slane %v256_v20, 7  ;;  %v335_v35 = vrot.slane %v259_v26, 7 }
  0x4a   : > { %v575_v37 = vld [vmem:[#allocation2 + $0x61] sm:$0xff]  ;;  %489 = vst.msk [vmem:[#allocation2 + $0x28] sm:$0x3] %vm433_vm1, %v414_v30  ;;  %v260_v30 = vld [vmem:[%s3469_s22 + $0xb8] sm:$0xff] }
  0x4b   : > { %v576_v41 = vld [vmem:[#allocation2 + $0x69] sm:$0xff]  ;;  %499 = vst.msk [vmem:[#allocation2 + $0x78] sm:$0xff] %vm430_vm0, %v402_v33  ;;  %v336_v39 = vrot.slane %v260_v30, 7  ;;  %v423_v44 = vsel %vm301_vm2, %v330_v29, 0.0  ;;  %v409_v49 = vsel %vm301_vm2, 0.0, %v335_v35 }
  0x4c   : > { %v3532_v45 = vpack.i.bf16 %v576_v41, %v575_v37  ;;  %500 = vst.msk [vmem:[#allocation2 + $0x80] sm:$0xff] %vm430_vm0, %v316_v36  ;;  %v263_v36 = vld [vmem:[%s3469_s22 + $0xd0] sm:$0xff]  ;;  %v607_v40 = vld [vmem:[#allocation2 + $0x62] sm:$0xff] }
  0x4d   : > { %v571_v47 = vld [vmem:[#allocation2 + $0x31] sm:$0xff]  ;;  %501 = vst.msk [vmem:[#allocation2 + $0x88] sm:$0x3] %vm433_vm1, %v418_v38  ;;  %v407_v38 = vsel %vm301_vm2, 0.0, %v329_v25  ;;  %v337_v53 = vsel %vm301_vm2, %v335_v35, %v336_v39 }
  0x4e   : > { %2700 = vrot.lane.b32.xlu2 %v3532_v45, %s3328_s3  ;;  %v572_v51 = vld [vmem:[#allocation2 + $0x39] sm:$0xff]  ;;  %493 = vst.msk [vmem:[#allocation2 + $0x48] sm:$0xff] %vm430_vm0, %v400_v42  ;;  %v331_v42 = vsel %vm301_vm2, %v329_v25, %v330_v29  ;;  %v600_v35 = vld [vmem:[#allocation2 + $0xa] sm:$0xff] }
  0x4f   : > { %v3544_v55 = vpack.i.bf16 %v572_v51, %v571_v47  ;;  %494 = vst.msk [vmem:[#allocation2 + $0x50] sm:$0xff] %vm430_vm0, %v310_v46  ;;  %v341_v46 = vrot.slane %v263_v36, 7  ;;  %v261_v47 = vld [vmem:[%s3469_s22 + $0xc0] sm:$0xff]  ;;  %v262_v51 = vld [vmem:[%s3469_s22 + $0xc8] sm:$0xff] }
  0x50   : > { %v569_v57 = vld [vmem:[#allocation2 + $0x19] sm:$0xff]  ;;  %495 = vst.msk [vmem:[#allocation2 + $0x58] sm:$0x3] %vm433_vm1, %v416_v48 }
  0x51   : > { %2690 = vrot.lane.b32.xlu1 %v3544_v55, %s3328_s3  ;;  %v570_v61 = vld [vmem:[#allocation2 + $0x21] sm:$0xff]  ;;  %502 = vst.msk [vmem:[#allocation2 + $0x90] sm:$0xff] %vm430_vm0, %v403_v52  ;;  %v411_v60 = vsel %vm301_vm2, 0.0, %v341_v46  ;;  %v343_v0 = vsel %vm301_vm2, %v341_v46, %v342_v50 }
  0x52   : > { %v3556_v1 = vpack.i.bf16 %v570_v61, %v569_v57  ;;  %503 = vst.msk [vmem:[#allocation2 + $0x98] sm:$0xff] %vm430_vm0, %v319_v56  ;;  %v425_v56 = vsel %vm301_vm2, %v336_v39, 0.0  ;;  %v338_v57 = vrot.slane %v261_v47, 7  ;;  %v339_v61 = vrot.slane %v262_v51, 7  ;;  %v602_v29 = vld [vmem:[#allocation2 + $0x22] sm:$0xff]  ;;  %v604_v39 = vld [vmem:[#allocation2 + $0x3a] sm:$0xff] }
  0x53   : > { %v577_v3 = vld [vmem:[#allocation2 + $0x79] sm:$0xff]  ;;  %504 = vst.msk [vmem:[#allocation2 + $0xa0] sm:$0x3] %vm433_vm1, %v419_v58 }
  0x54   : > { %2685 = vrot.lane.b32.xlu0 %v3556_v1, %s3328_s3  ;;  %v578_v7 = vld [vmem:[#allocation2 + $0x81] sm:$0xff]  ;;  %508 = vst.msk [vmem:[#allocation2 + $0xc0] sm:$0xff] %vm430_vm0, %v405_v62  ;;  %v410_v6 = vsel %vm301_vm2, 0.0, %v338_v57  ;;  %v340_v9 = vsel %vm301_vm2, %v338_v57, %v339_v61 }
  0x55   : > { %v3568_v11 = vpack.i.bf16 %v578_v7, %v577_v3  ;;  %509 = vst.msk [vmem:[#allocation2 + $0xc8] sm:$0xff] %vm430_vm0, %v325_v2  ;;  %v265_v58 = vld [vmem:[%s3469_s22 + $0xe0] sm:$0xff]  ;;  %v266_v62 = vld [vmem:[%s3469_s22 + $0xe8] sm:$0xff]  ;;  %v427_v3 = vsel %vm301_vm2, %v342_v50, 0.0 }
  0x56   : > { %v573_v13 = vld [vmem:[#allocation2 + $0x49] sm:$0xff]  ;;  %510 = vst.msk [vmem:[#allocation2 + $0xd0] sm:$0x3] %vm433_vm1, %v421_v4  ;;  %v344_v4 = vrot.slane %v265_v58, 7  ;;  %v345_v7 = vrot.slane %v266_v62, 7 }
  0x57   : > { %2705 = vrot.lane.b32.xlu2 %v3568_v11, %s3328_s3  ;;  %v574_v17 = vld [vmem:[#allocation2 + $0x51] sm:$0xff]  ;;  %505 = vst.msk [vmem:[#allocation2 + $0xa8] sm:$0xff] %vm430_vm0, %v404_v8  ;;  %v610_v50 = vld [vmem:[#allocation2 + $0x82] sm:$0xff] }
  0x58   : > { %v3580_v21 = vpack.i.bf16 %v574_v17, %v573_v13  ;;  %506 = vst.msk [vmem:[#allocation2 + $0xb0] sm:$0xff] %vm430_vm0, %v322_v12  ;;  %v426_v12 = vsel %vm301_vm2, %v339_v61, 0.0  ;;  %v346_v16 = vsel %vm301_vm2, %v344_v4, %v345_v7  ;;  %v606_v46 = vld [vmem:[#allocation2 + $0x52] sm:$0xff] }
  0x59   : > { %v579_v23 = vld [vmem:[#allocation2 + $0x91] sm:$0xff]  ;;  %507 = vst.msk [vmem:[#allocation2 + $0xb8] sm:$0x3] %vm433_vm1, %v420_v14  ;;  %v412_v14 = vsel %vm301_vm2, 0.0, %v344_v4 }
  0x5a   : > { %2695 = vrot.lane.b32.xlu1 %v3580_v21, %s3328_s3  ;;  %v580_v27 = vld [vmem:[#allocation2 + $0x99] sm:$0xff]  ;;  %511 = vst.msk [vmem:[#allocation2 + $0xd8] sm:$0xff] %vm430_vm0, %v406_v18  ;;  %v428_v18 = vsel %vm301_vm2, %v345_v7, 0.0 }
  0x5b   : > { %v3592_v31 = vpack.i.bf16 %v580_v27, %v579_v23  ;;  %512 = vst.msk [vmem:[#allocation2 + $0xe0] sm:$0xff] %vm430_vm0, %v328_v22  ;;  %v612_v57 = vld [vmem:[#allocation2 + $0x9a] sm:$0xff] }
  0x5c   : > { %v583_v33 = vld [vmem:[#allocation2 + $0xc1] sm:$0xff]  ;;  %513 = vst.msk [vmem:[#allocation2 + $0xe8] sm:$0x3] %vm433_vm1, %v422_v24 }
  0x5d   : > { %2710 = vrot.lane.b32.xlu0 %v3592_v31, %s3328_s3  ;;  %v584_v37 = vld [vmem:[#allocation2 + $0xc9] sm:$0xff]  ;;  %517 = vst.msk [vmem:[#allocation2 + $0x108] sm:$0xff] %vm430_vm0, %v408_v28  ;;  %v601_v28 = vld [vmem:[#allocation2 + $0x1a] sm:$0xff] }
  0x5e   : > { %v3604_v41 = vpack.i.bf16 %v584_v37, %v583_v33  ;;  %518 = vst.msk [vmem:[#allocation2 + $0x110] sm:$0xff] %vm430_vm0, %v334_v32  ;;  %v3673_v36 = vpack.i.bf16 %v602_v29, %v601_v28  ;;  %v616_v61 = vld [vmem:[#allocation2 + $0xca] sm:$0xff] }
  0x5f   : > { %v581_v43 = vld [vmem:[#allocation2 + $0xa9] sm:$0xff]  ;;  %519 = vst.msk [vmem:[#allocation2 + $0x118] sm:$0x3] %vm433_vm1, %v424_v34 }
  0x60   : > { %2720 = vrot.lane.b32.xlu2 %v3604_v41, %s3328_s3  ;;  %v582_v48 = vld [vmem:[#allocation2 + $0xb1] sm:$0xff]  ;;  %514 = vst.msk [vmem:[#allocation2 + $0xf0] sm:$0xff] %vm430_vm0, %v407_v38  ;;  %v599_v34 = vld [vmem:[#allocation2 + $0x2] sm:$0xff] }
  0x61   : > { %v3616_v52 = vpack.i.bf16 %v582_v48, %v581_v43  ;;  %515 = vst.msk [vmem:[#allocation2 + $0xf8] sm:$0xff] %vm430_vm0, %v331_v42  ;;  %v2759_v37 = vpack.i.bf16 %v600_v35, %v599_v34  ;;  %v603_v38 = vld [vmem:[#allocation2 + $0x32] sm:$0xff]  ;;  %v608_v42 = vld [vmem:[#allocation2 + $0x6a] sm:$0xff] }
  0x62   : > { %v585_v54 = vld [vmem:[#allocation2 + $0xd9] sm:$0xff]  ;;  %516 = vst.msk [vmem:[#allocation2 + $0x100] sm:$0x3] %vm433_vm1, %v423_v44  ;;  %v3679_v43 = vpack.i.bf16 %v604_v39, %v603_v38  ;;  %v605_v44 = vld [vmem:[#allocation2 + $0x4a] sm:$0xff]  ;;  %v3682_v47 = vpack.i.bf16 %v608_v42, %v607_v40 }
  0x63   : > { %2715 = vrot.lane.b32.xlu1 %v3616_v52, %s3328_s3  ;;  %v586_v59 = vld [vmem:[#allocation2 + $0xe1] sm:$0xff]  ;;  %520 = vst.msk [vmem:[#allocation2 + $0x120] sm:$0xff] %vm430_vm0, %v409_v49  ;;  %v3686_v48 = vpack.i.bf16 %v606_v46, %v605_v44  ;;  %v613_v51 = vld [vmem:[#allocation2 + $0xaa] sm:$0xff]  ;;  %v3742_v35 = vld [vmem:[#allocation2 + $0x38] sm:$0xff] }
  0x64   : > { %v3628_v63 = vpack.i.bf16 %v586_v59, %v585_v54  ;;  %521 = vst.msk [vmem:[#allocation2 + $0x128] sm:$0xff] %vm430_vm0, %v337_v53  ;;  %v609_v49 = vld [vmem:[#allocation2 + $0x7a] sm:$0xff]  ;;  %v614_v53 = vld [vmem:[#allocation2 + $0xb2] sm:$0xff]  ;;  %v618_v4 = vld [vmem:[#allocation2 + $0xe2] sm:$0xff] }
  0x65   : > { %v589_v2 = vld [vmem:[#allocation2 + $0x109] sm:$0xff]  ;;  %522 = vst.msk [vmem:[#allocation2 + $0x130] sm:$0x3] %vm433_vm1, %v425_v56  ;;  %v3690_v54 = vpack.i.bf16 %v610_v50, %v609_v49  ;;  %v611_v56 = vld [vmem:[#allocation2 + $0x92] sm:$0xff]  ;;  %v3694_v58 = vpack.i.bf16 %v614_v53, %v613_v51  ;;  %v637_v39 = vld [vmem:[#allocation2 + $0x60] sm:$0xff] }
  0x66   : > { %2725 = vrot.lane.b32.xlu0 %v3628_v63, %s3328_s3  ;;  %v590_v5 = vld [vmem:[#allocation2 + $0x111] sm:$0xff]  ;;  %526 = vst.msk [vmem:[#allocation2 + $0x150] sm:$0xff] %vm430_vm0, %v411_v60  ;;  %v3698_v59 = vpack.i.bf16 %v612_v57, %v611_v56  ;;  %v615_v60 = vld [vmem:[#allocation2 + $0xc2] sm:$0xff] }
  0x67   : > { %v3638_v8 = vpack.i.bf16 %v590_v5, %v589_v2  ;;  %527 = vst.msk [vmem:[#allocation2 + $0x158] sm:$0xff] %vm430_vm0, %v343_v0  ;;  %v3702_v2 = vpack.i.bf16 %v616_v61, %v615_v60  ;;  %v621_v7 = vld [vmem:[#allocation2 + $0x10a] sm:$0xff]  ;;  %v3747_v38 = vld [vmem:[%s3469_s22 + $0xf8] sm:$0xff] }
  0x68   : > { %v587_v10 = vld [vmem:[#allocation2 + $0xf1] sm:$0xff]  ;;  %528 = vst.msk [vmem:[#allocation2 + $0x160] sm:$0x3] %vm433_vm1, %v427_v3  ;;  %v617_v3 = vld [vmem:[#allocation2 + $0xda] sm:$0xff]  ;;  %v638_v40 = vld [vmem:[#allocation2 + $0x68] sm:$0xff]  ;;  %v4872_v44 = vrot.slane %v3747_v38, 7 }
  0x69   : > { %2735 = vrot.lane.b32.xlu2 %v3638_v8, %s3328_s3  ;;  %v588_v13 = vld [vmem:[#allocation2 + $0xf9] sm:$0xff]  ;;  %523 = vst.msk [vmem:[#allocation2 + $0x138] sm:$0xff] %vm430_vm0, %v410_v6  ;;  %v3710_v6 = vpack.i.bf16 %v618_v4, %v617_v3  ;;  %v3740_v34 = vld [vmem:[#allocation2 + $0x30] sm:$0xff]  ;;  %v3760_v51 = vld [vmem:[#allocation2 + $0x48] sm:$0xff]  ;;  %v2854_v56 = vpack.i.bf16 %v638_v40, %v637_v39 }
  0x6a   : > { %v3648_v15 = vpack.i.bf16 %v588_v13, %v587_v10  ;;  %524 = vst.msk [vmem:[#allocation2 + $0x140] sm:$0xff] %vm430_vm0, %v340_v9  ;;  %v619_v62 = vld [vmem:[#allocation2 + $0xf2] sm:$0xff]  ;;  %v620_v0 = vld [vmem:[#allocation2 + $0xfa] sm:$0xff]  ;;  %v3752_v46 = vpack.i.bf16 %v3742_v35, %v3740_v34 }
  0x6b   : > { %v591_v17 = vld [vmem:[#allocation2 + $0x121] sm:$0xff]  ;;  %525 = vst.msk [vmem:[#allocation2 + $0x148] sm:$0x3] %vm433_vm1, %v426_v12  ;;  %v3706_v5 = vpack.i.bf16 %v620_v0, %v619_v62  ;;  %v622_v9 = vld [vmem:[#allocation2 + $0x112] sm:$0xff] }
  0x6c   : > { %2730 = vrot.lane.b32.xlu1 %v3648_v15, %s3328_s3  ;;  %v592_v19 = vld [vmem:[#allocation2 + $0x129] sm:$0xff]  ;;  %529 = vst.msk [vmem:[#allocation2 + $0x168] sm:$0xff] %vm430_vm0, %v412_v14  ;;  %v3714_v13 = vpack.i.bf16 %v622_v9, %v621_v7  ;;  %v639_v61 = vld [vmem:[#allocation2 + $0x78] sm:$0xff]  ;;  %v640_v62 = vld [vmem:[#allocation2 + $0x80] sm:$0xff] }
  0x6d   : > { %v3657_v20 = vpack.i.bf16 %v592_v19, %v591_v17  ;;  %530 = vst.msk [vmem:[#allocation2 + $0x170] sm:$0xff] %vm430_vm0, %v346_v16  ;;  %v623_v14 = vld [vmem:[#allocation2 + $0x122] sm:$0xff]  ;;  %v624_v16 = vld [vmem:[#allocation2 + $0x12a] sm:$0xff] }
  0x6e   : > { %v595_v22 = vld [vmem:[#allocation2 + $0x151] sm:$0xff]  ;;  %531 = vst.msk [vmem:[#allocation2 + $0x178] sm:$0x3] %vm433_vm1, %v428_v18  ;;  %v3722_v18 = vpack.i.bf16 %v624_v16, %v623_v14  ;;  %v3779_v9 = vld [vmem:[#allocation2 + $0xa8] sm:$0xff] }
  0x6f   : > { %2740 = vrot.lane.b32.xlu0 %v3657_v20, %s3328_s3  ;;  %v596_v23 = vld [vmem:[#allocation2 + $0x159] sm:$0xff]  ;;  %4889 = vst [vmem:[#allocation3_spill] sm:$0xff] %v3694_v58  ;;  %v3762_v53 = vld [vmem:[#allocation2 + $0x50] sm:$0xff] }
  0x70   : > { %v3663_v24 = vpack.i.bf16 %v596_v23, %v595_v22  ;;  %4890 = vst [vmem:[#allocation4_spill] sm:$0xff] %v3702_v2  ;;  %v627_v19 = vld [vmem:[#allocation2 + $0x152] sm:$0xff]  ;;  %v628_v22 = vld [vmem:[#allocation2 + $0x15a] sm:$0xff]  ;;  %v3770_v60 = vpack.i.bf16 %v3762_v53, %v3760_v51 }
  0x71   : > { %v593_v25 = vld [vmem:[#allocation2 + $0x139] sm:$0xff]  ;;  %4891 = vst [vmem:[#allocation5_spill] sm:$0xff] %v3706_v5  ;;  %v3785_v14 = vld [vmem:[#allocation2 + $0x90] sm:$0xff] }
  0x72   : > { %2750 = vrot.lane.b32.xlu2 %v3663_v24, %s3328_s3  ;;  %v594_v26 = vld [vmem:[#allocation2 + $0x141] sm:$0xff]  ;;  %4892 = vst [vmem:[#allocation6_spill] sm:$0xff] %v3710_v6  ;;  %v3726_v23 = vld [vmem:[#allocation2 + $0x18] sm:$0xff] }
  0x73   : > { %v3667_v27 = vpack.i.bf16 %v594_v26, %v593_v25  ;;  %v625_v10 = vld [vmem:[#allocation2 + $0x13a] sm:$0xff]  ;;  %v626_v12 = vld [vmem:[#allocation2 + $0x142] sm:$0xff]  ;;  %4893 = vst [vmem:[#allocation7_spill] sm:$0xff] %v3714_v13  ;;  %v3730_v26 = vpack.i.bf16 %v628_v22, %v627_v19 }
  0x74   : > { %v597_v30 = vld [vmem:[#allocation2 + $0x169] sm:$0xff]  ;;  %v3718_v17 = vpack.i.bf16 %v626_v12, %v625_v10  ;;  %4895 = vst [vmem:[#allocation9_spill] sm:$0xff] %v3722_v18  ;;  %v3728_v25 = vld [vmem:[#allocation2 + $0x20] sm:$0xff]  ;;  %v2859_v12 = vpack.i.bf16 %v640_v62, %v639_v61  ;;  %v3787_v16 = vld [vmem:[#allocation2 + $0x98] sm:$0xff] }
  0x75   : > { %2745 = vrot.lane.b32.xlu1 %v3667_v27, %s3328_s3  ;;  %v598_v32 = vld [vmem:[#allocation2 + $0x171] sm:$0xff]  ;;  %4896 = vst [vmem:[#allocation10_spill] sm:$0xff] %v3730_v26  ;;  %v3794_v22 = vpack.i.bf16 %v3787_v16, %v3785_v14 }
  0x76   : > { %v3671_v33 = vpack.i.bf16 %v598_v32, %v597_v30  ;;  %4894 = vst [vmem:[#allocation8_spill] sm:$0xff] %v3718_v17  ;;  %v629_v28 = vld [vmem:[#allocation2 + $0x16a] sm:$0xff]  ;;  %v630_v29 = vld [vmem:[#allocation2 + $0x172] sm:$0xff]  ;;  %v2839_v30 = vpack.i.bf16 %v3728_v25, %v3726_v23 }
  0x77   : > { %v3738_v32 = vpack.i.bf16 %v630_v29, %v629_v28  ;;  %4898 = vst [vmem:[#allocation12_spill] sm:$0xff] %v3752_v46  ;;  %v3781_v10 = vld [vmem:[#allocation2 + $0xb0] sm:$0xff]  ;;  %v645_v28 = vld [vmem:[#allocation2 + $0xc0] sm:$0xff]  ;;  %v646_v29 = vld [vmem:[#allocation2 + $0xc8] sm:$0xff] }
  0x78   : > { %2755 = vrot.lane.b32.xlu0 %v3671_v33, %s3328_s3  ;;  %4899 = vst [vmem:[#allocation13_spill] sm:$0xff] %v3770_v60  ;;  %v2869_v19 = vpack.i.bf16 %v3781_v10, %v3779_v9  ;;  %s235_s3 = scalar_lea.vmem %s4871_s5, %s2622_s15 }
  0x79   : > { %4897 = vst [vmem:[#allocation11_spill] sm:$0xff] %v3738_v32 }
  0x7a   : > { %2765 = vrot.lane.b32.xlu2 %v3673_v36, %s3329_s23  ;;  %4900 = vst [vmem:[#allocation14_spill] sm:$0xff] %v3794_v22 }
  0x7d   : > { %2760 = vrot.lane.b32.xlu1 %v2759_v37, %s3329_s23  ;;  %v267_v37 = vld [vmem:[%s3469_s22 + $0xf0] sm:$0xff] }
  0x7e   : > { %v347_v42 = vrot.slane %v267_v37, 7 }
  0x80   : > { %2770 = vrot.lane.b32.xlu0 %v3679_v43, %s3329_s23  ;;  %v349_v49 = vsel %vm301_vm2, %v347_v42, %v4872_v44  ;;  %v413_v50 = vsel %vm301_vm2, 0.0, %v347_v42  ;;  %v3799_v42 = vld [vmem:[#allocation2 + $0xf8] sm:$0xff]  ;;  %v3824_v44 = vld [vmem:[#allocation2 + $0x140] sm:$0xff] }
  0x81   : > { %532 = vst.msk [vmem:[#allocation2 + $0x180] sm:$0xff] %vm430_vm0, %v413_v50 }
  0x82   : > { %2780 = vrot.lane.b32.xlu2 %v3682_v47, %s3329_s23  ;;  %533 = vst.msk [vmem:[#allocation2 + $0x188] sm:$0xff] %vm430_vm0, %v349_v49  ;;  %v2874_v49 = vpack.i.bf16 %v646_v29, %v645_v28 }
  0x85   : > { %2775 = vrot.lane.b32.xlu1 %v3686_v48, %s3329_s23 }
  0x88   : > { %2785 = vrot.lane.b32.xlu0 %v3690_v54, %s3329_s23 }
  0x8a   : > { %2795 = vrot.lane.b32.xlu2 %v3694_v58, %s3329_s23 }
  0x8d   : > { %2790 = vrot.lane.b32.xlu1 %v3698_v59, %s3329_s23 }
  0x90   : > { %2800 = vrot.lane.b32.xlu0 %v3702_v2, %s3329_s23 }
  0x92   : > { %2810 = vrot.lane.b32.xlu2 %v3706_v5, %s3329_s23 }
  0x95   : > { %2805 = vrot.lane.b32.xlu1 %v3710_v6, %s3329_s23 }
  0x98   : > { %2815 = vrot.lane.b32.xlu0 %v3714_v13, %s3329_s23 }
  0x9a   : > { %2825 = vrot.lane.b32.xlu2 %v3718_v17, %s3329_s23  ;;  %v657_v17 = vld [vmem:[#allocation2 + $0x150] sm:$0xff] }
  0x9d   : > { %2820 = vrot.lane.b32.xlu1 %v3722_v18, %s3329_s23 }
  0xa0   : > { %2830 = vrot.lane.b32.xlu0 %v3730_v26, %s3329_s23  ;;  %v658_v26 = vld [vmem:[#allocation2 + $0x158] sm:$0xff] }
  0xa2   : > { %2840 = vrot.lane.b32.xlu2 %v2839_v30, %s3330_s24 }
  0xa5   : > { %2835 = vrot.lane.b32.xlu1 %v3738_v32, %s3329_s23  ;;  %v3835_v32 = vld [vmem:[#allocation2 + $0x120] sm:$0xff] }
  0xa6   : > { %4903 = vst [vmem:[#allocation17_spill] sm:$0xff] %v3835_v32 }
  0xa8   : > { %2845 = vrot.lane.b32.xlu0 %v3752_v46, %s3330_s24  ;;  %v2701_v57 = vpop.permute.xlu2 %2700 }
  0xa9   : > { %v2703_v0 = vunpack.i.h.bf16 %v2701_v57  ;;  %v2702_v3 = vunpack.i.l.bf16 %v2701_v57  ;;  %v3809_v57 = vld [vmem:[#allocation2 + $0xd8] sm:$0xff] }
  0xaa   : > { %2855 = vrot.lane.b32.xlu2 %v2854_v56, %s3330_s24  ;;  %4901 = vst [vmem:[#allocation15_spill] sm:$0xff] %v3809_v57 }
  0xab   : > { %v3774_v4 = vsel %vm430_vm0, %v637_v39, %v2702_v3  ;;  %v3777_v7 = vsel %vm430_vm0, %v638_v40, %v2703_v0  ;;  %v3797_v40 = vld [vmem:[#allocation2 + $0xf0] sm:$0xff]  ;;  %v3811_v0 = vld [vmem:[#allocation2 + $0xe0] sm:$0xff] }
  0xac   : > { %v3815_v3 = vpack.i.bf16 %v3799_v42, %v3797_v40 }
  0xad   : > { %2850 = vrot.lane.b32.xlu1 %v3770_v60, %s3330_s24  ;;  %v3826_v60 = vpop.permute.xlu0 %2680 }
  0xae   : > { %4902 = vst [vmem:[#allocation16_spill] sm:$0xff] %v3815_v3 }
  0xb0   : > { %2860 = vrot.lane.b32.xlu0 %v2859_v12, %s3330_s24  ;;  %v651_v12 = vld [vmem:[#allocation2 + $0x108] sm:$0xff] }
  0xb1   : > { %v2706_v30 = vpop.permute.xlu2 %2705 }
  0xb2   : > { %2870 = vrot.lane.b32.xlu2 %v2869_v19, %s3330_s24  ;;  %v2708_v37 = vunpack.i.h.bf16 %v2706_v30  ;;  %v2707_v39 = vunpack.i.l.bf16 %v2706_v30  ;;  %v652_v19 = vld [vmem:[#allocation2 + $0x110] sm:$0xff] }
  0xb4   : > { %v3802_v50 = vsel %vm430_vm0, %v640_v62, %v2708_v37  ;;  %v3805_v56 = vsel %vm430_vm0, %v639_v61, %v2707_v39  ;;  %v2879_v62 = vpack.i.bf16 %v3811_v0, %v3809_v57  ;;  %v3822_v39 = vld [vmem:[#allocation2 + $0x138] sm:$0xff] }
  0xb5   : > { %2865 = vrot.lane.b32.xlu1 %v3794_v22, %s3330_s24  ;;  %v2889_v22 = vpack.i.bf16 %v652_v19, %v651_v12 }
  0xb8   : > { %2875 = vrot.lane.b32.xlu0 %v2874_v49, %s3330_s24 }
  0xba   : > { %2885 = vrot.lane.b32.xlu2 %v3815_v3, %s3330_s24  ;;  %v2721_v61 = vpop.permute.xlu2 %2720  ;;  %v3837_v3 = vld [vmem:[#allocation2 + $0x128] sm:$0xff] }
  0xbb   : > { %v2723_v30 = vunpack.i.h.bf16 %v2721_v61  ;;  %v2722_v37 = vunpack.i.l.bf16 %v2721_v61  ;;  %4904 = vst [vmem:[#allocation18_spill] sm:$0xff] %v3837_v3  ;;  %v2899_v61 = vpack.i.bf16 %v3824_v44, %v3822_v39 }
  0xbd   : > { %2880 = vrot.lane.b32.xlu1 %v2879_v62, %s3330_s24  ;;  %v3830_v49 = vsel %vm430_vm0, %v646_v29, %v2723_v30  ;;  %v3833_v46 = vsel %vm430_vm0, %v645_v28, %v2722_v37  ;;  %v2894_v62 = vpack.i.bf16 %v3837_v3, %v3835_v32  ;;  %v661_v29 = vld [vmem:[#allocation2 + $0x180] sm:$0xff]  ;;  %v662_v30 = vld [vmem:[#allocation2 + $0x188] sm:$0xff]  ;;  %v2904_v28 = vpack.i.bf16 %v658_v26, %v657_v17 }
  0xbe   : > { %v2914_v2 = vpack.i.bf16 %v662_v30, %v661_v29  ;;  %v3860_v3 = vld [vmem:[#allocation2 + $0x168] sm:$0xff] }
  0xc0   : > { %2890 = vrot.lane.b32.xlu0 %v2889_v22, %s3330_s24 }
  0xc2   : > { %2900 = vrot.lane.b32.xlu2 %v2899_v61, %s3330_s24 }
  0xc3   : > { %v2736_v37 = vpop.permute.xlu2 %2735  ;;  %v2691_v18 = vpop.permute.xlu1 %2690 }
  0xc4   : > { %v2738_v5 = vunpack.i.h.bf16 %v2736_v37  ;;  %v2737_v13 = vunpack.i.l.bf16 %v2736_v37  ;;  %v2693_v6 = vunpack.i.h.bf16 %v2691_v18  ;;  %v2692_v58 = vunpack.i.l.bf16 %v2691_v18  ;;  %v3862_v18 = vld [vmem:[#allocation2 + $0x170] sm:$0xff] }
  0xc5   : > { %2895 = vrot.lane.b32.xlu1 %v2894_v62, %s3330_s24 }
  0xc6   : > { %v3847_v22 = vsel %vm430_vm0, %v652_v19, %v2738_v5  ;;  %v3850_v57 = vsel %vm430_vm0, %v651_v12, %v2737_v13  ;;  %v3854_v61 = vsel %vm430_vm0, %v3740_v34, %v2692_v58  ;;  %v3858_v32 = vsel %vm430_vm0, %v3742_v35, %v2693_v6  ;;  %v2686_v37 = vpop.permute.xlu0 %2685 }
  0xc7   : > { %v2909_v5 = vpack.i.bf16 %v3862_v18, %v3860_v3  ;;  %v4905_v34 = vrot.slane %v3747_v38, 7  ;;  %v2687_v30 = vunpack.i.l.bf16 %v2686_v37 }
  0xc8   : > { %2905 = vrot.lane.b32.xlu0 %v2904_v28, %s3330_s24 }
  0xc9   : > { %v429_v35 = vsel %vm301_vm2, %v4905_v34, 0.0 }
  0xca   : > { %2915 = vrot.lane.b32.xlu2 %v2914_v2, %s3330_s24  ;;  %534 = vst.msk [vmem:[#allocation2 + $0x190] sm:$0x3] %vm433_vm1, %v429_v35  ;;  %v2688_v2 = vunpack.i.h.bf16 %v2686_v37 }
  0xcc   : > { %v2751_v13 = vpop.permute.xlu2 %2750  ;;  %v3868_v12 = vpop.permute.xlu1 %2695 }
  0xcd   : > { %2910 = vrot.lane.b32.xlu1 %v2909_v5, %s3330_s24  ;;  %v2753_v58 = vunpack.i.h.bf16 %v2751_v13  ;;  %v2752_v6 = vunpack.i.l.bf16 %v2751_v13  ;;  %v1850_v5 = vsel %vm430_vm0, %v3726_v23, %v2687_v30  ;;  %v1851_v13 = vsel %vm430_vm0, %v3728_v25, %v2688_v2 }
  0xcf   : > { %v3875_v19 = vsel %vm430_vm0, %v658_v26, %v2753_v58  ;;  %v3878_v62 = vsel %vm430_vm0, %v657_v17, %v2752_v6  ;;  %v3880_v29 = vpop.permute.xlu0 %2710 }
  0xd0   : > { %2920 = vrot.lane.b32.xlu0 %v3556_v1, %s3331_s25 }
  0xd2   : > { %2930 = vrot.lane.b32.xlu2 %v3580_v21, %s3331_s25 }
  0xd4   : > { %v2766_v38 = vpop.permute.xlu2 %2765 }
  0xd5   : > { %2925 = vrot.lane.b32.xlu1 %v3544_v55, %s3331_s25  ;;  %v2716_v17 = vpop.permute.xlu1 %2715  ;;  %v2768_v26 = vunpack.i.h.bf16 %v2766_v38  ;;  %v2767_v28 = vunpack.i.l.bf16 %v2766_v38 }
  0xd6   : > { %v2717_v35 = vunpack.i.l.bf16 %v2716_v17 }
  0xd7   : > { %v3894_v1 = vsel %vm1880_vm3, %v1850_v5, %v2767_v28  ;;  %v3897_v37 = vsel %vm1880_vm3, %v1851_v13, %v2768_v26  ;;  %v2682_v28 = vunpack.i.l.bf16 %v3826_v60 }
  0xd8   : > { %2935 = vrot.lane.b32.xlu0 %v3532_v45, %s3331_s25  ;;  %v3901_v21 = vpop.permute.xlu0 %2725  ;;  %v1862_v30 = vsel %vm430_vm0, %v3779_v9, %v2717_v35  ;;  %v2683_v9 = vunpack.i.h.bf16 %v3826_v60 }
  0xda   : > { %2945 = vrot.lane.b32.xlu2 %v3592_v31, %s3331_s25  ;;  %v2718_v31 = vunpack.i.h.bf16 %v2716_v17 }
  0xdc   : > { %v2781_v55 = vpop.permute.xlu2 %2780 }
  0xdd   : > { %2940 = vrot.lane.b32.xlu1 %v3568_v11, %s3331_s25  ;;  %v2783_v23 = vunpack.i.h.bf16 %v2781_v55  ;;  %v2782_v25 = vunpack.i.l.bf16 %v2781_v55  ;;  %v536_v55 = vld [vmem:[#allocation2 + $0x8] sm:$0xff] }
  0xde   : > { %v2731_v58 = vpop.permute.xlu1 %2730  ;;  %v1849_v35 = vsel %vm430_vm0, %v536_v55, %v2683_v9  ;;  %v2697_v9 = vunpack.i.l.bf16 %v3868_v12 }
  0xdf   : > { %v3909_v6 = vsel %vm1880_vm3, %v3777_v7, %v2783_v23  ;;  %v3913_v34 = vsel %vm1880_vm3, %v3774_v4, %v2782_v25  ;;  %v1863_v4 = vsel %vm430_vm0, %v3781_v10, %v2718_v31  ;;  %v535_v23 = vld [vmem:[#allocation2] sm:$0xff] }
  0xe0   : > { %2950 = vrot.lane.b32.xlu0 %v3616_v52, %s3331_s25 }
  0xe1   : > { %v3917_v45 = vpop.permute.xlu0 %2740 }
  0xe2   : > { %2960 = vrot.lane.b32.xlu2 %v3628_v63, %s3331_s25  ;;  %v2733_v63 = vunpack.i.h.bf16 %v2731_v58 }
  0xe4   : > { %v2796_v11 = vpop.permute.xlu2 %2795 }
  0xe5   : > { %2955 = vrot.lane.b32.xlu1 %v3604_v41, %s3331_s25  ;;  %v2798_v7 = vunpack.i.h.bf16 %v2796_v11  ;;  %v2797_v2 = vunpack.i.l.bf16 %v2796_v11  ;;  %v2732_v41 = vunpack.i.l.bf16 %v2731_v58  ;;  %v1848_v11 = vsel %vm430_vm0, %v535_v23, %v2682_v28 }
  0xe7   : > { %v2746_v52 = vpop.permute.xlu1 %2745  ;;  %v3928_v38 = vsel %vm1880_vm3, %v1863_v4, %v2798_v7  ;;  %v3931_v17 = vsel %vm1880_vm3, %v1862_v30, %v2797_v2  ;;  %v1868_v25 = vsel %vm430_vm0, %v3797_v40, %v2732_v41  ;;  %v694_v7 = vld [vmem:[#allocation2 + $0x189] sm:$0xff] }
  0xe8   : > { %2965 = vrot.lane.b32.xlu0 %v3648_v15, %s3331_s25  ;;  %v1869_v15 = vsel %vm430_vm0, %v3799_v42, %v2733_v63  ;;  %v693_v42 = vld [vmem:[#allocation2 + $0x181] sm:$0xff]  ;;  %v2748_v2 = vunpack.i.h.bf16 %v2746_v52  ;;  %v2747_v40 = vunpack.i.l.bf16 %v2746_v52 }
  0xea   : > { %v3935_v26 = vpop.permute.xlu0 %2755  ;;  %2975 = vrot.lane.b32.xlu2 %v3657_v20, %s3331_s25  ;;  %v1875_v23 = vsel %vm430_vm0, %v3824_v44, %v2748_v2  ;;  %v1854_v44 = vsel %vm430_vm0, %v3760_v51, %v2697_v9 }
  0xec   : > { %v2811_v10 = vpop.permute.xlu2 %2810 }
  0xed   : > { %2970 = vrot.lane.b32.xlu1 %v3638_v8, %s3331_s25  ;;  %v2813_v5 = vunpack.i.h.bf16 %v2811_v10  ;;  %v2812_v13 = vunpack.i.l.bf16 %v2811_v10  ;;  %v2698_v10 = vunpack.i.h.bf16 %v3868_v12  ;;  %v1874_v12 = vsel %vm430_vm0, %v3822_v39, %v2747_v40 }
  0xef   : > { %v2761_v58 = vpop.permute.xlu1 %2760  ;;  %v3948_v20 = vsel %vm1880_vm3, %v1869_v15, %v2813_v5  ;;  %v3951_v31 = vsel %vm1880_vm3, %v1868_v25, %v2812_v13  ;;  %v2994_v5 = vpack.i.bf16 %v694_v7, %v693_v42  ;;  %v2713_v42 = vunpack.i.h.bf16 %v3880_v29 }
  0xf0   : > { %2980 = vrot.lane.b32.xlu0 %v3667_v27, %s3331_s25  ;;  %v2763_v8 = vunpack.i.h.bf16 %v2761_v58  ;;  %v2762_v60 = vunpack.i.l.bf16 %v2761_v58  ;;  %v2712_v7 = vunpack.i.l.bf16 %v3880_v29 }
  0xf2   : > { %v1882_v4 = vsel %vm1880_vm3, %v1849_v35, %v2763_v8  ;;  %v1881_v30 = vsel %vm1880_vm3, %v1848_v11, %v2762_v60  ;;  %v2771_v63 = vpop.permute.xlu0 %2770  ;;  %2990 = vrot.lane.b32.xlu2 %v3671_v33, %s3331_s25 }
  0xf3   : > { %v2773_v41 = vunpack.i.h.bf16 %v2771_v63  ;;  %v2772_v27 = vunpack.i.l.bf16 %v2771_v63 }
  0xf4   : > { %v2826_v28 = vpop.permute.xlu2 %2825 }
  0xf5   : > { %v3965_v13 = vsel %vm1880_vm3, %v3858_v32, %v2773_v41  ;;  %v3969_v52 = vsel %vm1880_vm3, %v3854_v61, %v2772_v27  ;;  %2985 = vrot.lane.b32.xlu1 %v3663_v24, %s3331_s25  ;;  %v2828_v33 = vunpack.i.h.bf16 %v2826_v28  ;;  %v2827_v55 = vunpack.i.l.bf16 %v2826_v28 }
  0xf6   : > { %v1855_v24 = vsel %vm430_vm0, %v3762_v53, %v2698_v10  ;;  %v2727_v28 = vunpack.i.l.bf16 %v3901_v21 }
  0xf7   : > { %v2776_v15 = vpop.permute.xlu1 %2775  ;;  %v3978_v25 = vsel %vm1880_vm3, %v1875_v23, %v2828_v33  ;;  %v3981_v32 = vsel %vm1880_vm3, %v1874_v12, %v2827_v55 }
  0xf8   : > { %2995 = vrot.lane.b32.xlu0 %v2994_v5, %s3331_s25  ;;  %v2778_v61 = vunpack.i.h.bf16 %v2776_v15  ;;  %v2777_v58 = vunpack.i.l.bf16 %v2776_v15 }
  0xfa   : > { %v1887_v8 = vsel %vm1880_vm3, %v1854_v44, %v2777_v58  ;;  %v1888_v39 = vsel %vm1880_vm3, %v1855_v24, %v2778_v61  ;;  %v2786_v60 = vpop.permute.xlu0 %2785  ;;  %3005 = vrot.lane.b32.xlu2 %v3679_v43, %s3332_s26  ;;  %v4906_v61 = vld [vmem:[#allocation15_spill] sm:$0xff] }
  0xfb   : > { %v2788_v35 = vunpack.i.h.bf16 %v2786_v60  ;;  %v2787_v11 = vunpack.i.l.bf16 %v2786_v60 }
  0xfc   : > { %v2841_v53 = vpop.permute.xlu2 %2840 }
  0xfd   : > { %v3996_v51 = vsel %vm1880_vm3, %v3802_v50, %v2788_v35  ;;  %v4000_v2 = vsel %vm1880_vm3, %v3805_v56, %v2787_v11  ;;  %3000 = vrot.lane.b32.xlu1 %v3673_v36, %s3332_s26  ;;  %v2843_v43 = vunpack.i.h.bf16 %v2841_v53  ;;  %v2842_v40 = vunpack.i.l.bf16 %v2841_v53 }
  0xfe   : > { %v1861_v56 = vsel %vm430_vm0, %v3787_v16, %v2713_v42  ;;  %v1860_v36 = vsel %vm430_vm0, %v3785_v14, %v2712_v7  ;;  %v2742_v35 = vunpack.i.l.bf16 %v3917_v45  ;;  %v4908_v7 = vld [vmem:[#allocation3_spill] sm:$0xff] }
  0xff   : > { %v2791_v63 = vpop.permute.xlu1 %2790  ;;  %v4005_v41 = vsel %vm1913_vm4, %v1882_v4, %v2843_v43  ;;  %v4008_v29 = vsel %vm1913_vm4, %v1881_v30, %v2842_v40 }
 0x100   : > { %3010 = vrot.lane.b32.xlu0 %v3686_v48, %s3332_s26  ;;  %v2793_v50 = vunpack.i.h.bf16 %v2791_v63  ;;  %v2792_v27 = vunpack.i.l.bf16 %v2791_v63  ;;  %v2728_v48 = vunpack.i.h.bf16 %v3901_v21 }
 0x102   : > { %v1893_v10 = vsel %vm1880_vm3, %v1860_v36, %v2792_v27  ;;  %v1894_v9 = vsel %vm1880_vm3, %v1861_v56, %v2793_v50  ;;  %v2801_v4 = vpop.permute.xlu0 %2800  ;;  %3020 = vrot.lane.b32.xlu2 %v3690_v54, %s3332_s26  ;;  %v4909_v50 = vld [vmem:[#allocation6_spill] sm:$0xff]  ;;  %v4911_v36 = vld [vmem:[#allocation17_spill] sm:$0xff] }
 0x103   : > { %v2803_v30 = vunpack.i.h.bf16 %v2801_v4  ;;  %v2802_v5 = vunpack.i.l.bf16 %v2801_v4  ;;  %v4910_v56 = vld [vmem:[#allocation18_spill] sm:$0xff]  ;;  %v1872_v4 = vsel %vm430_vm0, %v4911_v36, %v2742_v35 }
 0x104   : > { %v2856_v33 = vpop.permute.xlu2 %2855 }
 0x105   : > { %v4024_v16 = vsel %vm1880_vm3, %v3830_v49, %v2803_v30  ;;  %v4028_v14 = vsel %vm1880_vm3, %v3833_v46, %v2802_v5  ;;  %3015 = vrot.lane.b32.xlu1 %v3682_v47, %s3332_s26  ;;  %v2858_v55 = vunpack.i.h.bf16 %v2856_v33  ;;  %v2857_v54 = vunpack.i.l.bf16 %v2856_v33 }
 0x106   : > { %v1867_v46 = vsel %vm430_vm0, %v3811_v0, %v2728_v48  ;;  %v1866_v47 = vsel %vm430_vm0, %v4906_v61, %v2727_v28  ;;  %v4912_v48 = vld [vmem:[#allocation7_spill] sm:$0xff]  ;;  %v2758_v33 = vunpack.i.h.bf16 %v3935_v26 }
 0x107   : > { %v2806_v23 = vpop.permute.xlu1 %2805  ;;  %v4033_v12 = vsel %vm1913_vm4, %v1888_v39, %v2858_v55  ;;  %v4036_v21 = vsel %vm1913_vm4, %v1887_v8, %v2857_v54  ;;  %v4907_v39 = vld [vmem:[#allocation4_spill] sm:$0xff]  ;;  %v2757_v55 = vunpack.i.l.bf16 %v3935_v26 }
 0x108   : > { %3025 = vrot.lane.b32.xlu0 %v3698_v59, %s3332_s26  ;;  %v2808_v49 = vunpack.i.h.bf16 %v2806_v23  ;;  %v2807_v15 = vunpack.i.l.bf16 %v2806_v23  ;;  %v2743_v59 = vunpack.i.h.bf16 %v3917_v45 }
 0x10a   : > { %v1899_v58 = vsel %vm1880_vm3, %v1866_v47, %v2807_v15  ;;  %v1900_v24 = vsel %vm1880_vm3, %v1867_v46, %v2808_v49  ;;  %v2816_v44 = vpop.permute.xlu0 %2815  ;;  %3035 = vrot.lane.b32.xlu2 %v4907_v39, %s3332_s26  ;;  %v4913_v15 = vld [vmem:[#allocation5_spill] sm:$0xff] }
 0x10b   : > { %v2818_v8 = vunpack.i.h.bf16 %v2816_v44  ;;  %v2817_v60 = vunpack.i.l.bf16 %v2816_v44  ;;  %v4914_v39 = vld [vmem:[#allocation9_spill] sm:$0xff] }
 0x10c   : > { %v2871_v11 = vpop.permute.xlu2 %2870 }
 0x10d   : > { %v4052_v0 = vsel %vm1880_vm3, %v3847_v22, %v2818_v8  ;;  %v4056_v42 = vsel %vm1880_vm3, %v3850_v57, %v2817_v60  ;;  %3030 = vrot.lane.b32.xlu1 %v4908_v7, %s3332_s26  ;;  %v2873_v53 = vunpack.i.h.bf16 %v2871_v11  ;;  %v2872_v43 = vunpack.i.l.bf16 %v2871_v11  ;;  %v4915_v11 = vld [vmem:[#allocation10_spill] sm:$0xff] }
 0x10e   : > { %v1873_v57 = vsel %vm430_vm0, %v4910_v56, %v2743_v59  ;;  %v1878_v60 = vsel %vm430_vm0, %v3860_v3, %v2757_v55  ;;  %v4916_v3 = vld [vmem:[#allocation8_spill] sm:$0xff] }
 0x10f   : > { %v2821_v40 = vpop.permute.xlu1 %2820  ;;  %v4061_v63 = vsel %vm1913_vm4, %v1893_v10, %v2872_v43  ;;  %v4064_v45 = vsel %vm1913_vm4, %v1894_v9, %v2873_v53 }
 0x110   : > { %3040 = vrot.lane.b32.xlu0 %v4909_v50, %s3332_s26  ;;  %v2823_v22 = vunpack.i.h.bf16 %v2821_v40  ;;  %v2822_v27 = vunpack.i.l.bf16 %v2821_v40 }
 0x112   : > { %v1905_v30 = vsel %vm1880_vm3, %v1872_v4, %v2822_v27  ;;  %v1906_v5 = vsel %vm1880_vm3, %v1873_v57, %v2823_v22  ;;  %v2831_v10 = vpop.permute.xlu0 %2830  ;;  %3050 = vrot.lane.b32.xlu2 %v4912_v48, %s3332_s26  ;;  %v725_v22 = vld [vmem:[#allocation2 + $0x182] sm:$0xff]  ;;  %v726_v27 = vld [vmem:[#allocation2 + $0x18a] sm:$0xff] }
 0x113   : > { %v2833_v9 = vunpack.i.h.bf16 %v2831_v10  ;;  %v2832_v28 = vunpack.i.l.bf16 %v2831_v10  ;;  %v4122_v10 = vpack.i.bf16 %v726_v27, %v725_v22  ;;  %v760_v48 = vld [vmem:[#allocation2 + $0x31] sm:$0xff] }
 0x114   : > { %v2886_v54 = vpop.permute.xlu2 %2885 }
 0x115   : > { %v4080_v23 = vsel %vm1880_vm3, %v3875_v19, %v2833_v9  ;;  %v4084_v49 = vsel %vm1880_vm3, %v3878_v62, %v2832_v28  ;;  %3045 = vrot.lane.b32.xlu1 %v4913_v15, %s3332_s26  ;;  %v2888_v46 = vunpack.i.h.bf16 %v2886_v54  ;;  %v2887_v61 = vunpack.i.l.bf16 %v2886_v54  ;;  %v761_v9 = vld [vmem:[#allocation2 + $0x39] sm:$0xff] }
 0x116   : > { %v1879_v62 = vsel %vm430_vm0, %v3862_v18, %v2758_v33  ;;  %v3084_v15 = vpack.i.bf16 %v761_v9, %v760_v48 }
 0x117   : > { %v2836_v47 = vpop.permute.xlu1 %2835  ;;  %v4089_v44 = vsel %vm1913_vm4, %v1899_v58, %v2887_v61  ;;  %v4092_v26 = vsel %vm1913_vm4, %v1900_v24, %v2888_v46 }
 0x118   : > { %3055 = vrot.lane.b32.xlu0 %v4914_v39, %s3332_s26  ;;  %v2838_v19 = vunpack.i.h.bf16 %v2836_v47  ;;  %v2837_v8 = vunpack.i.l.bf16 %v2836_v47  ;;  %v792_v39 = vld [vmem:[#allocation2 + $0x32] sm:$0xff] }
 0x11a   : > { %v1911_v59 = vsel %vm1880_vm3, %v1878_v60, %v2837_v8  ;;  %v1912_v35 = vsel %vm1880_vm3, %v1879_v62, %v2838_v19  ;;  %v2846_v58 = vpop.permute.xlu0 %2845  ;;  %3065 = vrot.lane.b32.xlu2 %v4915_v11, %s3332_s26  ;;  %v793_v19 = vld [vmem:[#allocation2 + $0x3a] sm:$0xff] }
 0x11b   : > { %v2848_v24 = vunpack.i.h.bf16 %v2846_v58  ;;  %v2847_v7 = vunpack.i.l.bf16 %v2846_v58  ;;  %v3089_v58 = vpack.i.bf16 %v793_v19, %v792_v39 }
 0x11c   : > { %v2901_v53 = vpop.permute.xlu2 %2900 }
 0x11d   : > { %v4106_v43 = vsel %vm1913_vm4, %v3894_v1, %v2847_v7  ;;  %v4110_v18 = vsel %vm1913_vm4, %v3897_v37, %v2848_v24  ;;  %3060 = vrot.lane.b32.xlu1 %v4916_v3, %s3332_s26  ;;  %v2903_v40 = vunpack.i.h.bf16 %v2901_v53  ;;  %v2902_v50 = vunpack.i.l.bf16 %v2901_v53  ;;  %v4917_v1 = vld [vmem:[#allocation11_spill] sm:$0xff]  ;;  %v4919_v53 = vld [vmem:[#allocation13_spill] sm:$0xff] }
 0x11f   : > { %v2851_v56 = vpop.permute.xlu1 %2850  ;;  %v4115_v57 = vsel %vm1913_vm4, %v1905_v30, %v2902_v50  ;;  %v4118_v36 = vsel %vm1913_vm4, %v1906_v5, %v2903_v40  ;;  %v4918_v5 = vld [vmem:[#allocation12_spill] sm:$0xff] }
 0x120   : > { %3070 = vrot.lane.b32.xlu0 %v4917_v1, %s3332_s26  ;;  %v2853_v4 = vunpack.i.h.bf16 %v2851_v56  ;;  %v2852_v37 = vunpack.i.l.bf16 %v2851_v56  ;;  %v769_v40 = vld [vmem:[#allocation2 + $0x99] sm:$0xff]  ;;  %v762_v56 = vld [vmem:[#allocation2 + $0x49] sm:$0xff]  ;;  %v763_v1 = vld [vmem:[#allocation2 + $0x51] sm:$0xff] }
 0x122   : > { %v1918_v28 = vsel %vm1913_vm4, %v3969_v52, %v2852_v37  ;;  %v1919_v33 = vsel %vm1913_vm4, %v3965_v13, %v2853_v4  ;;  %v2861_v30 = vpop.permute.xlu0 %2860  ;;  %3080 = vrot.lane.b32.xlu2 %v4918_v5, %s3333_s27  ;;  %v3104_v5 = vpack.i.bf16 %v763_v1, %v762_v56  ;;  %v732_v56 = vld [vmem:[#allocation2 + $0x60] sm:$0xff]  ;;  %v733_v1 = vld [vmem:[#allocation2 + $0x68] sm:$0xff] }
 0x123   : > { %v2863_v55 = vunpack.i.h.bf16 %v2861_v30  ;;  %v2862_v54 = vunpack.i.l.bf16 %v2861_v30 }
 0x124   : > { %v2916_v46 = vpop.permute.xlu2 %2915 }
 0x125   : > { %v4132_v61 = vsel %vm1913_vm4, %v3909_v6, %v2863_v55  ;;  %v4136_v47 = vsel %vm1913_vm4, %v3913_v34, %v2862_v54  ;;  %3075 = vrot.lane.b32.xlu1 %v4122_v10, %s3332_s26  ;;  %v2918_v13 = vunpack.i.h.bf16 %v2916_v46  ;;  %v2917_v52 = vunpack.i.l.bf16 %v2916_v46  ;;  %v794_v55 = vld [vmem:[#allocation2 + $0x4a] sm:$0xff]  ;;  %v795_v54 = vld [vmem:[#allocation2 + $0x52] sm:$0xff] }
 0x127   : > { %v2866_v8 = vpop.permute.xlu1 %2865  ;;  %v4141_v62 = vsel %vm1913_vm4, %v1911_v59, %v2917_v52  ;;  %v4144_v60 = vsel %vm1913_vm4, %v1912_v35, %v2918_v13  ;;  %v768_v35 = vld [vmem:[#allocation2 + $0x91] sm:$0xff]  ;;  %v3114_v52 = vpack.i.bf16 %v795_v54, %v794_v55  ;;  %v3139_v55 = vpack.i.bf16 %v733_v1, %v732_v56 }
 0x128   : > { %3085 = vrot.lane.b32.xlu0 %v3084_v15, %s3334_s28  ;;  %v2868_v6 = vunpack.i.h.bf16 %v2866_v8  ;;  %v2867_v34 = vunpack.i.l.bf16 %v2866_v8  ;;  %v3109_v4 = vpack.i.bf16 %v769_v40, %v768_v35  ;;  %v777_v35 = vld [vmem:[#allocation2 + $0xf9] sm:$0xff] }
 0x12a   : > { %v1924_v11 = vsel %vm1913_vm4, %v4000_v2, %v2867_v34  ;;  %v1925_v24 = vsel %vm1913_vm4, %v3996_v51, %v2868_v6  ;;  %v2876_v7 = vpop.permute.xlu0 %2875  ;;  %3095 = vrot.lane.b32.xlu2 %v4919_v53, %s3333_s27  ;;  %v801_v34 = vld [vmem:[#allocation2 + $0x9a] sm:$0xff] }
 0x12b   : > { %v2878_v59 = vunpack.i.h.bf16 %v2876_v7  ;;  %v2877_v3 = vunpack.i.l.bf16 %v2876_v7 }
 0x12c   : > { %v2931_v50 = vpop.permute.xlu2 %2930 }
 0x12d   : > { %v4155_v22 = vsel %vm1913_vm4, %v3928_v38, %v2878_v59  ;;  %v4159_v2 = vsel %vm1913_vm4, %v3931_v17, %v2877_v3  ;;  %3090 = vrot.lane.b32.xlu1 %v3089_v58, %s3335_s29  ;;  %v2933_v51 = vunpack.i.h.bf16 %v2931_v50  ;;  %v2932_v27 = vunpack.i.l.bf16 %v2931_v50  ;;  %v4920_v38 = vld [vmem:[#allocation14_spill] sm:$0xff] }
 0x12f   : > { %v2881_v37 = vpop.permute.xlu1 %2880  ;;  %v4163_v48 = vsel %vm1946_vm5, %v1918_v28, %v2932_v27  ;;  %v4166_v9 = vsel %vm1946_vm5, %v1919_v33, %v2933_v51 }
 0x130   : > { %3100 = vrot.lane.b32.xlu0 %v4920_v38, %s3333_s27  ;;  %v2883_v17 = vunpack.i.h.bf16 %v2881_v37  ;;  %v2882_v30 = vunpack.i.l.bf16 %v2881_v37 }
 0x132   : > { %v1930_v15 = vsel %vm1913_vm4, %v4028_v14, %v2882_v30  ;;  %v1931_v46 = vsel %vm1913_vm4, %v4024_v16, %v2883_v17  ;;  %v2891_v13 = vpop.permute.xlu0 %2890  ;;  %3110 = vrot.lane.b32.xlu2 %v3109_v4, %s3334_s28  ;;  %v800_v16 = vld [vmem:[#allocation2 + $0x92] sm:$0xff] }
 0x133   : > { %v2893_v28 = vunpack.i.h.bf16 %v2891_v13  ;;  %v2892_v33 = vunpack.i.l.bf16 %v2891_v13  ;;  %v3119_v3 = vpack.i.bf16 %v801_v34, %v800_v16  ;;  %v808_v30 = vld [vmem:[#allocation2 + $0xf2] sm:$0xff] }
 0x134   : > { %v2946_v39 = vpop.permute.xlu2 %2945 }
 0x135   : > { %v4177_v19 = vsel %vm1913_vm4, %v3948_v20, %v2893_v28  ;;  %v4181_v8 = vsel %vm1913_vm4, %v3951_v31, %v2892_v33  ;;  %3105 = vrot.lane.b32.xlu1 %v3104_v5, %s3334_s28  ;;  %v2948_v14 = vunpack.i.h.bf16 %v2946_v39  ;;  %v2947_v6 = vunpack.i.l.bf16 %v2946_v39  ;;  %v776_v31 = vld [vmem:[#allocation2 + $0xf1] sm:$0xff]  ;;  %v809_v5 = vld [vmem:[#allocation2 + $0xfa] sm:$0xff] }
 0x136   : > { %v3129_v4 = vpack.i.bf16 %v777_v35, %v776_v31  ;;  %v739_v39 = vld [vmem:[#allocation2 + $0xb0] sm:$0xff]  ;;  %v764_v35 = vld [vmem:[#allocation2 + $0x61] sm:$0xff] }
 0x137   : > { %v2896_v58 = vpop.permute.xlu1 %2895  ;;  %v4185_v7 = vsel %vm1946_vm5, %v1924_v11, %v2947_v6  ;;  %v4188_v53 = vsel %vm1946_vm5, %v1925_v24, %v2948_v14  ;;  %v4921_v11 = vld [vmem:[#allocation16_spill] sm:$0xff] }
 0x138   : > { %3115 = vrot.lane.b32.xlu0 %v3114_v52, %s3335_s29  ;;  %v2898_v20 = vunpack.i.h.bf16 %v2896_v58  ;;  %v2897_v59 = vunpack.i.l.bf16 %v2896_v58  ;;  %v738_v52 = vld [vmem:[#allocation2 + $0xa8] sm:$0xff]  ;;  %v771_v58 = vld [vmem:[#allocation2 + $0xb1] sm:$0xff] }
 0x13a   : > { %v1936_v40 = vsel %vm1913_vm4, %v4056_v42, %v2897_v59  ;;  %v1937_v50 = vsel %vm1913_vm4, %v4052_v0, %v2898_v20  ;;  %v2906_v51 = vpop.permute.xlu0 %2905  ;;  %3125 = vrot.lane.b32.xlu2 %v4921_v11, %s3333_s27  ;;  %v3144_v20 = vpack.i.bf16 %v739_v39, %v738_v52  ;;  %v802_v52 = vld [vmem:[#allocation2 + $0xaa] sm:$0xff]  ;;  %v803_v39 = vld [vmem:[#allocation2 + $0xb2] sm:$0xff] }
 0x13b   : > { %v2908_v27 = vunpack.i.h.bf16 %v2906_v51  ;;  %v2907_v24 = vunpack.i.l.bf16 %v2906_v51  ;;  %v765_v51 = vld [vmem:[#allocation2 + $0x69] sm:$0xff] }
 0x13c   : > { %v2961_v37 = vpop.permute.xlu2 %2960 }
 0x13d   : > { %v4199_v38 = vsel %vm1913_vm4, %v3978_v25, %v2908_v27  ;;  %v4203_v42 = vsel %vm1913_vm4, %v3981_v32, %v2907_v24  ;;  %3120 = vrot.lane.b32.xlu1 %v3119_v3, %s3335_s29  ;;  %v2963_v0 = vunpack.i.h.bf16 %v2961_v37  ;;  %v2962_v17 = vunpack.i.l.bf16 %v2961_v37  ;;  %v797_v37 = vld [vmem:[#allocation2 + $0x6a] sm:$0xff] }
 0x13e   : > { %v3134_v32 = vpack.i.bf16 %v809_v5, %v808_v30  ;;  %v746_v5 = vld [vmem:[#allocation2 + $0x108] sm:$0xff] }
 0x13f   : > { %v2911_v54 = vpop.permute.xlu1 %2910  ;;  %v4207_v13 = vsel %vm1946_vm5, %v1930_v15, %v2962_v17  ;;  %v4210_v28 = vsel %vm1946_vm5, %v1931_v46, %v2963_v0  ;;  %v770_v46 = vld [vmem:[#allocation2 + $0xa9] sm:$0xff] }
 0x140   : > { %3130 = vrot.lane.b32.xlu0 %v3129_v4, %s3334_s28  ;;  %v2913_v25 = vunpack.i.h.bf16 %v2911_v54  ;;  %v2912_v33 = vunpack.i.l.bf16 %v2911_v54  ;;  %v3154_v11 = vpack.i.bf16 %v771_v58, %v770_v46  ;;  %v796_v4 = vld [vmem:[#allocation2 + $0x62] sm:$0xff] }
 0x141   : > { %v3159_v54 = vpack.i.bf16 %v797_v37, %v796_v4 }
 0x142   : > { %v1942_v14 = vsel %vm1913_vm4, %v4084_v49, %v2912_v33  ;;  %v1943_v6 = vsel %vm1913_vm4, %v4080_v23, %v2913_v25  ;;  %v2921_v16 = vpop.permute.xlu0 %2920  ;;  %3140 = vrot.lane.b32.xlu2 %v3139_v55, %s3333_s27  ;;  %v747_v55 = vld [vmem:[#allocation2 + $0x110] sm:$0xff] }
 0x143   : > { %v2923_v15 = vunpack.i.h.bf16 %v2921_v16  ;;  %v2922_v34 = vunpack.i.l.bf16 %v2921_v16  ;;  %v3169_v16 = vpack.i.bf16 %v747_v55, %v746_v5  ;;  %v810_v5 = vld [vmem:[#allocation2 + $0x10a] sm:$0xff]  ;;  %v811_v55 = vld [vmem:[#allocation2 + $0x112] sm:$0xff] }
 0x144   : > { %v2976_v59 = vpop.permute.xlu2 %2975 }
 0x145   : > { %v4220_v3 = vsel %vm1946_vm5, %v4005_v41, %v2923_v15  ;;  %v4224_v31 = vsel %vm1946_vm5, %v4008_v29, %v2922_v34  ;;  %3135 = vrot.lane.b32.xlu1 %v3134_v32, %s3335_s29  ;;  %v2978_v23 = vunpack.i.h.bf16 %v2976_v59  ;;  %v2977_v49 = vunpack.i.l.bf16 %v2976_v59  ;;  %v753_v59 = vld [vmem:[#allocation2 + $0x158] sm:$0xff] }
 0x146   : > { %v3149_v29 = vpack.i.bf16 %v765_v51, %v764_v35  ;;  %v784_v51 = vld [vmem:[#allocation2 + $0x151] sm:$0xff] }
 0x147   : > { %v2926_v27 = vpop.permute.xlu1 %2925  ;;  %v4228_v24 = vsel %vm1946_vm5, %v1936_v40, %v2977_v49  ;;  %v4231_v56 = vsel %vm1946_vm5, %v1937_v50, %v2978_v23 }
 0x148   : > { %3145 = vrot.lane.b32.xlu0 %v3144_v20, %s3333_s27  ;;  %v2928_v41 = vunpack.i.h.bf16 %v2926_v27  ;;  %v2927_v1 = vunpack.i.l.bf16 %v2926_v27  ;;  %v752_v20 = vld [vmem:[#allocation2 + $0x150] sm:$0xff] }
 0x149   : > { %v3174_v27 = vpack.i.bf16 %v753_v59, %v752_v20 }
 0x14a   : > { %v4236_v0 = vsel %vm1946_vm5, %v4106_v43, %v2927_v1  ;;  %v4240_v17 = vsel %vm1946_vm5, %v4110_v18, %v2928_v41  ;;  %v2936_v40 = vpop.permute.xlu0 %2935  ;;  %3155 = vrot.lane.b32.xlu2 %v3154_v11, %s3334_s28  ;;  %v785_v11 = vld [vmem:[#allocation2 + $0x159] sm:$0xff] }
 0x14b   : > { %v2938_v50 = vunpack.i.h.bf16 %v2936_v40  ;;  %v2937_v30 = vunpack.i.l.bf16 %v2936_v40  ;;  %v3184_v4 = vpack.i.bf16 %v785_v11, %v784_v51 }
 0x14c   : > { %v2991_v25 = vpop.permute.xlu2 %2990 }
 0x14d   : > { %v4245_v33 = vsel %vm1946_vm5, %v4033_v12, %v2938_v50  ;;  %v4249_v43 = vsel %vm1946_vm5, %v4036_v21, %v2937_v30  ;;  %3150 = vrot.lane.b32.xlu1 %v3149_v29, %s3334_s28  ;;  %v2993_v18 = vunpack.i.h.bf16 %v2991_v25  ;;  %v2992_v32 = vunpack.i.l.bf16 %v2991_v25  ;;  %v779_v29 = vld [vmem:[#allocation2 + $0x111] sm:$0xff] }
 0x14e   : > { %v3164_v21 = vpack.i.bf16 %v803_v39, %v802_v52  ;;  %v735_v52 = vld [vmem:[#allocation2 + $0x80] sm:$0xff]  ;;  %v3189_v39 = vpack.i.bf16 %v811_v55, %v810_v5 }
 0x14f   : > { %v2941_v15 = vpop.permute.xlu1 %2940  ;;  %v4253_v34 = vsel %vm1946_vm5, %v1942_v14, %v2992_v32  ;;  %v4256_v46 = vsel %vm1946_vm5, %v1943_v6, %v2993_v18  ;;  %v734_v32 = vld [vmem:[#allocation2 + $0x78] sm:$0xff]  ;;  %v767_v5 = vld [vmem:[#allocation2 + $0x81] sm:$0xff] }
 0x150   : > { %3160 = vrot.lane.b32.xlu0 %v3159_v54, %s3335_s29  ;;  %v2943_v12 = vunpack.i.h.bf16 %v2941_v15  ;;  %v2942_v58 = vunpack.i.l.bf16 %v2941_v15 }
 0x152   : > { %v4261_v23 = vsel %vm1946_vm5, %v4136_v47, %v2942_v58  ;;  %v4265_v49 = vsel %vm1946_vm5, %v4132_v61, %v2943_v12  ;;  %v2951_v14 = vpop.permute.xlu0 %2950  ;;  %3170 = vrot.lane.b32.xlu2 %v3169_v16, %s3333_s27  ;;  %v778_v61 = vld [vmem:[#allocation2 + $0x109] sm:$0xff]  ;;  %v817_v12 = vld [vmem:[#allocation2 + $0x15a] sm:$0xff]  ;;  %v3199_v58 = vpack.i.bf16 %v735_v52, %v734_v32 }
 0x153   : > { %v2953_v6 = vunpack.i.h.bf16 %v2951_v14  ;;  %v2952_v35 = vunpack.i.l.bf16 %v2951_v14  ;;  %v3179_v30 = vpack.i.bf16 %v779_v29, %v778_v61  ;;  %v772_v61 = vld [vmem:[#allocation2 + $0xc1] sm:$0xff]  ;;  %v773_v29 = vld [vmem:[#allocation2 + $0xc9] sm:$0xff] }
 0x154   : > { %v4268_v41 = vpop.permute.xlu2 %3005  ;;  %v3214_v55 = vpack.i.bf16 %v773_v29, %v772_v61  ;;  %v798_v52 = vld [vmem:[#allocation2 + $0x7a] sm:$0xff] }
 0x155   : > { %v4272_v1 = vsel %vm1946_vm5, %v4061_v63, %v2952_v35  ;;  %v4276_v47 = vsel %vm1946_vm5, %v4064_v45, %v2953_v6  ;;  %3165 = vrot.lane.b32.xlu1 %v3164_v21, %s3335_s29  ;;  %v740_v6 = vld [vmem:[#allocation2 + $0xc0] sm:$0xff]  ;;  %v741_v35 = vld [vmem:[#allocation2 + $0xc8] sm:$0xff] }
 0x157   : > { %v2956_v37 = vpop.permute.xlu1 %2955 }
 0x158   : > { %3175 = vrot.lane.b32.xlu0 %v3174_v27, %s3333_s27  ;;  %v2958_v40 = vunpack.i.h.bf16 %v2956_v37  ;;  %v2957_v50 = vunpack.i.l.bf16 %v2956_v37 }
 0x15a   : > { %v1961_v63 = vsel %vm1946_vm5, %v4159_v2, %v2957_v50  ;;  %v1962_v45 = vsel %vm1946_vm5, %v4155_v22, %v2958_v40  ;;  %v2966_v54 = vpop.permute.xlu0 %2965  ;;  %3185 = vrot.lane.b32.xlu2 %v3184_v4, %s3334_s28  ;;  %v816_v22 = vld [vmem:[#allocation2 + $0x152] sm:$0xff]  ;;  %v3204_v4 = vpack.i.bf16 %v741_v35, %v740_v6 }
 0x15b   : > { %v2968_v25 = vunpack.i.h.bf16 %v2966_v54  ;;  %v2967_v18 = vunpack.i.l.bf16 %v2966_v54  ;;  %v3194_v14 = vpack.i.bf16 %v817_v12, %v816_v22 }
 0x15c   : > { %v4285_v16 = vpop.permute.xlu2 %3020 }
 0x15d   : > { %v4289_v15 = vsel %vm1946_vm5, %v4089_v44, %v2967_v18  ;;  %v4293_v2 = vsel %vm1946_vm5, %v4092_v26, %v2968_v25  ;;  %3180 = vrot.lane.b32.xlu1 %v3179_v30, %s3334_s28  ;;  %v766_v30 = vld [vmem:[#allocation2 + $0x79] sm:$0xff] }
 0x15e   : > { %v3209_v32 = vpack.i.bf16 %v767_v5, %v766_v30  ;;  %v786_v5 = vld [vmem:[#allocation2 + $0x169] sm:$0xff] }
 0x15f   : > { %v2971_v21 = vpop.permute.xlu1 %2970 }
 0x160   : > { %3190 = vrot.lane.b32.xlu0 %v3189_v39, %s3335_s29  ;;  %v2973_v20 = vunpack.i.h.bf16 %v2971_v21  ;;  %v2972_v59 = vunpack.i.l.bf16 %v2971_v21  ;;  %v799_v39 = vld [vmem:[#allocation2 + $0x82] sm:$0xff] }
 0x162   : > { %v1967_v44 = vsel %vm1946_vm5, %v4181_v8, %v2972_v59  ;;  %v1968_v26 = vsel %vm1946_vm5, %v4177_v19, %v2973_v20  ;;  %v2981_v51 = vpop.permute.xlu0 %2980  ;;  %3200 = vrot.lane.b32.xlu2 %v3199_v58, %s3333_s27  ;;  %v749_v20 = vld [vmem:[#allocation2 + $0x128] sm:$0xff]  ;;  %v3219_v59 = vpack.i.bf16 %v799_v39, %v798_v52 }
 0x163   : > { %v2983_v11 = vunpack.i.h.bf16 %v2981_v51  ;;  %v2982_v27 = vunpack.i.l.bf16 %v2981_v51  ;;  %v804_v51 = vld [vmem:[#allocation2 + $0xc2] sm:$0xff] }
 0x164   : > { %v3036_v37 = vpop.permute.xlu2 %3035  ;;  %v780_v52 = vld [vmem:[#allocation2 + $0x121] sm:$0xff]  ;;  %v781_v39 = vld [vmem:[#allocation2 + $0x129] sm:$0xff] }
 0x165   : > { %v4304_v40 = vsel %vm1946_vm5, %v4115_v57, %v2982_v27  ;;  %v4308_v50 = vsel %vm1946_vm5, %v4118_v36, %v2983_v11  ;;  %3195 = vrot.lane.b32.xlu1 %v3194_v14, %s3335_s29  ;;  %v3038_v19 = vunpack.i.h.bf16 %v3036_v37  ;;  %v3037_v8 = vunpack.i.l.bf16 %v3036_v37  ;;  %v805_v11 = vld [vmem:[#allocation2 + $0xca] sm:$0xff] }
 0x166   : > { %v755_v37 = vld [vmem:[#allocation2 + $0x170] sm:$0xff] }
 0x167   : > { %v2986_v54 = vpop.permute.xlu1 %2985  ;;  %v4312_v25 = vsel %vm1979_vm6, %v1961_v63, %v3037_v8  ;;  %v4315_v18 = vsel %vm1979_vm6, %v1962_v45, %v3038_v19  ;;  %v748_v45 = vld [vmem:[#allocation2 + $0x120] sm:$0xff] }
 0x168   : > { %3205 = vrot.lane.b32.xlu0 %v3204_v4, %s3333_s27  ;;  %v2988_v57 = vunpack.i.h.bf16 %v2986_v54  ;;  %v2987_v36 = vunpack.i.l.bf16 %v2986_v54  ;;  %v3229_v27 = vpack.i.bf16 %v749_v20, %v748_v45 }
 0x16a   : > { %v1973_v22 = vsel %vm1946_vm5, %v4203_v42, %v2987_v36  ;;  %v1974_v12 = vsel %vm1946_vm5, %v4199_v38, %v2988_v57  ;;  %v2996_v58 = vpop.permute.xlu0 %2995  ;;  %3215 = vrot.lane.b32.xlu2 %v3214_v55, %s3334_s28  ;;  %v787_v55 = vld [vmem:[#allocation2 + $0x171] sm:$0xff] }
 0x16b   : > { %v2998_v63 = vunpack.i.h.bf16 %v2996_v58  ;;  %v2997_v21 = vunpack.i.l.bf16 %v2996_v58  ;;  %v3244_v58 = vpack.i.bf16 %v787_v55, %v786_v5  ;;  %v818_v5 = vld [vmem:[#allocation2 + $0x16a] sm:$0xff]  ;;  %v819_v55 = vld [vmem:[#allocation2 + $0x172] sm:$0xff] }
 0x16c   : > { %v3051_v14 = vpop.permute.xlu2 %3050 }
 0x16d   : > { %v4325_v6 = vsel %vm1946_vm5, %v4141_v62, %v2997_v21  ;;  %v4329_v35 = vsel %vm1946_vm5, %v4144_v60, %v2998_v63  ;;  %3210 = vrot.lane.b32.xlu1 %v3209_v32, %s3334_s28  ;;  %v3053_v38 = vunpack.i.h.bf16 %v3051_v14  ;;  %v3052_v42 = vunpack.i.l.bf16 %v3051_v14  ;;  %v754_v60 = vld [vmem:[#allocation2 + $0x168] sm:$0xff] }
 0x16e   : > { %v3224_v62 = vpack.i.bf16 %v805_v11, %v804_v51  ;;  %v3234_v54 = vpack.i.bf16 %v755_v37, %v754_v60  ;;  %v3239_v14 = vpack.i.bf16 %v781_v39, %v780_v52  ;;  %v742_v60 = vld [vmem:[#allocation2 + $0xd8] sm:$0xff]  ;;  %v743_v37 = vld [vmem:[#allocation2 + $0xe0] sm:$0xff] }
 0x16f   : > { %v4332_v61 = vpop.permute.xlu1 %3000  ;;  %v4335_v29 = vsel %vm1979_vm6, %v1967_v44, %v3052_v42  ;;  %v4338_v4 = vsel %vm1979_vm6, %v1968_v26, %v3053_v38  ;;  %v812_v38 = vld [vmem:[#allocation2 + $0x122] sm:$0xff]  ;;  %v813_v42 = vld [vmem:[#allocation2 + $0x12a] sm:$0xff]  ;;  %v774_v52 = vld [vmem:[#allocation2 + $0xd9] sm:$0xff] }
 0x170   : > { %3220 = vrot.lane.b32.xlu0 %v3219_v59, %s3335_s29  ;;  %v775_v39 = vld [vmem:[#allocation2 + $0xe1] sm:$0xff] }
 0x172   : > { %v3011_v19 = vpop.permute.xlu0 %3010  ;;  %3230 = vrot.lane.b32.xlu2 %v3229_v27, %s3333_s27 }
 0x173   : > { %v3013_v8 = vunpack.i.h.bf16 %v3011_v19  ;;  %v3012_v30 = vunpack.i.l.bf16 %v3011_v19  ;;  %v3249_v19 = vpack.i.bf16 %v813_v42, %v812_v38  ;;  %v807_v38 = vld [vmem:[#allocation2 + $0xe2] sm:$0xff] }
 0x174   : > { %v3066_v57 = vpop.permute.xlu2 %3065 }
 0x175   : > { %v4344_v44 = vsel %vm1979_vm6, %v4163_v48, %v3012_v30  ;;  %v4348_v26 = vsel %vm1979_vm6, %v4166_v9, %v3013_v8  ;;  %3225 = vrot.lane.b32.xlu1 %v3224_v62, %s3335_s29  ;;  %v3068_v36 = vunpack.i.h.bf16 %v3066_v57  ;;  %v3067_v32 = vunpack.i.l.bf16 %v3066_v57  ;;  %v2131_v48 = vld [vmem:[%s4867_s1 + $0x10] sm:$0x3] }
 0x176   : > { %v2141_v59 = vunpack.c.l.b16 %v2131_v48 }
 0x177   : > { %v3016_v63 = vpop.permute.xlu1 %3015  ;;  %v4352_v21 = vsel %vm1979_vm6, %v1973_v22, %v3067_v32  ;;  %v4355_v45 = vsel %vm1979_vm6, %v1974_v12, %v3068_v36  ;;  %v2652_v36 = vld [vmem:[%s4867_s1 + $0x8] sm:$0xff] }
 0x178   : > { %3235 = vrot.lane.b32.xlu0 %v3234_v54, %s3333_s27  ;;  %v3018_v9 = vunpack.i.h.bf16 %v3016_v63  ;;  %v3017_v20 = vunpack.i.l.bf16 %v3016_v63  ;;  %v2144_v11 = vpack.c.b16 %v2141_v59, %v2141_v59  ;;  %v3259_v54 = vpack.i.bf16 %v743_v37, %v742_v60  ;;  %v2651_v59 = vld [vmem:[%s4867_s1] sm:$0xff]  ;;  %v757_v37 = vld [vmem:[#allocation2 + $0x188] sm:$0xff] }
 0x179   : > { %v756_v60 = vld [vmem:[#allocation2 + $0x180] sm:$0xff] }
 0x17a   : > { %v4363_v51 = vsel %vm1979_vm6, %v4249_v43, %v3017_v20  ;;  %v4367_v22 = vsel %vm1979_vm6, %v4245_v33, %v3018_v9  ;;  %v3026_v12 = vpop.permute.xlu0 %3025  ;;  %3245 = vrot.lane.b32.xlu2 %v3244_v58, %s3334_s28  ;;  %v2198_v30 = vsel %vm2196_vm7, %v2144_v11, 0  ;;  %v750_v9 = vld [vmem:[#allocation2 + $0x138] sm:$0xff]  ;;  %v751_v20 = vld [vmem:[#allocation2 + $0x140] sm:$0xff] }
 0x17b   : > { %v3028_v27 = vunpack.i.h.bf16 %v3026_v12  ;;  %v3027_v62 = vunpack.i.l.bf16 %v3026_v12  ;;  %2205 = vmatpush.bf16.msra.mxu0 %v2198_v30  ;;  %2653 = vmatpush.bf16.msra.mxu1 %v2198_v30  ;;  %v3274_v42 = vpack.i.bf16 %v751_v20, %v750_v9 }
 0x17c   : > { %v4370_v8 = vpop.permute.xlu2 %3080  ;;  %2654 = vmatpush.bf16.msra.mxu2 %v2198_v30  ;;  %2655 = vmatpush.bf16.msra.mxu3 %v2198_v30 }
 0x17d   : > { %v4374_v43 = vsel %vm1979_vm6, %v4185_v7, %v3027_v62  ;;  %v4378_v33 = vsel %vm1979_vm6, %v4188_v53, %v3028_v27  ;;  %3240 = vrot.lane.b32.xlu1 %v3239_v14, %s3334_s28  ;;  %v3254_v53 = vpack.i.bf16 %v819_v55, %v818_v5  ;;  %v3264_v14 = vpack.i.bf16 %v775_v39, %v774_v52 }
 0x17f   : > { %v3031_v57 = vpop.permute.xlu1 %3030  ;;  %2206 = vmatpush.bf16.msra.mxu0 %v2652_v36  ;;  %2656 = vmatpush.bf16.msra.mxu1 %v2652_v36 }
 0x180   : > { %3250 = vrot.lane.b32.xlu0 %v3249_v19, %s3335_s29  ;;  %v3033_v7 = vunpack.i.h.bf16 %v3031_v57  ;;  %v3032_v32 = vunpack.i.l.bf16 %v3031_v57  ;;  %2657 = vmatpush.bf16.msra.mxu2 %v2652_v36  ;;  %v788_v57 = vld [vmem:[#allocation2 + $0x181] sm:$0xff] }
 0x181   : > { %2658 = vmatpush.bf16.msra.mxu3 %v2652_v36  ;;  %v789_v36 = vld [vmem:[#allocation2 + $0x189] sm:$0xff] }
 0x182   : > { %v4387_v58 = vsel %vm1979_vm6, %v4272_v1, %v3032_v32  ;;  %v4391_v63 = vsel %vm1979_vm6, %v4276_v47, %v3033_v7  ;;  %v4393_v48 = vpop.permute.xlu0 %3040  ;;  %3260 = vrot.lane.b32.xlu2 %v3259_v54, %s3333_s27  ;;  %v806_v47 = vld [vmem:[#allocation2 + $0xda] sm:$0xff]  ;;  %v3279_v7 = vpack.i.bf16 %v757_v37, %v756_v60  ;;  %v3289_v52 = vpack.i.bf16 %v789_v36, %v788_v57 }
 0x183   : > { %2207 = vmatpush.bf16.msra.mxu0 %v2651_v59  ;;  %2659 = vmatpush.bf16.msra.mxu1 %v2651_v59  ;;  %v3269_v62 = vpack.i.bf16 %v807_v38, %v806_v47  ;;  %v814_v47 = vld [vmem:[#allocation2 + $0x13a] sm:$0xff] }
 0x184   : > { %v4400_v1 = vpop.permute.xlu2 %3095  ;;  %2660 = vmatpush.bf16.msra.mxu2 %v2651_v59  ;;  %v790_v36 = vld [vmem:[#allocation2 + $0x199] sm:$0xff] }
 0x185   : > { %3255 = vrot.lane.b32.xlu1 %v3254_v53, %s3335_s29  ;;  %2661 = vmatpush.bf16.msra.mxu3 %v2651_v59  ;;  %v783_v53 = vld [vmem:[#allocation2 + $0x141] sm:$0xff] }
 0x187   : > { %v3046_v12 = vpop.permute.xlu1 %3045 }
 0x188   : > { %3265 = vrot.lane.b32.xlu0 %v3264_v14, %s3334_s28  ;;  %v3048_v11 = vunpack.i.h.bf16 %v3046_v12  ;;  %v3047_v27 = vunpack.i.l.bf16 %v3046_v12 }
 0x18a   : > { %v4405_v19 = vsel %vm1979_vm6, %v4289_v15, %v3047_v27  ;;  %v4409_v30 = vsel %vm1979_vm6, %v4293_v2, %v3048_v11  ;;  %v3056_v5 = vpop.permute.xlu0 %3055  ;;  %3275 = vrot.lane.b32.xlu2 %v3274_v42, %s3333_s27  ;;  %v782_v2 = vld [vmem:[#allocation2 + $0x139] sm:$0xff] }
 0x18b   : > { %v3058_v55 = vunpack.i.h.bf16 %v3056_v5  ;;  %v3057_v54 = vunpack.i.l.bf16 %v3056_v5  ;;  %v3284_v14 = vpack.i.bf16 %v783_v53, %v782_v2  ;;  %v758_v27 = vld [vmem:[#allocation2 + $0x198] sm:$0xff]  ;;  %v3003_v53 = vunpack.i.h.bf16 %v4332_v61 }
 0x18c   : > { %v4421_v9 = vpop.permute.xlu2 %3110 }
 0x18d   : > { %v4414_v32 = vsel %vm1979_vm6, %v4228_v24, %v3057_v54  ;;  %v4418_v15 = vsel %vm1979_vm6, %v4231_v56, %v3058_v55  ;;  %3270 = vrot.lane.b32.xlu1 %v3269_v62, %s3335_s29  ;;  %v815_v24 = vld [vmem:[#allocation2 + $0x142] sm:$0xff] }
 0x18e   : > { %v759_v62 = vld [vmem:[#allocation2 + $0x1a0] sm:$0xff]  ;;  %v3294_v60 = vpack.i.bf16 %v815_v24, %v814_v47 }
 0x18f   : > { %v3061_v39 = vpop.permute.xlu1 %3060  ;;  %v823_v47 = vld [vmem:[#allocation2 + $0x1a2] sm:$0xff] }
 0x190   : > { %3280 = vrot.lane.b32.xlu0 %v3279_v7, %s3333_s27  ;;  %v3063_v20 = vunpack.i.h.bf16 %v3061_v39  ;;  %v3062_v59 = vunpack.i.l.bf16 %v3061_v39  ;;  %v791_v7 = vld [vmem:[#allocation2 + $0x1a1] sm:$0xff]  ;;  %v3083_v39 = vunpack.i.h.bf16 %v4370_v8 }
 0x192   : > { %v4426_v38 = vsel %vm1979_vm6, %v4304_v40, %v3062_v59  ;;  %v4430_v56 = vsel %vm1979_vm6, %v4308_v50, %v3063_v20  ;;  %v3071_v42 = vpop.permute.xlu0 %3070  ;;  %3290 = vrot.lane.b32.xlu2 %v3289_v52, %s3334_s28  ;;  %v3304_v50 = vpack.i.bf16 %v759_v62, %v758_v27  ;;  %v3002_v52 = vunpack.i.l.bf16 %v4332_v61 }
 0x193   : > { %v3073_v12 = vunpack.i.h.bf16 %v3071_v42  ;;  %v3072_v11 = vunpack.i.l.bf16 %v3071_v42  ;;  %v3082_v20 = vunpack.i.l.bf16 %v4370_v8  ;;  %v3309_v59 = vpack.i.bf16 %v791_v7, %v790_v36 }
 0x194   : > { %v4443_v57 = vpop.permute.xlu2 %3125  ;;  %v1980_v24 = vsel %vm1979_vm6, %v4224_v31, %v3002_v52  ;;  %v1981_v61 = vsel %vm1979_vm6, %v4220_v3, %v3003_v53  ;;  %v3098_v7 = vunpack.i.h.bf16 %v4400_v1 }
 0x195   : > { %v4435_v37 = vsel %vm1979_vm6, %v4253_v34, %v3072_v11  ;;  %v4439_v40 = vsel %vm1979_vm6, %v4256_v46, %v3073_v12  ;;  %3285 = vrot.lane.b32.xlu1 %v3284_v14, %s3334_s28  ;;  %v2013_v8 = vsel %vm2012_vm8, %v1980_v24, %v3082_v20  ;;  %v2014_v12 = vsel %vm2012_vm8, %v1981_v61, %v3083_v39 }
 0x196   : > { %v3022_v20 = vunpack.i.l.bf16 %v4285_v16 }
 0x197   : > { %v3076_v5 = vpop.permute.xlu1 %3075 }
 0x198   : > { %3295 = vrot.lane.b32.xlu0 %v3294_v60, %s3335_s29  ;;  %v3078_v55 = vunpack.i.h.bf16 %v3076_v5  ;;  %v3077_v54 = vunpack.i.l.bf16 %v3076_v5  ;;  %v3008_v5 = vunpack.i.h.bf16 %v4268_v41 }
 0x19a   : > { %v4447_v34 = vsel %vm1979_vm6, %v4325_v6, %v3077_v54  ;;  %v4451_v46 = vsel %vm1979_vm6, %v4329_v35, %v3078_v55  ;;  %v3086_v2 = vpop.permute.xlu0 %3085  ;;  %3305 = vrot.lane.b32.xlu2 %v3304_v50, %s3333_s27  ;;  %v822_v35 = vld [vmem:[#allocation2 + $0x19a] sm:$0xff]  ;;  %v3007_v55 = vunpack.i.l.bf16 %v4268_v41  ;;  %v1983_v52 = vsel %vm1979_vm6, %v4240_v17, %v3008_v5 }
 0x19b   : > { %v3088_v14 = vunpack.i.h.bf16 %v3086_v2  ;;  %v3087_v6 = vunpack.i.l.bf16 %v3086_v2  ;;  %v3314_v60 = vpack.i.bf16 %v823_v47, %v822_v35  ;;  %v3097_v2 = vunpack.i.l.bf16 %v4400_v1 }
 0x19c   : > { %v4473_v54 = vpop.permute.xlu2 %3140  ;;  %v1982_v53 = vsel %vm1979_vm6, %v4236_v0, %v3007_v55  ;;  %v3023_v41 = vunpack.i.h.bf16 %v4285_v16  ;;  %v2016_v1 = vsel %vm2012_vm8, %v1983_v52, %v3098_v7 }
 0x19d   : > { %3300 = vrot.lane.b32.xlu1 %v4122_v10, %s3335_s29  ;;  %v2046_v10 = vsel %vm2045_vm9, %v2013_v8, %v3087_v6  ;;  %v2047_v62 = vsel %vm2045_vm9, %v2014_v12, %v3088_v14  ;;  %v2015_v6 = vsel %vm2012_vm8, %v1982_v53, %v3097_v2  ;;  %v1988_v8 = vsel %vm1979_vm6, %v4261_v23, %v3022_v20 }
 0x19e   : > { %v1989_v16 = vsel %vm1979_vm6, %v4265_v49, %v3023_v41  ;;  %v3113_v12 = vunpack.i.h.bf16 %v4421_v9  ;;  %v3043_v2 = vunpack.i.h.bf16 %v4393_v48  ;;  %v3042_v53 = vunpack.i.l.bf16 %v4393_v48 }
 0x19f   : > { %v3091_v42 = vpop.permute.xlu1 %3090  ;;  %v3127_v41 = vunpack.i.l.bf16 %v4443_v57 }
 0x1a0   : > { %3310 = vrot.lane.b32.xlu0 %v3309_v59, %s3334_s28  ;;  %v3093_v11 = vunpack.i.h.bf16 %v3091_v42  ;;  %v3092_v27 = vunpack.i.l.bf16 %v3091_v42 }
 0x1a2   : > { %v3101_v50 = vpop.permute.xlu0 %3100  ;;  %v2079_v31 = vsel %vm2078_vm10, %v2046_v10, %v3092_v27  ;;  %v2080_v3 = vsel %vm2078_vm10, %v2047_v62, %v3093_v11  ;;  %v3112_v11 = vunpack.i.l.bf16 %v4421_v9 }
 0x1a3   : > { %v2111_v36 = vpack.c.bf16 %v2080_v3, %v2079_v31  ;;  %v3103_v35 = vunpack.i.h.bf16 %v3101_v50  ;;  %v3102_v47 = vunpack.i.l.bf16 %v3101_v50 }
 0x1a4   : > { %v4495_v27 = vpop.permute.xlu2 %3155 }
 0x1a5   : > { %3315 = vrot.lane.b32.xlu1 %v3314_v60, %s3335_s29  ;;  %2631 = vmatmul.msk.bf16.vlgmr.msra.gmra.mxu0 %vm2147_vm11, %v2111_v36  ;;  %v2021_v60 = vsel %vm2012_vm8, %v1988_v8, %v3102_v47  ;;  %v2022_v50 = vsel %vm2012_vm8, %v1989_v16, %v3103_v35  ;;  %v3142_v16 = vunpack.i.l.bf16 %v4473_v54 }
 0x1a6   : > { %v2054_v49 = vsel %vm2045_vm9, %v2021_v60, %v3112_v11  ;;  %v2055_v55 = vsel %vm2045_vm9, %v2022_v50, %v3113_v12 }
 0x1a7   : > { %v3106_v39 = vpop.permute.xlu1 %3105 }
 0x1a8   : > { %v3108_v59 = vunpack.i.h.bf16 %v3106_v39  ;;  %v3107_v14 = vunpack.i.l.bf16 %v3106_v39  ;;  %v3128_v39 = vunpack.i.h.bf16 %v4443_v57 }
 0x1aa   : > { %v2048_v24 = vsel %vm2045_vm9, %v2015_v6, %v3107_v14  ;;  %v2049_v0 = vsel %vm2045_vm9, %v2016_v1, %v3108_v59  ;;  %v3116_v61 = vpop.permute.xlu0 %3115  ;;  %v1996_v14 = vsel %vm1979_vm6, %v4207_v13, %v3042_v53  ;;  %v1997_v6 = vsel %vm1979_vm6, %v4210_v28, %v3043_v2 }
 0x1ab   : > { %v3118_v42 = vunpack.i.h.bf16 %v3116_v61  ;;  %v3117_v17 = vunpack.i.l.bf16 %v3116_v61  ;;  %v2029_v48 = vsel %vm2012_vm8, %v1996_v14, %v3127_v41  ;;  %v2030_v47 = vsel %vm2012_vm8, %v1997_v6, %v3128_v39 }
 0x1ac   : > { %v3171_v1 = vpop.permute.xlu2 %3170  ;;  %v3143_v28 = vunpack.i.h.bf16 %v4473_v54 }
 0x1ad   : > { %v2081_v10 = vsel %vm2078_vm10, %v2048_v24, %v3117_v17  ;;  %v2082_v62 = vsel %vm2078_vm10, %v2049_v0, %v3118_v42 }
 0x1ae   : > { %v2112_v31 = vpack.c.bf16 %v2082_v62, %v2081_v10  ;;  %v2017_v62 = vsel %vm2012_vm8, %v4344_v44, %v3142_v16  ;;  %v2018_v60 = vsel %vm2012_vm8, %v4348_v26, %v3143_v28 }
 0x1af   : > { %v3121_v3 = vpop.permute.xlu1 %3120 }
 0x1b0   : > { %v3123_v23 = vunpack.i.h.bf16 %v3121_v3  ;;  %v3122_v5 = vunpack.i.l.bf16 %v3121_v3 }
 0x1b2   : > { %v3131_v36 = vpop.permute.xlu0 %3130  ;;  %v2087_v9 = vsel %vm2078_vm10, %v2054_v49, %v3122_v5  ;;  %v2088_v7 = vsel %vm2078_vm10, %v2055_v55, %v3123_v23 }
 0x1b3   : > { %v2115_v52 = vpack.c.bf16 %v2088_v7, %v2087_v9  ;;  %v3133_v20 = vunpack.i.h.bf16 %v3131_v36  ;;  %v3132_v59 = vunpack.i.l.bf16 %v3131_v36  ;;  %v3158_v36 = vunpack.i.h.bf16 %v4495_v27 }
 0x1b4   : > { %v3186_v50 = vpop.permute.xlu2 %3185  ;;  %v3157_v9 = vunpack.i.l.bf16 %v4495_v27 }
 0x1b5   : > { %2632 = vmatmul.msk.bf16.gmra.mxu0 %vm2147_vm11, %v2112_v31  ;;  %2635 = vmatmul.msk.bf16.vlgmr.msra.gmra.mxu1 %vm2147_vm11, %v2115_v52  ;;  %v2062_v0 = vsel %vm2045_vm9, %v2029_v48, %v3132_v59  ;;  %v2063_v61 = vsel %vm2045_vm9, %v2030_v47, %v3133_v20  ;;  %v3173_v48 = vunpack.i.h.bf16 %v3171_v1  ;;  %v3172_v47 = vunpack.i.l.bf16 %v3171_v1 }
 0x1b7   : > { %v3136_v35 = vpop.permute.xlu1 %3135 }
 0x1b8   : > { %v3138_v24 = vunpack.i.h.bf16 %v3136_v35  ;;  %v3137_v57 = vunpack.i.l.bf16 %v3136_v35 }
 0x1ba   : > { %v3146_v42 = vpop.permute.xlu0 %3145  ;;  %v2095_v17 = vsel %vm2078_vm10, %v2062_v0, %v3137_v57  ;;  %v2096_v13 = vsel %vm2078_vm10, %v2063_v61, %v3138_v24  ;;  %v2031_v0 = vsel %vm2012_vm8, %v4405_v19, %v3172_v47  ;;  %v2032_v61 = vsel %vm2012_vm8, %v4409_v30, %v3173_v48 }
 0x1bb   : > { %v2119_v8 = vpack.c.bf16 %v2096_v13, %v2095_v17  ;;  %v3148_v31 = vunpack.i.h.bf16 %v3146_v42  ;;  %v3147_v3 = vunpack.i.l.bf16 %v3146_v42 }
 0x1bc   : > { %v3201_v35 = vpop.permute.xlu2 %3200 }
 0x1bd   : > { %2639 = vmatmul.msk.bf16.vlgmr.msra.gmra.mxu2 %vm2147_vm11, %v2119_v8  ;;  %v2023_v26 = vsel %vm2012_vm8, %v4374_v43, %v3147_v3  ;;  %v2024_v2 = vsel %vm2012_vm8, %v4378_v33, %v3148_v31 }
 0x1be   : > { %v2056_v20 = vsel %vm2045_vm9, %v2023_v26, %v3157_v9  ;;  %v2057_v27 = vsel %vm2045_vm9, %v2024_v2, %v3158_v36 }
 0x1bf   : > { %v3151_v12 = vpop.permute.xlu1 %3150 }
 0x1c0   : > { %v3153_v11 = vunpack.i.h.bf16 %v3151_v12  ;;  %v3152_v10 = vunpack.i.l.bf16 %v3151_v12  ;;  %v3188_v12 = vunpack.i.h.bf16 %v3186_v50 }
 0x1c2   : > { %v2050_v23 = vsel %vm2045_vm9, %v2017_v62, %v3152_v10  ;;  %v2051_v5 = vsel %vm2045_vm9, %v2018_v60, %v3153_v11  ;;  %v3161_v49 = vpop.permute.xlu0 %3160  ;;  %v3187_v11 = vunpack.i.l.bf16 %v3186_v50 }
 0x1c3   : > { %v3163_v54 = vunpack.i.h.bf16 %v3161_v49  ;;  %v3162_v55 = vunpack.i.l.bf16 %v3161_v49 }
 0x1c4   : > { %v3216_v10 = vpop.permute.xlu2 %3215 }
 0x1c5   : > { %v2083_v7 = vsel %vm2078_vm10, %v2050_v23, %v3162_v55  ;;  %v2084_v44 = vsel %vm2078_vm10, %v2051_v5, %v3163_v54 }
 0x1c6   : > { %v2113_v53 = vpack.c.bf16 %v2084_v44, %v2083_v7  ;;  %v3202_v7 = vunpack.i.l.bf16 %v3201_v35 }
 0x1c7   : > { %v3166_v52 = vpop.permute.xlu1 %3165 }
 0x1c8   : > { %2633 = vmatmul.msk.bf16.gmra.mxu0 %vm2147_vm11, %v2113_v53  ;;  %v3168_v39 = vunpack.i.h.bf16 %v3166_v52  ;;  %v3167_v41 = vunpack.i.l.bf16 %v3166_v52  ;;  %v2019_v53 = vsel %vm2012_vm8, %v4363_v51, %v3202_v7 }
 0x1ca   : > { %v3176_v59 = vpop.permute.xlu0 %3175  ;;  %v2089_v14 = vsel %vm2078_vm10, %v2056_v20, %v3167_v41  ;;  %v2090_v6 = vsel %vm2078_vm10, %v2057_v27, %v3168_v39 }
 0x1cb   : > { %v2116_v43 = vpack.c.bf16 %v2090_v6, %v2089_v14  ;;  %v3178_v42 = vunpack.i.h.bf16 %v3176_v59  ;;  %v3177_v17 = vunpack.i.l.bf16 %v3176_v59 }
 0x1cd   : > { %2636 = vmatmul.msk.bf16.gmra.mxu1 %vm2147_vm11, %v2116_v43  ;;  %v2037_v19 = vsel %vm2012_vm8, %v4426_v38, %v3177_v17  ;;  %v2038_v30 = vsel %vm2012_vm8, %v4430_v56, %v3178_v42  ;;  %v3203_v38 = vunpack.i.h.bf16 %v3201_v35  ;;  %v3231_v56 = vpop.permute.xlu2 %3230  ;;  %v3218_v35 = vunpack.i.h.bf16 %v3216_v10 }
 0x1ce   : > { %v2070_v49 = vsel %vm2045_vm9, %v2037_v19, %v3187_v11  ;;  %v2071_v50 = vsel %vm2045_vm9, %v2038_v30, %v3188_v12  ;;  %v3217_v43 = vunpack.i.l.bf16 %v3216_v10 }
 0x1cf   : > { %v3181_v33 = vpop.permute.xlu1 %3180  ;;  %v2020_v52 = vsel %vm2012_vm8, %v4367_v22, %v3203_v38 }
 0x1d0   : > { %v3183_v24 = vunpack.i.h.bf16 %v3181_v33  ;;  %v3182_v57 = vunpack.i.l.bf16 %v3181_v33 }
 0x1d2   : > { %v2064_v13 = vsel %vm2045_vm9, %v2031_v0, %v3182_v57  ;;  %v2065_v8 = vsel %vm2045_vm9, %v2032_v61, %v3183_v24  ;;  %v3191_v28 = vpop.permute.xlu0 %3190 }
 0x1d3   : > { %v3193_v16 = vunpack.i.h.bf16 %v3191_v28  ;;  %v3192_v1 = vunpack.i.l.bf16 %v3191_v28 }
 0x1d5   : > { %v2097_v62 = vsel %vm2078_vm10, %v2064_v13, %v3192_v1  ;;  %v2098_v60 = vsel %vm2078_vm10, %v2065_v8, %v3193_v16  ;;  %v3246_v61 = vpop.permute.xlu2 %3245  ;;  %v3233_v16 = vunpack.i.h.bf16 %v3231_v56  ;;  %v3232_v1 = vunpack.i.l.bf16 %v3231_v56 }
 0x1d6   : > { %v2120_v31 = vpack.c.bf16 %v2098_v60, %v2097_v62 }
 0x1d7   : > { %v3196_v3 = vpop.permute.xlu1 %3195  ;;  %v2033_v10 = vsel %vm2012_vm8, %v4335_v29, %v3232_v1  ;;  %v2034_v62 = vsel %vm2012_vm8, %v4338_v4, %v3233_v16 }
 0x1d8   : > { %2640 = vmatmul.msk.bf16.gmra.mxu2 %vm2147_vm11, %v2120_v31  ;;  %v3198_v23 = vunpack.i.h.bf16 %v3196_v3  ;;  %v3197_v5 = vunpack.i.l.bf16 %v3196_v3 }
 0x1da   : > { %v3206_v54 = vpop.permute.xlu0 %3205  ;;  %v2103_v55 = vsel %vm2078_vm10, %v2070_v49, %v3197_v5  ;;  %v2104_v36 = vsel %vm2078_vm10, %v2071_v50, %v3198_v23  ;;  %v3248_v50 = vunpack.i.h.bf16 %v3246_v61 }
 0x1db   : > { %v2123_v9 = vpack.c.bf16 %v2104_v36, %v2103_v55  ;;  %v3208_v39 = vunpack.i.h.bf16 %v3206_v54  ;;  %v3207_v41 = vunpack.i.l.bf16 %v3206_v54  ;;  %v3247_v54 = vunpack.i.l.bf16 %v3246_v61 }
 0x1dd   : > { %2643 = vmatmul.msk.bf16.vlgmr.msra.gmra.mxu3 %vm2147_vm11, %v2123_v9  ;;  %v2025_v51 = vsel %vm2012_vm8, %v4387_v58, %v3207_v41  ;;  %v2026_v22 = vsel %vm2012_vm8, %v4391_v63, %v3208_v39  ;;  %v3261_v23 = vpop.permute.xlu2 %3260 }
 0x1de   : > { %v2058_v42 = vsel %vm2045_vm9, %v2025_v51, %v3217_v43  ;;  %v2059_v17 = vsel %vm2045_vm9, %v2026_v22, %v3218_v35  ;;  %v3262_v41 = vunpack.i.l.bf16 %v3261_v23 }
 0x1df   : > { %v3211_v44 = vpop.permute.xlu1 %3210 }
 0x1e0   : > { %v3213_v26 = vunpack.i.h.bf16 %v3211_v44  ;;  %v3212_v2 = vunpack.i.l.bf16 %v3211_v44 }
 0x1e2   : > { %v2052_v20 = vsel %vm2045_vm9, %v2019_v53, %v3212_v2  ;;  %v2053_v27 = vsel %vm2045_vm9, %v2020_v52, %v3213_v26  ;;  %v3221_v59 = vpop.permute.xlu0 %3220 }
 0x1e3   : > { %v3223_v14 = vunpack.i.h.bf16 %v3221_v59  ;;  %v3222_v6 = vunpack.i.l.bf16 %v3221_v59 }
 0x1e5   : > { %v2085_v48 = vsel %vm2078_vm10, %v2052_v20, %v3222_v6  ;;  %v2086_v47 = vsel %vm2078_vm10, %v2053_v27, %v3223_v14  ;;  %v3276_v20 = vpop.permute.xlu2 %3275  ;;  %v2027_v14 = vsel %vm2012_vm8, %v4312_v25, %v3262_v41 }
 0x1e6   : > { %v2114_v33 = vpack.c.bf16 %v2086_v47, %v2085_v48 }
 0x1e7   : > { %v3226_v24 = vpop.permute.xlu1 %3225 }
 0x1e8   : > { %2634 = vmatmul.msk.bf16.gmra.mxu0 %vm2147_vm11, %v2114_v33  ;;  %v3228_v57 = vunpack.i.h.bf16 %v3226_v24  ;;  %v3227_v0 = vunpack.i.l.bf16 %v3226_v24 }
 0x1ea   : > { %v3236_v13 = vpop.permute.xlu0 %3235  ;;  %v2091_v8 = vsel %vm2078_vm10, %v2058_v42, %v3227_v0  ;;  %v2092_v28 = vsel %vm2078_vm10, %v2059_v17, %v3228_v57  ;;  %v3278_v57 = vunpack.i.h.bf16 %v3276_v20  ;;  %v3277_v0 = vunpack.i.l.bf16 %v3276_v20 }
 0x1eb   : > { %v2117_v58 = vpack.c.bf16 %v2092_v28, %v2091_v8  ;;  %v3238_v60 = vunpack.i.h.bf16 %v3236_v13  ;;  %v3237_v19 = vunpack.i.l.bf16 %v3236_v13 }
 0x1ec   : > { %v2035_v17 = vsel %vm2012_vm8, %v4414_v32, %v3277_v0  ;;  %v2036_v13 = vsel %vm2012_vm8, %v4418_v15, %v3278_v57 }
 0x1ed   : > { %2637 = vmatmul.msk.bf16.gmra.mxu1 %vm2147_vm11, %v2117_v58  ;;  %v2039_v29 = vsel %vm2012_vm8, %v4352_v21, %v3237_v19  ;;  %v2040_v4 = vsel %vm2012_vm8, %v4355_v45, %v3238_v60  ;;  %v3263_v21 = vunpack.i.h.bf16 %v3261_v23  ;;  %v3291_v25 = vpop.permute.xlu2 %3290 }
 0x1ee   : > { %v2072_v44 = vsel %vm2045_vm9, %v2039_v29, %v3247_v54  ;;  %v2073_v26 = vsel %vm2045_vm9, %v2040_v4, %v3248_v50 }
 0x1ef   : > { %v3241_v63 = vpop.permute.xlu1 %3240  ;;  %v2028_v6 = vsel %vm2012_vm8, %v4315_v18, %v3263_v21 }
 0x1f0   : > { %v3243_v12 = vunpack.i.h.bf16 %v3241_v63  ;;  %v3242_v11 = vunpack.i.l.bf16 %v3241_v63 }
 0x1f2   : > { %v2066_v30 = vsel %vm2045_vm9, %v2033_v10, %v3242_v11  ;;  %v2067_v31 = vsel %vm2045_vm9, %v2034_v62, %v3243_v12  ;;  %v3251_v3 = vpop.permute.xlu0 %3250  ;;  %v3293_v11 = vunpack.i.h.bf16 %v3291_v25  ;;  %v3292_v10 = vunpack.i.l.bf16 %v3291_v25 }
 0x1f3   : > { %v3253_v5 = vunpack.i.h.bf16 %v3251_v3  ;;  %v3252_v49 = vunpack.i.l.bf16 %v3251_v3 }
 0x1f5   : > { %v2099_v55 = vsel %vm2078_vm10, %v2066_v30, %v3252_v49  ;;  %v2100_v36 = vsel %vm2078_vm10, %v2067_v31, %v3253_v5  ;;  %v3306_v23 = vpop.permute.xlu2 %3305 }
 0x1f6   : > { %v2121_v9 = vpack.c.bf16 %v2100_v36, %v2099_v55  ;;  %v3308_v36 = vunpack.i.h.bf16 %v3306_v23 }
 0x1f7   : > { %v3256_v38 = vpop.permute.xlu1 %3255 }
 0x1f8   : > { %2641 = vmatmul.msk.bf16.gmra.mxu2 %vm2147_vm11, %v2121_v9  ;;  %v3258_v7 = vunpack.i.h.bf16 %v3256_v38  ;;  %v3257_v56 = vunpack.i.l.bf16 %v3256_v38 }
 0x1fa   : > { %v3266_v2 = vpop.permute.xlu0 %3265  ;;  %v2105_v53 = vsel %vm2078_vm10, %v2072_v44, %v3257_v56  ;;  %v2106_v52 = vsel %vm2078_vm10, %v2073_v26, %v3258_v7  ;;  %v2044_v7 = vsel %vm2012_vm8, %v4451_v46, %v3308_v36 }
 0x1fb   : > { %v2124_v39 = vpack.c.bf16 %v2106_v52, %v2105_v53  ;;  %v3268_v45 = vunpack.i.h.bf16 %v3266_v2  ;;  %v3267_v27 = vunpack.i.l.bf16 %v3266_v2 }
 0x1fd   : > { %2644 = vmatmul.msk.bf16.gmra.mxu3 %vm2147_vm11, %v2124_v39  ;;  %v2060_v48 = vsel %vm2045_vm9, %v2027_v14, %v3267_v27  ;;  %v2061_v47 = vsel %vm2045_vm9, %v2028_v6, %v3268_v45 }
 0x1ff   : > { %v3271_v59 = vpop.permute.xlu1 %3270 }
 0x200   : > { %v3273_v35 = vunpack.i.h.bf16 %v3271_v59  ;;  %v3272_v43 = vunpack.i.l.bf16 %v3271_v59 }
 0x202   : > { %v3281_v51 = vpop.permute.xlu0 %3280  ;;  %v2093_v22 = vsel %vm2078_vm10, %v2060_v48, %v3272_v43  ;;  %v2094_v33 = vsel %vm2078_vm10, %v2061_v47, %v3273_v35 }
 0x203   : > { %v2118_v24 = vpack.c.bf16 %v2094_v33, %v2093_v22  ;;  %v3283_v8 = vunpack.i.h.bf16 %v3281_v51  ;;  %v3282_v28 = vunpack.i.l.bf16 %v3281_v51 }
 0x205   : > { %2638 = vmatmul.msk.bf16.gmra.mxu1 %vm2147_vm11, %v2118_v24  ;;  %v2041_v32 = vsel %vm2012_vm8, %v4435_v37, %v3282_v28  ;;  %v2042_v15 = vsel %vm2012_vm8, %v4439_v40, %v3283_v8  ;;  %v3307_v40 = vunpack.i.l.bf16 %v3306_v23 }
 0x206   : > { %v2074_v5 = vsel %vm2045_vm9, %v2041_v32, %v3292_v10  ;;  %v2075_v49 = vsel %vm2045_vm9, %v2042_v15, %v3293_v11 }
 0x207   : > { %v3286_v61 = vpop.permute.xlu1 %3285  ;;  %v2043_v38 = vsel %vm2012_vm8, %v4447_v34, %v3307_v40 }
 0x208   : > { %v3288_v42 = vunpack.i.h.bf16 %v3286_v61  ;;  %v3287_v18 = vunpack.i.l.bf16 %v3286_v61 }
 0x20a   : > { %v2068_v58 = vsel %vm2045_vm9, %v2035_v17, %v3287_v18  ;;  %v2069_v16 = vsel %vm2045_vm9, %v2036_v13, %v3288_v42  ;;  %v3296_v1 = vpop.permute.xlu0 %3295 }
 0x20b   : > { %v3298_v63 = vunpack.i.h.bf16 %v3296_v1  ;;  %v3297_v12 = vunpack.i.l.bf16 %v3296_v1 }
 0x20d   : > { %v2101_v62 = vsel %vm2078_vm10, %v2068_v58, %v3297_v12  ;;  %v2102_v60 = vsel %vm2078_vm10, %v2069_v16, %v3298_v63 }
 0x20e   : > { %v2122_v19 = vpack.c.bf16 %v2102_v60, %v2101_v62 }
 0x20f   : > { %v3301_v30 = vpop.permute.xlu1 %3300 }
 0x210   : > { %2642 = vmatmul.msk.bf16.gmra.mxu2 %vm2147_vm11, %v2122_v19  ;;  %v3303_v31 = vunpack.i.h.bf16 %v3301_v30  ;;  %v3302_v3 = vunpack.i.l.bf16 %v3301_v30 }
 0x212   : > { %v3311_v50 = vpop.permute.xlu0 %3310  ;;  %v2107_v54 = vsel %vm2078_vm10, %v2074_v5, %v3302_v3  ;;  %v2108_v55 = vsel %vm2078_vm10, %v2075_v49, %v3303_v31 }
 0x213   : > { %v2125_v37 = vpack.c.bf16 %v2108_v55, %v2107_v54  ;;  %v3313_v29 = vunpack.i.h.bf16 %v3311_v50  ;;  %v3312_v4 = vunpack.i.l.bf16 %v3311_v50 }
 0x215   : > { %2645 = vmatmul.msk.bf16.gmra.mxu3 %vm2147_vm11, %v2125_v37  ;;  %v2076_v26 = vsel %vm2045_vm9, %v2043_v38, %v3312_v4  ;;  %v2077_v2 = vsel %vm2045_vm9, %v2044_v7, %v3313_v29 }
 0x217   : > { %v3316_v9 = vpop.permute.xlu1 %3315 }
 0x218   : > { %v3318_v56 = vunpack.i.h.bf16 %v3316_v9  ;;  %v3317_v44 = vunpack.i.l.bf16 %v3316_v9 }
 0x21a   : > { %v2109_v53 = vsel %vm2078_vm10, %v2076_v26, %v3317_v44  ;;  %v2110_v52 = vsel %vm2078_vm10, %v2077_v2, %v3318_v56 }
 0x21b   : > { %v2126_v39 = vpack.c.bf16 %v2110_v52, %v2109_v53 }
 0x222   : > { %v2209_v34 = vpop.f32.mrf.mxu0 }
 0x223   : > { %v2289_v46 = vpack.c.bf16 %v2209_v34, %v2209_v34  ;;  %v2425_v21 = vmul.f32 %v2209_v34, %v2209_v34  ;;  %v2354_v20 = vsel %vm430_vm0, %v2209_v34, 0.0 }
 0x225   : > { %2322 = vst.msk [vmem:[%s4637_s14] sm:$0xf] %vm2321_vm12, %v2289_v46  ;;  %2646 = vmatmul.msk.bf16.gmra.mxu3 %vm2147_vm11, %v2126_v39  ;;  %v2457_v6 = vsel %vm430_vm0, %v2425_v21, 0.0 }
 0x22a   : > { %v2211_v41 = vpop.f32.mrf.mxu0 }
 0x22b   : > { %v2290_v45 = vpack.c.bf16 %v2211_v41, %v2211_v41  ;;  %v2355_v27 = vsel %vm430_vm0, %v2211_v41, 0.0  ;;  %v2426_v59 = vmul.f32 %v2211_v41, %v2211_v41 }
 0x22c   : > { %v2356_v14 = vadd.f32 %v2355_v27, %v2354_v20 }
 0x22d   : > { %2323 = vst.msk [vmem:[%s4637_s14 + $0x4] sm:$0xf] %vm2321_vm12, %v2290_v45  ;;  %v2458_v35 = vsel %vm430_vm0, %v2426_v59, 0.0 }
 0x22e   : > { %v2459_v43 = vadd.f32 %v2458_v35, %v2457_v6 }
 0x232   : > { %v2214_v48 = vpop.f32.mrf.mxu0  ;;  %v4648_v47 = vpop.f32.mrf.mxu1 }
 0x233   : > { %v2291_v51 = vpack.c.bf16 %v2214_v48, %v2214_v48  ;;  %v2357_v22 = vsel %vm430_vm0, %v2214_v48, 0.0  ;;  %v2427_v33 = vmul.f32 %v2214_v48, %v2214_v48  ;;  %v2297_v24 = vpack.c.bf16 %v4648_v47, %v4648_v47 }
 0x234   : > { %v2358_v57 = vadd.f32 %v2357_v22, %v2356_v14  ;;  %v2433_v45 = vmul.f32 %v4648_v47, %v4648_v47 }
 0x235   : > { %2324 = vst.msk [vmem:[%s4637_s14 + $0x8] sm:$0xf] %vm2321_vm12, %v2291_v51  ;;  %v2460_v0 = vsel %vm430_vm0, %v2427_v33, 0.0 }
 0x236   : > { %v2461_v25 = vadd.f32 %v2460_v0, %v2459_v43  ;;  %2330 = vst.msk [vmem:[%s4637_s14 + $0x20] sm:$0xf] %vm2321_vm12, %v2297_v24  ;;  %v2369_v43 = vsel %vm430_vm0, %v4648_v47, 0.0  ;;  %v2472_v24 = vsel %vm430_vm0, %v2433_v45, 0.0 }
 0x23a   : > { %v2216_v61 = vpop.f32.mrf.mxu0  ;;  %v4658_v42 = vpop.f32.mrf.mxu1 }
 0x23b   : > { %v2292_v18 = vpack.c.bf16 %v2216_v61, %v2216_v61  ;;  %v2298_v17 = vpack.c.bf16 %v4658_v42, %v4658_v42  ;;  %v2428_v31 = vmul.f32 %v2216_v61, %v2216_v61  ;;  %v2359_v23 = vsel %vm430_vm0, %v2216_v61, 0.0 }
 0x23c   : > { %v2360_v40 = vadd.f32 %v2359_v23, %v2358_v57  ;;  %v2434_v48 = vmul.f32 %v4658_v42, %v4658_v42  ;;  %v2371_v57 = vsel %vm430_vm0, %v4658_v42, 0.0 }
 0x23d   : > { %2325 = vst.msk [vmem:[%s4637_s14 + $0xc] sm:$0xf] %vm2321_vm12, %v2292_v18  ;;  %v2462_v54 = vsel %vm430_vm0, %v2428_v31, 0.0 }
 0x23e   : > { %2331 = vst.msk [vmem:[%s4637_s14 + $0x24] sm:$0xf] %vm2321_vm12, %v2298_v17  ;;  %v2463_v7 = vadd.f32 %v2462_v54, %v2461_v25  ;;  %v2474_v47 = vsel %vm430_vm0, %v2434_v48, 0.0 }
 0x240   : > { %v4666_v13 = vpop.f32.mrf.mxu2 }
 0x241   : > { %v2305_v8 = vpack.c.bf16 %v4666_v13, %v4666_v13 }
 0x243   : > { %2338 = vst.msk [vmem:[%s4637_s14 + $0x40] sm:$0xf] %vm2321_vm12, %v2305_v8 }
 0x245   : > { %v2219_v28 = vpop.f32.mrf.mxu0 }
 0x246   : > { %v2293_v58 = vpack.c.bf16 %v2219_v28, %v2219_v28  ;;  %v2429_v5 = vmul.f32 %v2219_v28, %v2219_v28  ;;  %v2361_v55 = vsel %vm430_vm0, %v2219_v28, 0.0 }
 0x247   : > { %v2362_v56 = vadd.f32 %v2361_v55, %v2360_v40 }
 0x248   : > { %2326 = vst.msk [vmem:[%s4637_s14 + $0x10] sm:$0xf] %vm2321_vm12, %v2293_v58  ;;  %v4674_v16 = vpop.f32.mrf.mxu2  ;;  %v2464_v29 = vsel %vm430_vm0, %v2429_v5, 0.0 }
 0x249   : > { %v2306_v1 = vpack.c.bf16 %v4674_v16, %v4674_v16  ;;  %v2465_v52 = vadd.f32 %v2464_v29, %v2463_v7 }
 0x24a   : > { %v4678_v63 = vpop.f32.mrf.mxu1 }
 0x24b   : > { %2339 = vst.msk [vmem:[%s4637_s14 + $0x44] sm:$0xf] %vm2321_vm12, %v2306_v1  ;;  %v2299_v12 = vpack.c.bf16 %v4678_v63, %v4678_v63  ;;  %v2435_v8 = vmul.f32 %v4678_v63, %v4678_v63  ;;  %v2373_v28 = vsel %vm430_vm0, %v4678_v63, 0.0 }
 0x24d   : > { %2332 = vst.msk [vmem:[%s4637_s14 + $0x28] sm:$0xf] %vm2321_vm12, %v2299_v12  ;;  %v2221_v11 = vpop.f32.mrf.mxu0  ;;  %v2476_v12 = vsel %vm430_vm0, %v2435_v8, 0.0 }
 0x24e   : > { %v2294_v10 = vpack.c.bf16 %v2221_v11, %v2221_v11  ;;  %v2430_v37 = vmul.f32 %v2221_v11, %v2221_v11  ;;  %v2363_v4 = vsel %vm430_vm0, %v2221_v11, 0.0 }
 0x24f   : > { %v2364_v39 = vadd.f32 %v2363_v4, %v2362_v56 }
 0x250   : > { %2327 = vst.msk [vmem:[%s4637_s14 + $0x14] sm:$0xf] %vm2321_vm12, %v2294_v10  ;;  %v2466_v26 = vsel %vm430_vm0, %v2430_v37, 0.0 }
 0x251   : > { %v2467_v21 = vadd.f32 %v2466_v26, %v2465_v52 }
 0x252   : > { %v4688_v62 = vpop.f32.mrf.mxu1 }
 0x253   : > { %v2300_v60 = vpack.c.bf16 %v4688_v62, %v4688_v62  ;;  %v2436_v11 = vmul.f32 %v4688_v62, %v4688_v62 }
 0x255   : > { %2333 = vst.msk [vmem:[%s4637_s14 + $0x2c] sm:$0xf] %vm2321_vm12, %v2300_v60  ;;  %v2375_v60 = vsel %vm430_vm0, %v4688_v62, 0.0 }
 0x25b   : > { %v4694_v32 = vpop.f32.mrf.mxu2 }
 0x25c   : > { %v2307_v15 = vpack.c.bf16 %v4694_v32, %v4694_v32 }
 0x25e   : > { %2340 = vst.msk [vmem:[%s4637_s14 + $0x48] sm:$0xf] %vm2321_vm12, %v2307_v15 }
 0x260   : > { %v4700_v19 = vpop.f32.mrf.mxu3 }
 0x261   : > { %v2313_v30 = vpack.c.bf16 %v4700_v19, %v4700_v19 }
 0x263   : > { %2346 = vst.msk [vmem:[%s4637_s14 + $0x60] sm:$0xf] %vm2321_vm12, %v2313_v30  ;;  %v4706_v3 = vpop.f32.mrf.mxu2  ;;  %v2478_v30 = vsel %vm430_vm0, %v2436_v11, 0.0 }
 0x264   : > { %v2308_v49 = vpack.c.bf16 %v4706_v3, %v4706_v3 }
 0x265   : > { %v2224_v50 = vpop.f32.mrf.mxu0 }
 0x266   : > { %2341 = vst.msk [vmem:[%s4637_s14 + $0x4c] sm:$0xf] %vm2321_vm12, %v2308_v49  ;;  %v2295_v36 = vpack.c.bf16 %v2224_v50, %v2224_v50  ;;  %v2431_v9 = vmul.f32 %v2224_v50, %v2224_v50  ;;  %v2365_v2 = vsel %vm430_vm0, %v2224_v50, 0.0 }
 0x267   : > { %v2366_v41 = vadd.f32 %v2365_v2, %v2364_v39 }
 0x268   : > { %2328 = vst.msk [vmem:[%s4637_s14 + $0x18] sm:$0xf] %vm2321_vm12, %v2295_v36  ;;  %v4719_v38 = vpop.f32.mrf.mxu3  ;;  %v2468_v46 = vsel %vm430_vm0, %v2431_v9, 0.0 }
 0x269   : > { %v2314_v44 = vpack.c.bf16 %v4719_v38, %v4719_v38  ;;  %v2469_v6 = vadd.f32 %v2468_v46, %v2467_v21  ;;  %v2441_v46 = vmul.f32 %v4666_v13, %v4666_v13 }
 0x26a   : > { %v2239_v53 = vpop.f32.mrf.mxu1 }
 0x26b   : > { %2347 = vst.msk [vmem:[%s4637_s14 + $0x64] sm:$0xf] %vm2321_vm12, %v2314_v44  ;;  %v2301_v34 = vpack.c.bf16 %v2239_v53, %v2239_v53  ;;  %v2437_v31 = vmul.f32 %v2239_v53, %v2239_v53  ;;  %v2377_v50 = vsel %vm430_vm0, %v2239_v53, 0.0  ;;  %v2488_v48 = vsel %vm430_vm0, %v2441_v46, 0.0 }
 0x26d   : > { %2334 = vst.msk [vmem:[%s4637_s14 + $0x30] sm:$0xf] %vm2321_vm12, %v2301_v34  ;;  %v2226_v20 = vpop.f32.mrf.mxu0  ;;  %v2480_v36 = vsel %vm430_vm0, %v2437_v31, 0.0 }
 0x26e   : > { %v2296_v27 = vpack.c.bf16 %v2226_v20, %v2226_v20  ;;  %v2367_v59 = vsel %vm430_vm0, %v2226_v20, 0.0  ;;  %v2432_v14 = vmul.f32 %v2226_v20, %v2226_v20 }
 0x26f   : > { %v2368_v35 = vadd.f32 %v2367_v59, %v2366_v41  ;;  %v2385_v59 = vsel %vm430_vm0, %v4666_v13, 0.0 }
 0x270   : > { %2329 = vst.msk [vmem:[%s4637_s14 + $0x1c] sm:$0xf] %vm2321_vm12, %v2296_v27  ;;  %v2470_v51 = vsel %vm430_vm0, %v2432_v14, 0.0  ;;  %v2442_v14 = vmul.f32 %v4674_v16, %v4674_v16 }
 0x271   : > { %v2370_v22 = vadd.f32 %v2369_v43, %v2368_v35  ;;  %v2471_v33 = vadd.f32 %v2470_v51, %v2469_v6  ;;  %v2387_v51 = vsel %vm430_vm0, %v4674_v16, 0.0  ;;  %v2391_v16 = vsel %vm430_vm0, %v4706_v3, 0.0 }
 0x272   : > { %v2241_v0 = vpop.f32.mrf.mxu1  ;;  %v2490_v13 = vsel %vm430_vm0, %v2442_v14, 0.0 }
 0x273   : > { %v2372_v25 = vadd.f32 %v2371_v57, %v2370_v22  ;;  %v2473_v61 = vadd.f32 %v2472_v24, %v2471_v33  ;;  %v2302_v18 = vpack.c.bf16 %v2241_v0, %v2241_v0  ;;  %v2438_v40 = vmul.f32 %v2241_v0, %v2241_v0 }
 0x274   : > { %v2379_v9 = vsel %vm430_vm0, %v2241_v0, 0.0  ;;  %v2443_v22 = vmul.f32 %v4694_v32, %v4694_v32  ;;  %v2389_v57 = vsel %vm430_vm0, %v4694_v32, 0.0  ;;  %v2444_v0 = vmul.f32 %v4706_v3, %v4706_v3 }
 0x275   : > { %v2475_v17 = vadd.f32 %v2474_v47, %v2473_v61  ;;  %2335 = vst.msk [vmem:[%s4637_s14 + $0x34] sm:$0xf] %vm2321_vm12, %v2302_v18  ;;  %v2374_v42 = vadd.f32 %v2373_v28, %v2372_v25  ;;  %v2482_v26 = vsel %vm430_vm0, %v2438_v40, 0.0 }
 0x276   : > { %v2492_v18 = vsel %vm430_vm0, %v2443_v22, 0.0 }
 0x277   : > { %v2477_v10 = vadd.f32 %v2476_v12, %v2475_v17  ;;  %v2376_v63 = vadd.f32 %v2375_v60, %v2374_v42 }
 0x279   : > { %v2479_v5 = vadd.f32 %v2478_v30, %v2477_v10  ;;  %v2378_v62 = vadd.f32 %v2377_v50, %v2376_v63 }
 0x27b   : > { %v4750_v58 = vpop.f32.mrf.mxu2  ;;  %v2481_v4 = vadd.f32 %v2480_v36, %v2479_v5  ;;  %v2380_v56 = vadd.f32 %v2379_v9, %v2378_v62  ;;  %v2449_v62 = vmul.f32 %v4700_v19, %v4700_v19 }
 0x27c   : > { %v2309_v1 = vpack.c.bf16 %v4750_v58, %v4750_v58  ;;  %v2445_v47 = vmul.f32 %v4750_v58, %v4750_v58  ;;  %v2393_v32 = vsel %vm430_vm0, %v4750_v58, 0.0 }
 0x27d   : > { %v2483_v52 = vadd.f32 %v2482_v26, %v2481_v4 }
 0x27e   : > { %2342 = vst.msk [vmem:[%s4637_s14 + $0x50] sm:$0xf] %vm2321_vm12, %v2309_v1  ;;  %v2494_v1 = vsel %vm430_vm0, %v2444_v0, 0.0  ;;  %v2496_v3 = vsel %vm430_vm0, %v2445_v47, 0.0 }
 0x280   : > { %v4761_v15 = vpop.f32.mrf.mxu3 }
 0x281   : > { %v2315_v23 = vpack.c.bf16 %v4761_v15, %v4761_v15 }
 0x282   : > { %v2244_v49 = vpop.f32.mrf.mxu1 }
 0x283   : > { %2348 = vst.msk [vmem:[%s4637_s14 + $0x68] sm:$0xf] %vm2321_vm12, %v2315_v23  ;;  %v2261_v54 = vpop.f32.mrf.mxu2  ;;  %v2303_v55 = vpack.c.bf16 %v2244_v49, %v2244_v49  ;;  %v2439_v29 = vmul.f32 %v2244_v49, %v2244_v49  ;;  %v2381_v7 = vsel %vm430_vm0, %v2244_v49, 0.0 }
 0x284   : > { %v2310_v37 = vpack.c.bf16 %v2261_v54, %v2261_v54  ;;  %v2382_v39 = vadd.f32 %v2381_v7, %v2380_v56  ;;  %v2446_v12 = vmul.f32 %v2261_v54, %v2261_v54  ;;  %v2395_v60 = vsel %vm430_vm0, %v2261_v54, 0.0 }
 0x285   : > { %2336 = vst.msk [vmem:[%s4637_s14 + $0x38] sm:$0xf] %vm2321_vm12, %v2303_v55  ;;  %v2484_v2 = vsel %vm430_vm0, %v2439_v29, 0.0  ;;  %v2401_v7 = vsel %vm430_vm0, %v4700_v19, 0.0  ;;  %v2450_v56 = vmul.f32 %v4719_v38, %v4719_v38 }
 0x286   : > { %2343 = vst.msk [vmem:[%s4637_s14 + $0x54] sm:$0xf] %vm2321_vm12, %v2310_v37  ;;  %v2485_v45 = vadd.f32 %v2484_v2, %v2483_v52  ;;  %v2498_v5 = vsel %vm430_vm0, %v2446_v12, 0.0  ;;  %v2504_v52 = vsel %vm430_vm0, %v2449_v62, 0.0 }
 0x288   : > { %v4776_v44 = vpop.f32.mrf.mxu3 }
 0x289   : > { %v2316_v53 = vpack.c.bf16 %v4776_v44, %v4776_v44 }
 0x28a   : > { %v2246_v34 = vpop.f32.mrf.mxu1 }
 0x28b   : > { %2349 = vst.msk [vmem:[%s4637_s14 + $0x6c] sm:$0xf] %vm2321_vm12, %v2316_v53  ;;  %v2304_v21 = vpack.c.bf16 %v2246_v34, %v2246_v34  ;;  %v2383_v41 = vsel %vm430_vm0, %v2246_v34, 0.0  ;;  %v2440_v20 = vmul.f32 %v2246_v34, %v2246_v34  ;;  %v2451_v34 = vmul.f32 %v4761_v15, %v4761_v15 }
 0x28c   : > { %v2384_v27 = vadd.f32 %v2383_v41, %v2382_v39  ;;  %v2403_v39 = vsel %vm430_vm0, %v4719_v38, 0.0 }
 0x28d   : > { %2337 = vst.msk [vmem:[%s4637_s14 + $0x3c] sm:$0xf] %vm2321_vm12, %v2304_v21  ;;  %v2486_v6 = vsel %vm430_vm0, %v2440_v20, 0.0  ;;  %v2506_v20 = vsel %vm430_vm0, %v2450_v56, 0.0  ;;  %v2508_v38 = vsel %vm430_vm0, %v2451_v34, 0.0 }
 0x28e   : > { %v2386_v35 = vadd.f32 %v2385_v59, %v2384_v27  ;;  %v2487_v43 = vadd.f32 %v2486_v6, %v2485_v45  ;;  %v2405_v45 = vsel %vm430_vm0, %v4761_v15, 0.0  ;;  %v2452_v27 = vmul.f32 %v4776_v44, %v4776_v44 }
 0x28f   : > { %v2407_v6 = vsel %vm430_vm0, %v4776_v44, 0.0 }
 0x290   : > { %v2388_v33 = vadd.f32 %v2387_v51, %v2386_v35  ;;  %v2489_v24 = vadd.f32 %v2488_v48, %v2487_v43  ;;  %v2510_v51 = vsel %vm430_vm0, %v2452_v27, 0.0 }
 0x292   : > { %v2390_v25 = vadd.f32 %v2389_v57, %v2388_v33  ;;  %v2491_v61 = vadd.f32 %v2490_v13, %v2489_v24 }
 0x293   : > { %v2264_v17 = vpop.f32.mrf.mxu2 }
 0x294   : > { %v2493_v8 = vadd.f32 %v2492_v18, %v2491_v61  ;;  %v2311_v28 = vpack.c.bf16 %v2264_v17, %v2264_v17  ;;  %v2392_v42 = vadd.f32 %v2391_v16, %v2390_v25  ;;  %v2447_v63 = vmul.f32 %v2264_v17, %v2264_v17 }
 0x295   : > { %v2397_v49 = vsel %vm430_vm0, %v2264_v17, 0.0 }
 0x296   : > { %2344 = vst.msk [vmem:[%s4637_s14 + $0x58] sm:$0xf] %vm2321_vm12, %v2311_v28  ;;  %v2394_v11 = vadd.f32 %v2393_v32, %v2392_v42  ;;  %v2495_v10 = vadd.f32 %v2494_v1, %v2493_v8  ;;  %v2500_v37 = vsel %vm430_vm0, %v2447_v63, 0.0 }
 0x298   : > { %v2396_v30 = vadd.f32 %v2395_v60, %v2394_v11  ;;  %v2497_v31 = vadd.f32 %v2496_v3, %v2495_v10  ;;  %v2279_v23 = vpop.f32.mrf.mxu3 }
 0x299   : > { %v2317_v58 = vpack.c.bf16 %v2279_v23, %v2279_v23  ;;  %v2453_v35 = vmul.f32 %v2279_v23, %v2279_v23  ;;  %v2409_v15 = vsel %vm430_vm0, %v2279_v23, 0.0 }
 0x29a   : > { %v2398_v50 = vadd.f32 %v2397_v49, %v2396_v30  ;;  %v2499_v55 = vadd.f32 %v2498_v5, %v2497_v31 }
 0x29b   : > { %2350 = vst.msk [vmem:[%s4637_s14 + $0x70] sm:$0xf] %vm2321_vm12, %v2317_v58  ;;  %v2266_v54 = vpop.f32.mrf.mxu2  ;;  %v2512_v13 = vsel %vm430_vm0, %v2453_v35, 0.0 }
 0x29c   : > { %v2501_v36 = vadd.f32 %v2500_v37, %v2499_v55  ;;  %v2312_v40 = vpack.c.bf16 %v2266_v54, %v2266_v54  ;;  %v2399_v29 = vsel %vm430_vm0, %v2266_v54, 0.0  ;;  %v2448_v4 = vmul.f32 %v2266_v54, %v2266_v54 }
 0x29d   : > { %v2400_v9 = vadd.f32 %v2399_v29, %v2398_v50 }
 0x29e   : > { %2345 = vst.msk [vmem:[%s4637_s14 + $0x5c] sm:$0xf] %vm2321_vm12, %v2312_v40  ;;  %v2502_v26 = vsel %vm430_vm0, %v2448_v4, 0.0 }
 0x29f   : > { %v2402_v2 = vadd.f32 %v2401_v7, %v2400_v9  ;;  %v2503_v53 = vadd.f32 %v2502_v26, %v2501_v36 }
 0x2a0   : > { %v2281_v46 = vpop.f32.mrf.mxu3 }
 0x2a1   : > { %v2404_v19 = vadd.f32 %v2403_v39, %v2402_v2  ;;  %v2505_v21 = vadd.f32 %v2504_v52, %v2503_v53  ;;  %v2318_v41 = vpack.c.bf16 %v2281_v46, %v2281_v46  ;;  %v2454_v57 = vmul.f32 %v2281_v46, %v2281_v46 }
 0x2a2   : > { %v2411_v61 = vsel %vm430_vm0, %v2281_v46, 0.0 }
 0x2a3   : > { %v2406_v59 = vadd.f32 %v2405_v45, %v2404_v19  ;;  %v2507_v14 = vadd.f32 %v2506_v20, %v2505_v21  ;;  %2351 = vst.msk [vmem:[%s4637_s14 + $0x74] sm:$0xf] %vm2321_vm12, %v2318_v41  ;;  %v2514_v16 = vsel %vm430_vm0, %v2454_v57, 0.0 }
 0x2a5   : > { %v2509_v43 = vadd.f32 %v2508_v38, %v2507_v14  ;;  %v2408_v48 = vadd.f32 %v2407_v6, %v2406_v59 }
 0x2a7   : > { %v2511_v22 = vadd.f32 %v2510_v51, %v2509_v43  ;;  %v2410_v33 = vadd.f32 %v2409_v15, %v2408_v48 }
 0x2a8   : > { %v2284_v24 = vpop.f32.mrf.mxu3 }
 0x2a9   : > { %v2319_v0 = vpack.c.bf16 %v2284_v24, %v2284_v24  ;;  %v2513_v25 = vadd.f32 %v2512_v13, %v2511_v22  ;;  %v2455_v44 = vmul.f32 %v2284_v24, %v2284_v24  ;;  %v2412_v18 = vadd.f32 %v2411_v61, %v2410_v33 }
 0x2aa   : > { %v2413_v47 = vsel %vm430_vm0, %v2284_v24, 0.0 }
 0x2ab   : > { %2352 = vst.msk [vmem:[%s4637_s14 + $0x78] sm:$0xf] %vm2321_vm12, %v2319_v0  ;;  %v2515_v17 = vadd.f32 %v2514_v16, %v2513_v25  ;;  %v2516_v8 = vsel %vm430_vm0, %v2455_v44, 0.0  ;;  %v2414_v28 = vadd.f32 %v2413_v47, %v2412_v18 }
 0x2ad   : > { %v2517_v11 = vadd.f32 %v2516_v8, %v2515_v17 }
 0x2b0   : > { %v2286_v42 = vpop.f32.mrf.mxu3 }
 0x2b1   : > { %v2320_v1 = vpack.c.bf16 %v2286_v42, %v2286_v42  ;;  %v2415_v32 = vsel %vm430_vm0, %v2286_v42, 0.0  ;;  %v2456_v12 = vmul.f32 %v2286_v42, %v2286_v42 }
 0x2b2   : > { %v2416_v10 = vadd.f32 %v2415_v32, %v2414_v28 }
 0x2b3   : > { %2353 = vst.msk [vmem:[%s4637_s14 + $0x7c] sm:$0xf] %vm2321_vm12, %v2320_v1  ;;  %v2518_v3 = vsel %vm430_vm0, %v2456_v12, 0.0 }
 0x2b4   : > { %v2417_v60 = vrot.slane %v2416_v10, 4  ;;  %v2519_v63 = vadd.f32 %v2518_v3, %v2517_v11 }
 0x2b6   : > { %v2418_v30 = vadd.f32 %v2417_v60, %v2416_v10  ;;  %v2520_v31 = vrot.slane %v2519_v63, 4 }
 0x2b8   : > { %v2419_v23 = vrot.slane %v2418_v30, 2  ;;  %v2521_v5 = vadd.f32 %v2520_v31, %v2519_v63 }
 0x2ba   : > { %v2420_v49 = vadd.f32 %v2419_v23, %v2418_v30  ;;  %v2522_v58 = vrot.slane %v2521_v5, 2 }
 0x2bc   : > { %v2421_v50 = vrot.slane %v2420_v49, 1  ;;  %v2523_v55 = vadd.f32 %v2522_v58, %v2521_v5 }
 0x2be   : > { %v2422_v62 = vadd.f32 %v2421_v50, %v2420_v49  ;;  %v2524_v37 = vrot.slane %v2523_v55, 1 }
 0x2c0   : > { %2424 = vst.msk [vmem:[%s235_s3] sm:$0x1] %vm2423_vm13, %v2422_v62  ;;  %v2525_v54 = vadd.f32 %v2524_v37, %v2523_v55 }
 0x2c2   : > { %2526 = vst.msk [vmem:[%s235_s3 + $0x1] sm:$0x1] %vm2423_vm13, %v2525_v54 }
 0x2c3 PF: > { %s16_s18 = sadd.s32 1, %s3325_s18  }
 0x2c4   : > { %p13_p4 = scmp.ge.s32.totalorder %s16_s18, 4  }
 0x2c6   :  { %15 = sbr.rel (!%p13_p4) target bundleno = 1 (0x1), region = 80 }

</bundles_post_ra>
